<compile_context>
chip_gen: v7x
topology: tpu7x:2x2x1
jax: 0.10.0
libtpu: 0.0.40
codegen_flags: <defaults>
</compile_context>

<pallas_src>
import jax
import jax.numpy as jnp
from jax.experimental import pallas as pl
from jax.experimental.pallas import tpu as pltpu

# ----------------------------- configuration -------------------------------
DIM = 128          # transformer dim
HEAD_DIM = 64      # per-head dim
NUM_HEADS = DIM // HEAD_DIM
DEPTH = 2          # number of decoder blocks
MLP_RATIO = 4.0
MLP_HIDDEN = int(DIM * MLP_RATIO)
B = 2              # batch
N = 8              # target sequence length
M = 16             # context sequence length
EPS = 1e-6
SCALE = HEAD_DIM ** (-0.5)
INV_SQRT2 = 0.7071067811865476

# Weights are cast to bf16 *before* the pallas_call so the BlockSpec DMAs half
# the bytes; the MXU consumes bf16 operands with f32 accumulation.  All
# element-wise math stays f32.
WEIGHT_DTYPE = jnp.bfloat16
MXU_DTYPE = jnp.bfloat16

# Column offsets inside the packed (D, 8*D + MLP_HIDDEN) weight slab:
#   [Wq_s | Wk_s | Wv_s | Wo_s | Wq_c | Wkv_c(2D) | Wo_c | W1]
_QKV_S = (0, 3 * DIM)
_WO_S = (3 * DIM, 4 * DIM)
_WQ_C = (4 * DIM, 5 * DIM)
_WKV_C = (5 * DIM, 7 * DIM)
_WO_C = (7 * DIM, 8 * DIM)
_W1 = (8 * DIM, 8 * DIM + MLP_HIDDEN)
WCOLS = 8 * DIM + MLP_HIDDEN
BCOLS = MLP_HIDDEN + DIM


# ----------------------------- kernel helpers -------------------------------
def _mm(a, b):
    return jnp.dot(a.astype(MXU_DTYPE), b.astype(MXU_DTYPE),
                   preferred_element_type=jnp.float32)


def _qkt(a, b):
    # a: (Lq, hd), b: (Lk, hd) -> (Lq, Lk), expressed as a contraction on the
    # trailing dims so no explicit transpose/relayout is generated.
    return jax.lax.dot_general(
        a.astype(MXU_DTYPE), b.astype(MXU_DTYPE),
        (((1,), (1,)), ((), ())),
        preferred_element_type=jnp.float32)


def _layer_norm(v, gamma):
    mu = jnp.mean(v, axis=-1, keepdims=True)
    c = v - mu
    var = jnp.mean(c * c, axis=-1, keepdims=True)
    return c * jax.lax.rsqrt(var + EPS) * gamma


def _mha(q, k, v, wo):
    """Multi-head attention with the output projection folded per head.

    q: (Lq, D), k/v: (Lk, D), wo: (D, D) -> (Lq, D)
    out = sum_h softmax(q_h k_h^T * scale) @ v_h @ wo[h*hd:(h+1)*hd, :]
    (identical to concat-over-heads followed by @ wo, but avoids the 64-lane
    concatenate and keeps everything as clean matmuls + f32 adds).
    """
    out = None
    for h in range(NUM_HEADS):
        sl = slice(h * HEAD_DIM, (h + 1) * HEAD_DIM)
        a = _qkt(q[:, sl], k[:, sl]) * SCALE
        a = a - jnp.max(a, axis=-1, keepdims=True)
        e = jnp.exp(a)
        inv = pl.reciprocal(jnp.sum(e, axis=-1, keepdims=True), approx=True)
        p = e * inv
        oh = _mm(p, v[:, sl])                 # (Lq, hd)
        contrib = _mm(oh, wo[sl, :])          # (Lq, D) ; 64-row slice is free
        out = contrib if out is None else out + contrib
    return out


# ------------------------------- kernel -------------------------------------
def trunk_kernel(x_ref, ctx_ref, gam_ref, w_ref, w2_ref, bias_ref, o_ref):
    depth = gam_ref.shape[0]                 # static at trace time

    x = x_ref[0].astype(jnp.float32)         # (N, D) carried activation (f32)
    ctx = ctx_ref[0].astype(jnp.float32)     # (M, D)

    # Statically unrolled loop over the decoder layers; all per-layer weights
    # are VMEM-resident (hoisted once via constant-index full-array specs).
    for d in range(depth):
        # ---------------- self-attention + residual ----------------
        xn = _layer_norm(x, gam_ref[d, 0:1])
        qkv = _mm(xn, w_ref[d, :, _QKV_S[0]:_QKV_S[1]])   # fused Q|K|V (N, 3D)
        q = qkv[:, 0:DIM]
        k = qkv[:, DIM:2 * DIM]
        v = qkv[:, 2 * DIM:3 * DIM]
        x = x + _mha(q, k, v, w_ref[d, :, _WO_S[0]:_WO_S[1]])

        # ---------------- cross-attention + residual ---------------
        qn = _layer_norm(x, gam_ref[d, 1:2])
        cn = _layer_norm(ctx, gam_ref[d, 2:3])
        qc = _mm(qn, w_ref[d, :, _WQ_C[0]:_WQ_C[1]])
        kv = _mm(cn, w_ref[d, :, _WKV_C[0]:_WKV_C[1]])    # (M, 2D)
        kc = kv[:, 0:DIM]
        vc = kv[:, DIM:2 * DIM]
        x = x + _mha(qc, kc, vc, w_ref[d, :, _WO_C[0]:_WO_C[1]])

        # ---------------------- MLP + residual ---------------------
        xn = _layer_norm(x, gam_ref[d, 3:4])
        h = _mm(xn, w_ref[d, :, _W1[0]:_W1[1]]) + bias_ref[d, :, 0:MLP_HIDDEN]
        h = 0.5 * h * (1.0 + jax.lax.erf(h * INV_SQRT2))  # exact nn.GELU()
        x = x + _mm(h, w2_ref[d]) + bias_ref[d, :, MLP_HIDDEN:]

    o_ref[0] = x.astype(o_ref.dtype)


# ------------------------------ wrapper --------------------------------------
@jax.jit
def transformer_decoder_trunk(x, context, gammas, w_packed, w2, biases):
    """Fused trunk forward. x: (B, N, D), context: (B, M, D).

    gammas:   (depth, 4, D)  f32   [norm1 | q_norm | c_norm | norm2]
    w_packed: (depth, D, 8*D + H)  bf16  [Wq_s|Wk_s|Wv_s|Wo_s|Wq_c|Wkv_c|Wo_c|W1]
    w2:       (depth, H, D)        bf16
    biases:   (depth, 1, H + D)    f32   [b1 | b2]
    """
    Bb, Nn, D = x.shape
    _, Mm, _ = context.shape
    depth, _, wcols = w_packed.shape
    hid = w2.shape[1]
    bcols = biases.shape[2]

    in_specs = [
        # Per-batch activation / context blocks.
        pl.BlockSpec((1, Nn, D), lambda b: (b, 0, 0)),          # x
        pl.BlockSpec((1, Mm, D), lambda b: (b, 0, 0)),          # context
        # Full depth-stacked parameter slabs, VMEM-hoisted once (constant
        # index_map -> a single prologue DMA per core, no per-step refetch).
        pl.BlockSpec((depth, 4, D), lambda b: (0, 0, 0)),       # LN gammas
        pl.BlockSpec((depth, D, wcols), lambda b: (0, 0, 0)),   # packed weights
        pl.BlockSpec((depth, hid, D), lambda b: (0, 0, 0)),     # W2
        pl.BlockSpec((depth, 1, bcols), lambda b: (0, 0, 0)),   # b1 | b2
    ]
    out_spec = pl.BlockSpec((1, Nn, D), lambda b: (b, 0, 0))

    return pl.pallas_call(
        trunk_kernel,
        out_shape=jax.ShapeDtypeStruct((Bb, Nn, D), x.dtype),
        grid_spec=pltpu.PrefetchScalarGridSpec(
            num_scalar_prefetch=0,
            grid=(Bb,),
            in_specs=in_specs,
            out_specs=out_spec,
        ),
        compiler_params=pltpu.CompilerParams(
            dimension_semantics=("parallel",)),
    )(x, context, gammas, w_packed, w2, biases)


# -------------------------- parameter init / packing -------------------------
def init_layer_params(key):
    ks = jax.random.split(key, 15)
    s = 0.02
    g = lambda k: 1.0 + 0.1 * jax.random.normal(k, (1, DIM), jnp.float32)
    return {
        # LayerNorm gammas (bias disabled, use_bias=False)
        "g1": g(ks[0]), "gq": g(ks[1]), "gc": g(ks[2]), "g2": g(ks[3]),
        # self-attention (qkv_bias=False, proj_bias=False)
        "wq_s": s * jax.random.normal(ks[4], (DIM, DIM), jnp.float32),
        "wk_s": s * jax.random.normal(ks[5], (DIM, DIM), jnp.float32),
        "wv_s": s * jax.random.normal(ks[6], (DIM, DIM), jnp.float32),
        "wo_s": s * jax.random.normal(ks[7], (DIM, DIM), jnp.float32),
        # cross-attention
        "wq_c": s * jax.random.normal(ks[8], (DIM, DIM), jnp.float32),
        "wkv_c": s * jax.random.normal(ks[9], (DIM, 2 * DIM), jnp.float32),
        "wo_c": s * jax.random.normal(ks[10], (DIM, DIM), jnp.float32),
        # MLP (nn.Linear defaults -> biases present)
        "w1": s * jax.random.normal(ks[11], (DIM, MLP_HIDDEN), jnp.float32),
        "b1": s * jax.random.normal(ks[12], (1, MLP_HIDDEN), jnp.float32),
        "w2": s * jax.random.normal(ks[13], (MLP_HIDDEN, DIM), jnp.float32),
        "b2": s * jax.random.normal(ks[14], (1, DIM), jnp.float32),
    }


def pack_params(layer_params):
    gammas = jnp.stack([jnp.concatenate(
        [p["g1"], p["gq"], p["gc"], p["g2"]], axis=0) for p in layer_params])
    # Cast the big slabs to bf16 HERE (before pallas_call) so the BlockSpec
    # DMAs move half the bytes; gammas/biases stay f32 (tiny, keeps LN exact).
    w_packed = jnp.stack([jnp.concatenate(
        [p["wq_s"], p["wk_s"], p["wv_s"], p["wo_s"],
         p["wq_c"], p["wkv_c"], p["wo_c"], p["w1"]], axis=1)
        for p in layer_params]).astype(WEIGHT_DTYPE)
    w2 = jnp.stack([p["w2"] for p in layer_params]).astype(WEIGHT_DTYPE)
    biases = jnp.stack([jnp.concatenate([p["b1"], p["b2"]], axis=1)
                        for p in layer_params])
    return gammas, w_packed, w2, biases


# --------------------------- pure-JAX reference -------------------------------
def _ref_block(x, ctx, p):
    def ln(v, g):
        mu = jnp.mean(v, -1, keepdims=True)
        var = jnp.mean((v - mu) ** 2, -1, keepdims=True)
        return (v - mu) / jnp.sqrt(var + EPS) * g[0]

    def split_heads(t):
        Bb, L, _ = t.shape
        return t.reshape(Bb, L, NUM_HEADS, HEAD_DIM).transpose(0, 2, 1, 3)

    def merge_heads(t):
        Bb, H, L, hd = t.shape
        return t.transpose(0, 2, 1, 3).reshape(Bb, L, H * hd)

    def attn(q, k, v):
        a = jnp.einsum("bhqd,bhkd->bhqk", q, k) * SCALE
        a = jax.nn.softmax(a, axis=-1)
        return jnp.einsum("bhqk,bhkd->bhqd", a, v)

    xn = ln(x, p["g1"])
    q, k, v = (split_heads(xn @ w) for w in (p["wq_s"], p["wk_s"], p["wv_s"]))
    x = x + merge_heads(attn(q, k, v)) @ p["wo_s"]

    qn, cn = ln(x, p["gq"]), ln(ctx, p["gc"])
    q = split_heads(qn @ p["wq_c"])
    kv = cn @ p["wkv_c"]
    k, v = split_heads(kv[..., :DIM]), split_heads(kv[..., DIM:])
    x = x + merge_heads(attn(q, k, v)) @ p["wo_c"]

    xn = ln(x, p["g2"])
    h = xn @ p["w1"] + p["b1"][0]
    h = 0.5 * h * (1.0 + jax.lax.erf(h / jnp.sqrt(2.0)))
    return x + h @ p["w2"] + p["b2"][0]


def ref_trunk(x, ctx, layer_params):
    for p in layer_params:
        x = _ref_block(x, ctx, p)
    return x


# --------------------------------- main ---------------------------------------
if __name__ == "__main__":
    key = jax.random.PRNGKey(0)
    kx, kc, kp = jax.random.split(key, 3)
    x = jax.random.normal(kx, (B, N, DIM), jnp.float32)
    context = jax.random.normal(kc, (B, M, DIM), jnp.float32)

    layer_keys = jax.random.split(kp, DEPTH)
    layer_params = [init_layer_params(k) for k in layer_keys]
    gammas, w_packed, w2, biases = pack_params(layer_params)

    out = transformer_decoder_trunk(x, context, gammas, w_packed, w2, biases)
    out = jax.block_until_ready(out)

    ref = ref_trunk(x, context, layer_params)
    assert out.shape == (B, N, DIM)
    # bf16 weights + approx-reciprocal softmax vs f32 exact reference ->
    # looser tolerance than a pure-f32 parity check.
    assert jnp.allclose(out, ref, atol=2e-2, rtol=2e-2), "mismatch vs JAX reference"

    print("KERNEL_OK")
</pallas_src>

<mosaic_0001>
module attributes {stable_mosaic.version = 11 : i64} {
  func.func @trunk_kernel(%arg0: i32, %arg1: memref<1x8x128xf32, #tpu.memory_space<vmem>>, %arg2: memref<1x16x128xf32, #tpu.memory_space<vmem>>, %arg3: memref<2x4x128xf32, #tpu.memory_space<vmem>>, %arg4: memref<2x128x1536xbf16, #tpu.memory_space<vmem>>, %arg5: memref<2x512x128xbf16, #tpu.memory_space<vmem>>, %arg6: memref<2x1x640xf32, #tpu.memory_space<vmem>>, %arg7: memref<1x8x128xf32, #tpu.memory_space<vmem>>) attributes {dimension_semantics = [#tpu.dimension_semantics<parallel>], iteration_bounds = array<i64: 2>, scalar_prefetch = 0 : i64, scratch_operands = 0 : i64, tpu.core_type = #tpu.core_type<tc>, window_params = [{transform_indices = @transform_0, window_bounds = array<i64: 1, 8, 128>}, {transform_indices = @transform_1, window_bounds = array<i64: 1, 16, 128>}, {pipeline_mode = #tpu.pipeline_mode<synchronous>, transform_indices = @transform_2, window_bounds = array<i64: 2, 4, 128>}, {pipeline_mode = #tpu.pipeline_mode<synchronous>, transform_indices = @transform_3, window_bounds = array<i64: 2, 128, 1536>}, {pipeline_mode = #tpu.pipeline_mode<synchronous>, transform_indices = @transform_4, window_bounds = array<i64: 2, 512, 128>}, {pipeline_mode = #tpu.pipeline_mode<synchronous>, transform_indices = @transform_5, window_bounds = array<i64: 2, 1, 640>}, {transform_indices = @transform_6, window_bounds = array<i64: 1, 8, 128>}]} {
    %c0 = arith.constant 0 : index
    %c0_0 = arith.constant 0 : index
    %c0_1 = arith.constant 0 : index
    %0 = vector.load %arg1[%c0, %c0_0, %c0_1] : memref<1x8x128xf32, #tpu.memory_space<vmem>>, vector<1x8x128xf32>
    %1 = vector.shape_cast %0 : vector<1x8x128xf32> to vector<8x128xf32>
    %c0_2 = arith.constant 0 : index
    %c0_3 = arith.constant 0 : index
    %c0_4 = arith.constant 0 : index
    %2 = vector.load %arg2[%c0_2, %c0_3, %c0_4] : memref<1x16x128xf32, #tpu.memory_space<vmem>>, vector<1x16x128xf32>
    %3 = vector.shape_cast %2 : vector<1x16x128xf32> to vector<16x128xf32>
    %c0_5 = arith.constant 0 : index
    %c0_6 = arith.constant 0 : index
    %c0_7 = arith.constant 0 : index
    %4 = vector.load %arg3[%c0_5, %c0_6, %c0_7] : memref<2x4x128xf32, #tpu.memory_space<vmem>>, vector<1x1x128xf32>
    %5 = vector.shape_cast %4 : vector<1x1x128xf32> to vector<1x128xf32>
    %cst = arith.constant dense<0.000000e+00> : vector<8xf32>
    %6 = vector.multi_reduction <add>, %1, %cst [1] : vector<8x128xf32> to vector<8xf32>
    %7 = vector.shape_cast %6 : vector<8xf32> to vector<8x1xf32>
    %cst_8 = arith.constant 1.280000e+02 : f32
    %8 = vector.broadcast %cst_8 : f32 to vector<8x1xf32>
    %9 = arith.divf %7, %8 : vector<8x1xf32>
    %10 = vector.broadcast %9 : vector<8x1xf32> to vector<8x128xf32>
    %11 = arith.subf %1, %10 : vector<8x128xf32>
    %12 = arith.mulf %11, %11 : vector<8x128xf32>
    %cst_9 = arith.constant dense<0.000000e+00> : vector<8xf32>
    %13 = vector.multi_reduction <add>, %12, %cst_9 [1] : vector<8x128xf32> to vector<8xf32>
    %14 = vector.shape_cast %13 : vector<8xf32> to vector<8x1xf32>
    %cst_10 = arith.constant 1.280000e+02 : f32
    %15 = vector.broadcast %cst_10 : f32 to vector<8x1xf32>
    %16 = arith.divf %14, %15 : vector<8x1xf32>
    %cst_11 = arith.constant 9.99999997E-7 : f32
    %17 = vector.broadcast %cst_11 : f32 to vector<8x1xf32>
    %18 = arith.addf %16, %17 : vector<8x1xf32>
    %19 = math.rsqrt %18 : vector<8x1xf32>
    %20 = vector.broadcast %19 : vector<8x1xf32> to vector<8x128xf32>
    %21 = arith.mulf %11, %20 : vector<8x128xf32>
    %22 = vector.broadcast %5 : vector<1x128xf32> to vector<8x128xf32>
    %23 = arith.mulf %21, %22 : vector<8x128xf32>
    %c0_12 = arith.constant 0 : index
    %c0_13 = arith.constant 0 : index
    %c0_14 = arith.constant 0 : index
    %24 = vector.load %arg4[%c0_12, %c0_13, %c0_14] : memref<2x128x1536xbf16, #tpu.memory_space<vmem>>, vector<1x128x384xbf16>
    %25 = vector.shape_cast %24 : vector<1x128x384xbf16> to vector<128x384xbf16>
    %26 = arith.truncf %23 : vector<8x128xf32> to vector<8x128xbf16>
    %cst_15 = arith.constant dense<0.000000e+00> : vector<8x384xf32>
    %27 = tpu.matmul %26, %25, %cst_15 {dimension_numbers = #tpu.dot_dimension_numbers<[1], [0], [0], [1], [0, 0, 1, 1], [], []>} : vector<8x128xbf16>, vector<128x384xbf16>, vector<8x384xf32> -> vector<8x384xf32>
    %28 = vector.extract_strided_slice %27 {offsets = [0, 0], sizes = [8, 128], strides = [1, 1]} : vector<8x384xf32> to vector<8x128xf32>
    %29 = vector.extract_strided_slice %27 {offsets = [0, 128], sizes = [8, 128], strides = [1, 1]} : vector<8x384xf32> to vector<8x128xf32>
    %30 = vector.extract_strided_slice %27 {offsets = [0, 256], sizes = [8, 128], strides = [1, 1]} : vector<8x384xf32> to vector<8x128xf32>
    %c0_16 = arith.constant 0 : index
    %c0_17 = arith.constant 0 : index
    %c384 = arith.constant 384 : index
    %31 = vector.load %arg4[%c0_16, %c0_17, %c384] : memref<2x128x1536xbf16, #tpu.memory_space<vmem>>, vector<1x128x128xbf16>
    %32 = vector.shape_cast %31 : vector<1x128x128xbf16> to vector<128x128xbf16>
    %33 = vector.extract_strided_slice %28 {offsets = [0, 0], sizes = [8, 64], strides = [1, 1]} : vector<8x128xf32> to vector<8x64xf32>
    %34 = vector.extract_strided_slice %29 {offsets = [0, 0], sizes = [8, 64], strides = [1, 1]} : vector<8x128xf32> to vector<8x64xf32>
    %35 = arith.truncf %33 : vector<8x64xf32> to vector<8x64xbf16>
    %36 = arith.truncf %34 : vector<8x64xf32> to vector<8x64xbf16>
    %cst_18 = arith.constant dense<0.000000e+00> : vector<8x8xf32>
    %37 = tpu.matmul %35, %36, %cst_18 {dimension_numbers = #tpu.dot_dimension_numbers<[1], [1], [0], [0], [0, 0, 1, 0], [], []>} : vector<8x64xbf16>, vector<8x64xbf16>, vector<8x8xf32> -> vector<8x8xf32>
    %cst_19 = arith.constant 1.250000e-01 : f32
    %38 = vector.broadcast %cst_19 : f32 to vector<8x8xf32>
    %39 = arith.mulf %37, %38 : vector<8x8xf32>
    %cst_20 = arith.constant dense<0xFF800000> : vector<8xf32>
    %40 = vector.multi_reduction <maximumf>, %39, %cst_20 [1] : vector<8x8xf32> to vector<8xf32>
    %41 = vector.shape_cast %40 : vector<8xf32> to vector<8x1xf32>
    %42 = vector.broadcast %41 : vector<8x1xf32> to vector<8x8xf32>
    %43 = arith.subf %39, %42 : vector<8x8xf32>
    %44 = math.exp %43 : vector<8x8xf32>
    %cst_21 = arith.constant dense<0.000000e+00> : vector<8xf32>
    %45 = vector.multi_reduction <add>, %44, %cst_21 [1] : vector<8x8xf32> to vector<8xf32>
    %46 = vector.shape_cast %45 : vector<8xf32> to vector<8x1xf32>
    %47 = tpu.reciprocal %46 {approx = true} : vector<8x1xf32> -> vector<8x1xf32>
    %48 = vector.broadcast %47 : vector<8x1xf32> to vector<8x8xf32>
    %49 = arith.mulf %44, %48 : vector<8x8xf32>
    %50 = vector.extract_strided_slice %30 {offsets = [0, 0], sizes = [8, 64], strides = [1, 1]} : vector<8x128xf32> to vector<8x64xf32>
    %51 = arith.truncf %49 : vector<8x8xf32> to vector<8x8xbf16>
    %52 = arith.truncf %50 : vector<8x64xf32> to vector<8x64xbf16>
    %cst_22 = arith.constant dense<0.000000e+00> : vector<8x64xf32>
    %53 = tpu.matmul %51, %52, %cst_22 {dimension_numbers = #tpu.dot_dimension_numbers<[1], [0], [0], [1], [0, 0, 1, 1], [], []>} : vector<8x8xbf16>, vector<8x64xbf16>, vector<8x64xf32> -> vector<8x64xf32>
    %54 = vector.extract_strided_slice %32 {offsets = [0, 0], sizes = [64, 128], strides = [1, 1]} : vector<128x128xbf16> to vector<64x128xbf16>
    %55 = arith.truncf %53 : vector<8x64xf32> to vector<8x64xbf16>
    %cst_23 = arith.constant dense<0.000000e+00> : vector<8x128xf32>
    %56 = tpu.matmul %55, %54, %cst_23 {dimension_numbers = #tpu.dot_dimension_numbers<[1], [0], [0], [1], [0, 0, 1, 1], [], []>} : vector<8x64xbf16>, vector<64x128xbf16>, vector<8x128xf32> -> vector<8x128xf32>
    %57 = vector.extract_strided_slice %28 {offsets = [0, 64], sizes = [8, 64], strides = [1, 1]} : vector<8x128xf32> to vector<8x64xf32>
    %58 = vector.extract_strided_slice %29 {offsets = [0, 64], sizes = [8, 64], strides = [1, 1]} : vector<8x128xf32> to vector<8x64xf32>
    %59 = arith.truncf %57 : vector<8x64xf32> to vector<8x64xbf16>
    %60 = arith.truncf %58 : vector<8x64xf32> to vector<8x64xbf16>
    %cst_24 = arith.constant dense<0.000000e+00> : vector<8x8xf32>
    %61 = tpu.matmul %59, %60, %cst_24 {dimension_numbers = #tpu.dot_dimension_numbers<[1], [1], [0], [0], [0, 0, 1, 0], [], []>} : vector<8x64xbf16>, vector<8x64xbf16>, vector<8x8xf32> -> vector<8x8xf32>
    %cst_25 = arith.constant 1.250000e-01 : f32
    %62 = vector.broadcast %cst_25 : f32 to vector<8x8xf32>
    %63 = arith.mulf %61, %62 : vector<8x8xf32>
    %cst_26 = arith.constant dense<0xFF800000> : vector<8xf32>
    %64 = vector.multi_reduction <maximumf>, %63, %cst_26 [1] : vector<8x8xf32> to vector<8xf32>
    %65 = vector.shape_cast %64 : vector<8xf32> to vector<8x1xf32>
    %66 = vector.broadcast %65 : vector<8x1xf32> to vector<8x8xf32>
    %67 = arith.subf %63, %66 : vector<8x8xf32>
    %68 = math.exp %67 : vector<8x8xf32>
    %cst_27 = arith.constant dense<0.000000e+00> : vector<8xf32>
    %69 = vector.multi_reduction <add>, %68, %cst_27 [1] : vector<8x8xf32> to vector<8xf32>
    %70 = vector.shape_cast %69 : vector<8xf32> to vector<8x1xf32>
    %71 = tpu.reciprocal %70 {approx = true} : vector<8x1xf32> -> vector<8x1xf32>
    %72 = vector.broadcast %71 : vector<8x1xf32> to vector<8x8xf32>
    %73 = arith.mulf %68, %72 : vector<8x8xf32>
    %74 = vector.extract_strided_slice %30 {offsets = [0, 64], sizes = [8, 64], strides = [1, 1]} : vector<8x128xf32> to vector<8x64xf32>
    %75 = arith.truncf %73 : vector<8x8xf32> to vector<8x8xbf16>
    %76 = arith.truncf %74 : vector<8x64xf32> to vector<8x64xbf16>
    %cst_28 = arith.constant dense<0.000000e+00> : vector<8x64xf32>
    %77 = tpu.matmul %75, %76, %cst_28 {dimension_numbers = #tpu.dot_dimension_numbers<[1], [0], [0], [1], [0, 0, 1, 1], [], []>} : vector<8x8xbf16>, vector<8x64xbf16>, vector<8x64xf32> -> vector<8x64xf32>
    %78 = vector.extract_strided_slice %32 {offsets = [64, 0], sizes = [64, 128], strides = [1, 1]} : vector<128x128xbf16> to vector<64x128xbf16>
    %79 = arith.truncf %77 : vector<8x64xf32> to vector<8x64xbf16>
    %cst_29 = arith.constant dense<0.000000e+00> : vector<8x128xf32>
    %80 = tpu.matmul %79, %78, %cst_29 {dimension_numbers = #tpu.dot_dimension_numbers<[1], [0], [0], [1], [0, 0, 1, 1], [], []>} : vector<8x64xbf16>, vector<64x128xbf16>, vector<8x128xf32> -> vector<8x128xf32>
    %81 = arith.addf %56, %80 : vector<8x128xf32>
    %82 = arith.addf %1, %81 : vector<8x128xf32>
    %c0_30 = arith.constant 0 : index
    %c1 = arith.constant 1 : index
    %c0_31 = arith.constant 0 : index
    %83 = vector.load %arg3[%c0_30, %c1, %c0_31] : memref<2x4x128xf32, #tpu.memory_space<vmem>>, vector<1x1x128xf32>
    %84 = vector.shape_cast %83 : vector<1x1x128xf32> to vector<1x128xf32>
    %cst_32 = arith.constant dense<0.000000e+00> : vector<8xf32>
    %85 = vector.multi_reduction <add>, %82, %cst_32 [1] : vector<8x128xf32> to vector<8xf32>
    %86 = vector.shape_cast %85 : vector<8xf32> to vector<8x1xf32>
    %cst_33 = arith.constant 1.280000e+02 : f32
    %87 = vector.broadcast %cst_33 : f32 to vector<8x1xf32>
    %88 = arith.divf %86, %87 : vector<8x1xf32>
    %89 = vector.broadcast %88 : vector<8x1xf32> to vector<8x128xf32>
    %90 = arith.subf %82, %89 : vector<8x128xf32>
    %91 = arith.mulf %90, %90 : vector<8x128xf32>
    %cst_34 = arith.constant dense<0.000000e+00> : vector<8xf32>
    %92 = vector.multi_reduction <add>, %91, %cst_34 [1] : vector<8x128xf32> to vector<8xf32>
    %93 = vector.shape_cast %92 : vector<8xf32> to vector<8x1xf32>
    %cst_35 = arith.constant 1.280000e+02 : f32
    %94 = vector.broadcast %cst_35 : f32 to vector<8x1xf32>
    %95 = arith.divf %93, %94 : vector<8x1xf32>
    %cst_36 = arith.constant 9.99999997E-7 : f32
    %96 = vector.broadcast %cst_36 : f32 to vector<8x1xf32>
    %97 = arith.addf %95, %96 : vector<8x1xf32>
    %98 = math.rsqrt %97 : vector<8x1xf32>
    %99 = vector.broadcast %98 : vector<8x1xf32> to vector<8x128xf32>
    %100 = arith.mulf %90, %99 : vector<8x128xf32>
    %101 = vector.broadcast %84 : vector<1x128xf32> to vector<8x128xf32>
    %102 = arith.mulf %100, %101 : vector<8x128xf32>
    %c0_37 = arith.constant 0 : index
    %c2 = arith.constant 2 : index
    %c0_38 = arith.constant 0 : index
    %103 = vector.load %arg3[%c0_37, %c2, %c0_38] : memref<2x4x128xf32, #tpu.memory_space<vmem>>, vector<1x1x128xf32>
    %104 = vector.shape_cast %103 : vector<1x1x128xf32> to vector<1x128xf32>
    %cst_39 = arith.constant dense<0.000000e+00> : vector<16xf32>
    %105 = vector.multi_reduction <add>, %3, %cst_39 [1] : vector<16x128xf32> to vector<16xf32>
    %106 = vector.shape_cast %105 : vector<16xf32> to vector<16x1xf32>
    %cst_40 = arith.constant 1.280000e+02 : f32
    %107 = vector.broadcast %cst_40 : f32 to vector<16x1xf32>
    %108 = arith.divf %106, %107 : vector<16x1xf32>
    %109 = vector.broadcast %108 : vector<16x1xf32> to vector<16x128xf32>
    %110 = arith.subf %3, %109 : vector<16x128xf32>
    %111 = arith.mulf %110, %110 : vector<16x128xf32>
    %cst_41 = arith.constant dense<0.000000e+00> : vector<16xf32>
    %112 = vector.multi_reduction <add>, %111, %cst_41 [1] : vector<16x128xf32> to vector<16xf32>
    %113 = vector.shape_cast %112 : vector<16xf32> to vector<16x1xf32>
    %cst_42 = arith.constant 1.280000e+02 : f32
    %114 = vector.broadcast %cst_42 : f32 to vector<16x1xf32>
    %115 = arith.divf %113, %114 : vector<16x1xf32>
    %cst_43 = arith.constant 9.99999997E-7 : f32
    %116 = vector.broadcast %cst_43 : f32 to vector<16x1xf32>
    %117 = arith.addf %115, %116 : vector<16x1xf32>
    %118 = math.rsqrt %117 : vector<16x1xf32>
    %119 = vector.broadcast %118 : vector<16x1xf32> to vector<16x128xf32>
    %120 = arith.mulf %110, %119 : vector<16x128xf32>
    %121 = vector.broadcast %104 : vector<1x128xf32> to vector<16x128xf32>
    %122 = arith.mulf %120, %121 : vector<16x128xf32>
    %c0_44 = arith.constant 0 : index
    %c0_45 = arith.constant 0 : index
    %c512 = arith.constant 512 : index
    %123 = vector.load %arg4[%c0_44, %c0_45, %c512] : memref<2x128x1536xbf16, #tpu.memory_space<vmem>>, vector<1x128x128xbf16>
    %124 = vector.shape_cast %123 : vector<1x128x128xbf16> to vector<128x128xbf16>
    %125 = arith.truncf %102 : vector<8x128xf32> to vector<8x128xbf16>
    %cst_46 = arith.constant dense<0.000000e+00> : vector<8x128xf32>
    %126 = tpu.matmul %125, %124, %cst_46 {dimension_numbers = #tpu.dot_dimension_numbers<[1], [0], [0], [1], [0, 0, 1, 1], [], []>} : vector<8x128xbf16>, vector<128x128xbf16>, vector<8x128xf32> -> vector<8x128xf32>
    %c0_47 = arith.constant 0 : index
    %c0_48 = arith.constant 0 : index
    %c640 = arith.constant 640 : index
    %127 = vector.load %arg4[%c0_47, %c0_48, %c640] : memref<2x128x1536xbf16, #tpu.memory_space<vmem>>, vector<1x128x256xbf16>
    %128 = vector.shape_cast %127 : vector<1x128x256xbf16> to vector<128x256xbf16>
    %129 = arith.truncf %122 : vector<16x128xf32> to vector<16x128xbf16>
    %cst_49 = arith.constant dense<0.000000e+00> : vector<16x256xf32>
    %130 = tpu.matmul %129, %128, %cst_49 {dimension_numbers = #tpu.dot_dimension_numbers<[1], [0], [0], [1], [0, 0, 1, 1], [], []>} : vector<16x128xbf16>, vector<128x256xbf16>, vector<16x256xf32> -> vector<16x256xf32>
    %131 = vector.extract_strided_slice %130 {offsets = [0, 0], sizes = [16, 128], strides = [1, 1]} : vector<16x256xf32> to vector<16x128xf32>
    %132 = vector.extract_strided_slice %130 {offsets = [0, 128], sizes = [16, 128], strides = [1, 1]} : vector<16x256xf32> to vector<16x128xf32>
    %c0_50 = arith.constant 0 : index
    %c0_51 = arith.constant 0 : index
    %c896 = arith.constant 896 : index
    %133 = vector.load %arg4[%c0_50, %c0_51, %c896] : memref<2x128x1536xbf16, #tpu.memory_space<vmem>>, vector<1x128x128xbf16>
    %134 = vector.shape_cast %133 : vector<1x128x128xbf16> to vector<128x128xbf16>
    %135 = vector.extract_strided_slice %126 {offsets = [0, 0], sizes = [8, 64], strides = [1, 1]} : vector<8x128xf32> to vector<8x64xf32>
    %136 = vector.extract_strided_slice %131 {offsets = [0, 0], sizes = [16, 64], strides = [1, 1]} : vector<16x128xf32> to vector<16x64xf32>
    %137 = arith.truncf %135 : vector<8x64xf32> to vector<8x64xbf16>
    %138 = arith.truncf %136 : vector<16x64xf32> to vector<16x64xbf16>
    %cst_52 = arith.constant dense<0.000000e+00> : vector<8x16xf32>
    %139 = tpu.matmul %137, %138, %cst_52 {dimension_numbers = #tpu.dot_dimension_numbers<[1], [1], [0], [0], [0, 0, 1, 0], [], []>} : vector<8x64xbf16>, vector<16x64xbf16>, vector<8x16xf32> -> vector<8x16xf32>
    %cst_53 = arith.constant 1.250000e-01 : f32
    %140 = vector.broadcast %cst_53 : f32 to vector<8x16xf32>
    %141 = arith.mulf %139, %140 : vector<8x16xf32>
    %cst_54 = arith.constant dense<0xFF800000> : vector<8xf32>
    %142 = vector.multi_reduction <maximumf>, %141, %cst_54 [1] : vector<8x16xf32> to vector<8xf32>
    %143 = vector.shape_cast %142 : vector<8xf32> to vector<8x1xf32>
    %144 = vector.broadcast %143 : vector<8x1xf32> to vector<8x16xf32>
    %145 = arith.subf %141, %144 : vector<8x16xf32>
    %146 = math.exp %145 : vector<8x16xf32>
    %cst_55 = arith.constant dense<0.000000e+00> : vector<8xf32>
    %147 = vector.multi_reduction <add>, %146, %cst_55 [1] : vector<8x16xf32> to vector<8xf32>
    %148 = vector.shape_cast %147 : vector<8xf32> to vector<8x1xf32>
    %149 = tpu.reciprocal %148 {approx = true} : vector<8x1xf32> -> vector<8x1xf32>
    %150 = vector.broadcast %149 : vector<8x1xf32> to vector<8x16xf32>
    %151 = arith.mulf %146, %150 : vector<8x16xf32>
    %152 = vector.extract_strided_slice %132 {offsets = [0, 0], sizes = [16, 64], strides = [1, 1]} : vector<16x128xf32> to vector<16x64xf32>
    %153 = arith.truncf %151 : vector<8x16xf32> to vector<8x16xbf16>
    %154 = arith.truncf %152 : vector<16x64xf32> to vector<16x64xbf16>
    %cst_56 = arith.constant dense<0.000000e+00> : vector<8x64xf32>
    %155 = tpu.matmul %153, %154, %cst_56 {dimension_numbers = #tpu.dot_dimension_numbers<[1], [0], [0], [1], [0, 0, 1, 1], [], []>} : vector<8x16xbf16>, vector<16x64xbf16>, vector<8x64xf32> -> vector<8x64xf32>
    %156 = vector.extract_strided_slice %134 {offsets = [0, 0], sizes = [64, 128], strides = [1, 1]} : vector<128x128xbf16> to vector<64x128xbf16>
    %157 = arith.truncf %155 : vector<8x64xf32> to vector<8x64xbf16>
    %cst_57 = arith.constant dense<0.000000e+00> : vector<8x128xf32>
    %158 = tpu.matmul %157, %156, %cst_57 {dimension_numbers = #tpu.dot_dimension_numbers<[1], [0], [0], [1], [0, 0, 1, 1], [], []>} : vector<8x64xbf16>, vector<64x128xbf16>, vector<8x128xf32> -> vector<8x128xf32>
    %159 = vector.extract_strided_slice %126 {offsets = [0, 64], sizes = [8, 64], strides = [1, 1]} : vector<8x128xf32> to vector<8x64xf32>
    %160 = vector.extract_strided_slice %131 {offsets = [0, 64], sizes = [16, 64], strides = [1, 1]} : vector<16x128xf32> to vector<16x64xf32>
    %161 = arith.truncf %159 : vector<8x64xf32> to vector<8x64xbf16>
    %162 = arith.truncf %160 : vector<16x64xf32> to vector<16x64xbf16>
    %cst_58 = arith.constant dense<0.000000e+00> : vector<8x16xf32>
    %163 = tpu.matmul %161, %162, %cst_58 {dimension_numbers = #tpu.dot_dimension_numbers<[1], [1], [0], [0], [0, 0, 1, 0], [], []>} : vector<8x64xbf16>, vector<16x64xbf16>, vector<8x16xf32> -> vector<8x16xf32>
    %cst_59 = arith.constant 1.250000e-01 : f32
    %164 = vector.broadcast %cst_59 : f32 to vector<8x16xf32>
    %165 = arith.mulf %163, %164 : vector<8x16xf32>
    %cst_60 = arith.constant dense<0xFF800000> : vector<8xf32>
    %166 = vector.multi_reduction <maximumf>, %165, %cst_60 [1] : vector<8x16xf32> to vector<8xf32>
    %167 = vector.shape_cast %166 : vector<8xf32> to vector<8x1xf32>
    %168 = vector.broadcast %167 : vector<8x1xf32> to vector<8x16xf32>
    %169 = arith.subf %165, %168 : vector<8x16xf32>
    %170 = math.exp %169 : vector<8x16xf32>
    %cst_61 = arith.constant dense<0.000000e+00> : vector<8xf32>
    %171 = vector.multi_reduction <add>, %170, %cst_61 [1] : vector<8x16xf32> to vector<8xf32>
    %172 = vector.shape_cast %171 : vector<8xf32> to vector<8x1xf32>
    %173 = tpu.reciprocal %172 {approx = true} : vector<8x1xf32> -> vector<8x1xf32>
    %174 = vector.broadcast %173 : vector<8x1xf32> to vector<8x16xf32>
    %175 = arith.mulf %170, %174 : vector<8x16xf32>
    %176 = vector.extract_strided_slice %132 {offsets = [0, 64], sizes = [16, 64], strides = [1, 1]} : vector<16x128xf32> to vector<16x64xf32>
    %177 = arith.truncf %175 : vector<8x16xf32> to vector<8x16xbf16>
    %178 = arith.truncf %176 : vector<16x64xf32> to vector<16x64xbf16>
    %cst_62 = arith.constant dense<0.000000e+00> : vector<8x64xf32>
    %179 = tpu.matmul %177, %178, %cst_62 {dimension_numbers = #tpu.dot_dimension_numbers<[1], [0], [0], [1], [0, 0, 1, 1], [], []>} : vector<8x16xbf16>, vector<16x64xbf16>, vector<8x64xf32> -> vector<8x64xf32>
    %180 = vector.extract_strided_slice %134 {offsets = [64, 0], sizes = [64, 128], strides = [1, 1]} : vector<128x128xbf16> to vector<64x128xbf16>
    %181 = arith.truncf %179 : vector<8x64xf32> to vector<8x64xbf16>
    %cst_63 = arith.constant dense<0.000000e+00> : vector<8x128xf32>
    %182 = tpu.matmul %181, %180, %cst_63 {dimension_numbers = #tpu.dot_dimension_numbers<[1], [0], [0], [1], [0, 0, 1, 1], [], []>} : vector<8x64xbf16>, vector<64x128xbf16>, vector<8x128xf32> -> vector<8x128xf32>
    %183 = arith.addf %158, %182 : vector<8x128xf32>
    %184 = arith.addf %82, %183 : vector<8x128xf32>
    %c0_64 = arith.constant 0 : index
    %c3 = arith.constant 3 : index
    %c0_65 = arith.constant 0 : index
    %185 = vector.load %arg3[%c0_64, %c3, %c0_65] : memref<2x4x128xf32, #tpu.memory_space<vmem>>, vector<1x1x128xf32>
    %186 = vector.shape_cast %185 : vector<1x1x128xf32> to vector<1x128xf32>
    %cst_66 = arith.constant dense<0.000000e+00> : vector<8xf32>
    %187 = vector.multi_reduction <add>, %184, %cst_66 [1] : vector<8x128xf32> to vector<8xf32>
    %188 = vector.shape_cast %187 : vector<8xf32> to vector<8x1xf32>
    %cst_67 = arith.constant 1.280000e+02 : f32
    %189 = vector.broadcast %cst_67 : f32 to vector<8x1xf32>
    %190 = arith.divf %188, %189 : vector<8x1xf32>
    %191 = vector.broadcast %190 : vector<8x1xf32> to vector<8x128xf32>
    %192 = arith.subf %184, %191 : vector<8x128xf32>
    %193 = arith.mulf %192, %192 : vector<8x128xf32>
    %cst_68 = arith.constant dense<0.000000e+00> : vector<8xf32>
    %194 = vector.multi_reduction <add>, %193, %cst_68 [1] : vector<8x128xf32> to vector<8xf32>
    %195 = vector.shape_cast %194 : vector<8xf32> to vector<8x1xf32>
    %cst_69 = arith.constant 1.280000e+02 : f32
    %196 = vector.broadcast %cst_69 : f32 to vector<8x1xf32>
    %197 = arith.divf %195, %196 : vector<8x1xf32>
    %cst_70 = arith.constant 9.99999997E-7 : f32
    %198 = vector.broadcast %cst_70 : f32 to vector<8x1xf32>
    %199 = arith.addf %197, %198 : vector<8x1xf32>
    %200 = math.rsqrt %199 : vector<8x1xf32>
    %201 = vector.broadcast %200 : vector<8x1xf32> to vector<8x128xf32>
    %202 = arith.mulf %192, %201 : vector<8x128xf32>
    %203 = vector.broadcast %186 : vector<1x128xf32> to vector<8x128xf32>
    %204 = arith.mulf %202, %203 : vector<8x128xf32>
    %c0_71 = arith.constant 0 : index
    %c0_72 = arith.constant 0 : index
    %c1024 = arith.constant 1024 : index
    %205 = vector.load %arg4[%c0_71, %c0_72, %c1024] : memref<2x128x1536xbf16, #tpu.memory_space<vmem>>, vector<1x128x512xbf16>
    %206 = vector.shape_cast %205 : vector<1x128x512xbf16> to vector<128x512xbf16>
    %207 = arith.truncf %204 : vector<8x128xf32> to vector<8x128xbf16>
    %cst_73 = arith.constant dense<0.000000e+00> : vector<8x512xf32>
    %208 = tpu.matmul %207, %206, %cst_73 {dimension_numbers = #tpu.dot_dimension_numbers<[1], [0], [0], [1], [0, 0, 1, 1], [], []>} : vector<8x128xbf16>, vector<128x512xbf16>, vector<8x512xf32> -> vector<8x512xf32>
    %c0_74 = arith.constant 0 : index
    %c0_75 = arith.constant 0 : index
    %c0_76 = arith.constant 0 : index
    %209 = vector.load %arg6[%c0_74, %c0_75, %c0_76] : memref<2x1x640xf32, #tpu.memory_space<vmem>>, vector<1x1x512xf32>
    %210 = vector.shape_cast %209 : vector<1x1x512xf32> to vector<1x512xf32>
    %211 = vector.broadcast %210 : vector<1x512xf32> to vector<8x512xf32>
    %212 = arith.addf %208, %211 : vector<8x512xf32>
    %cst_77 = arith.constant 5.000000e-01 : f32
    %213 = vector.broadcast %cst_77 : f32 to vector<8x512xf32>
    %214 = arith.mulf %213, %212 : vector<8x512xf32>
    %cst_78 = arith.constant 0.707106769 : f32
    %215 = vector.broadcast %cst_78 : f32 to vector<8x512xf32>
    %216 = arith.mulf %212, %215 : vector<8x512xf32>
    %217 = math.erf %216 : vector<8x512xf32>
    %cst_79 = arith.constant 1.000000e+00 : f32
    %218 = vector.broadcast %cst_79 : f32 to vector<8x512xf32>
    %219 = arith.addf %218, %217 : vector<8x512xf32>
    %220 = arith.mulf %214, %219 : vector<8x512xf32>
    %c0_80 = arith.constant 0 : index
    %c0_81 = arith.constant 0 : index
    %c0_82 = arith.constant 0 : index
    %221 = vector.load %arg5[%c0_80, %c0_81, %c0_82] : memref<2x512x128xbf16, #tpu.memory_space<vmem>>, vector<1x512x128xbf16>
    %222 = vector.shape_cast %221 : vector<1x512x128xbf16> to vector<512x128xbf16>
    %223 = arith.truncf %220 : vector<8x512xf32> to vector<8x512xbf16>
    %cst_83 = arith.constant dense<0.000000e+00> : vector<8x128xf32>
    %224 = tpu.matmul %223, %222, %cst_83 {dimension_numbers = #tpu.dot_dimension_numbers<[1], [0], [0], [1], [0, 0, 1, 1], [], []>} : vector<8x512xbf16>, vector<512x128xbf16>, vector<8x128xf32> -> vector<8x128xf32>
    %225 = arith.addf %184, %224 : vector<8x128xf32>
    %c0_84 = arith.constant 0 : index
    %c0_85 = arith.constant 0 : index
    %c512_86 = arith.constant 512 : index
    %226 = vector.load %arg6[%c0_84, %c0_85, %c512_86] : memref<2x1x640xf32, #tpu.memory_space<vmem>>, vector<1x1x128xf32>
    %227 = vector.shape_cast %226 : vector<1x1x128xf32> to vector<1x128xf32>
    %228 = vector.broadcast %227 : vector<1x128xf32> to vector<8x128xf32>
    %229 = arith.addf %225, %228 : vector<8x128xf32>
    %c1_87 = arith.constant 1 : index
    %c0_88 = arith.constant 0 : index
    %c0_89 = arith.constant 0 : index
    %230 = vector.load %arg3[%c1_87, %c0_88, %c0_89] : memref<2x4x128xf32, #tpu.memory_space<vmem>>, vector<1x1x128xf32>
    %231 = vector.shape_cast %230 : vector<1x1x128xf32> to vector<1x128xf32>
    %cst_90 = arith.constant dense<0.000000e+00> : vector<8xf32>
    %232 = vector.multi_reduction <add>, %229, %cst_90 [1] : vector<8x128xf32> to vector<8xf32>
    %233 = vector.shape_cast %232 : vector<8xf32> to vector<8x1xf32>
    %cst_91 = arith.constant 1.280000e+02 : f32
    %234 = vector.broadcast %cst_91 : f32 to vector<8x1xf32>
    %235 = arith.divf %233, %234 : vector<8x1xf32>
    %236 = vector.broadcast %235 : vector<8x1xf32> to vector<8x128xf32>
    %237 = arith.subf %229, %236 : vector<8x128xf32>
    %238 = arith.mulf %237, %237 : vector<8x128xf32>
    %cst_92 = arith.constant dense<0.000000e+00> : vector<8xf32>
    %239 = vector.multi_reduction <add>, %238, %cst_92 [1] : vector<8x128xf32> to vector<8xf32>
    %240 = vector.shape_cast %239 : vector<8xf32> to vector<8x1xf32>
    %cst_93 = arith.constant 1.280000e+02 : f32
    %241 = vector.broadcast %cst_93 : f32 to vector<8x1xf32>
    %242 = arith.divf %240, %241 : vector<8x1xf32>
    %cst_94 = arith.constant 9.99999997E-7 : f32
    %243 = vector.broadcast %cst_94 : f32 to vector<8x1xf32>
    %244 = arith.addf %242, %243 : vector<8x1xf32>
    %245 = math.rsqrt %244 : vector<8x1xf32>
    %246 = vector.broadcast %245 : vector<8x1xf32> to vector<8x128xf32>
    %247 = arith.mulf %237, %246 : vector<8x128xf32>
    %248 = vector.broadcast %231 : vector<1x128xf32> to vector<8x128xf32>
    %249 = arith.mulf %247, %248 : vector<8x128xf32>
    %c1_95 = arith.constant 1 : index
    %c0_96 = arith.constant 0 : index
    %c0_97 = arith.constant 0 : index
    %250 = vector.load %arg4[%c1_95, %c0_96, %c0_97] : memref<2x128x1536xbf16, #tpu.memory_space<vmem>>, vector<1x128x384xbf16>
    %251 = vector.shape_cast %250 : vector<1x128x384xbf16> to vector<128x384xbf16>
    %252 = arith.truncf %249 : vector<8x128xf32> to vector<8x128xbf16>
    %cst_98 = arith.constant dense<0.000000e+00> : vector<8x384xf32>
    %253 = tpu.matmul %252, %251, %cst_98 {dimension_numbers = #tpu.dot_dimension_numbers<[1], [0], [0], [1], [0, 0, 1, 1], [], []>} : vector<8x128xbf16>, vector<128x384xbf16>, vector<8x384xf32> -> vector<8x384xf32>
    %254 = vector.extract_strided_slice %253 {offsets = [0, 0], sizes = [8, 128], strides = [1, 1]} : vector<8x384xf32> to vector<8x128xf32>
    %255 = vector.extract_strided_slice %253 {offsets = [0, 128], sizes = [8, 128], strides = [1, 1]} : vector<8x384xf32> to vector<8x128xf32>
    %256 = vector.extract_strided_slice %253 {offsets = [0, 256], sizes = [8, 128], strides = [1, 1]} : vector<8x384xf32> to vector<8x128xf32>
    %c1_99 = arith.constant 1 : index
    %c0_100 = arith.constant 0 : index
    %c384_101 = arith.constant 384 : index
    %257 = vector.load %arg4[%c1_99, %c0_100, %c384_101] : memref<2x128x1536xbf16, #tpu.memory_space<vmem>>, vector<1x128x128xbf16>
    %258 = vector.shape_cast %257 : vector<1x128x128xbf16> to vector<128x128xbf16>
    %259 = vector.extract_strided_slice %254 {offsets = [0, 0], sizes = [8, 64], strides = [1, 1]} : vector<8x128xf32> to vector<8x64xf32>
    %260 = vector.extract_strided_slice %255 {offsets = [0, 0], sizes = [8, 64], strides = [1, 1]} : vector<8x128xf32> to vector<8x64xf32>
    %261 = arith.truncf %259 : vector<8x64xf32> to vector<8x64xbf16>
    %262 = arith.truncf %260 : vector<8x64xf32> to vector<8x64xbf16>
    %cst_102 = arith.constant dense<0.000000e+00> : vector<8x8xf32>
    %263 = tpu.matmul %261, %262, %cst_102 {dimension_numbers = #tpu.dot_dimension_numbers<[1], [1], [0], [0], [0, 0, 1, 0], [], []>} : vector<8x64xbf16>, vector<8x64xbf16>, vector<8x8xf32> -> vector<8x8xf32>
    %cst_103 = arith.constant 1.250000e-01 : f32
    %264 = vector.broadcast %cst_103 : f32 to vector<8x8xf32>
    %265 = arith.mulf %263, %264 : vector<8x8xf32>
    %cst_104 = arith.constant dense<0xFF800000> : vector<8xf32>
    %266 = vector.multi_reduction <maximumf>, %265, %cst_104 [1] : vector<8x8xf32> to vector<8xf32>
    %267 = vector.shape_cast %266 : vector<8xf32> to vector<8x1xf32>
    %268 = vector.broadcast %267 : vector<8x1xf32> to vector<8x8xf32>
    %269 = arith.subf %265, %268 : vector<8x8xf32>
    %270 = math.exp %269 : vector<8x8xf32>
    %cst_105 = arith.constant dense<0.000000e+00> : vector<8xf32>
    %271 = vector.multi_reduction <add>, %270, %cst_105 [1] : vector<8x8xf32> to vector<8xf32>
    %272 = vector.shape_cast %271 : vector<8xf32> to vector<8x1xf32>
    %273 = tpu.reciprocal %272 {approx = true} : vector<8x1xf32> -> vector<8x1xf32>
    %274 = vector.broadcast %273 : vector<8x1xf32> to vector<8x8xf32>
    %275 = arith.mulf %270, %274 : vector<8x8xf32>
    %276 = vector.extract_strided_slice %256 {offsets = [0, 0], sizes = [8, 64], strides = [1, 1]} : vector<8x128xf32> to vector<8x64xf32>
    %277 = arith.truncf %275 : vector<8x8xf32> to vector<8x8xbf16>
    %278 = arith.truncf %276 : vector<8x64xf32> to vector<8x64xbf16>
    %cst_106 = arith.constant dense<0.000000e+00> : vector<8x64xf32>
    %279 = tpu.matmul %277, %278, %cst_106 {dimension_numbers = #tpu.dot_dimension_numbers<[1], [0], [0], [1], [0, 0, 1, 1], [], []>} : vector<8x8xbf16>, vector<8x64xbf16>, vector<8x64xf32> -> vector<8x64xf32>
    %280 = vector.extract_strided_slice %258 {offsets = [0, 0], sizes = [64, 128], strides = [1, 1]} : vector<128x128xbf16> to vector<64x128xbf16>
    %281 = arith.truncf %279 : vector<8x64xf32> to vector<8x64xbf16>
    %cst_107 = arith.constant dense<0.000000e+00> : vector<8x128xf32>
    %282 = tpu.matmul %281, %280, %cst_107 {dimension_numbers = #tpu.dot_dimension_numbers<[1], [0], [0], [1], [0, 0, 1, 1], [], []>} : vector<8x64xbf16>, vector<64x128xbf16>, vector<8x128xf32> -> vector<8x128xf32>
    %283 = vector.extract_strided_slice %254 {offsets = [0, 64], sizes = [8, 64], strides = [1, 1]} : vector<8x128xf32> to vector<8x64xf32>
    %284 = vector.extract_strided_slice %255 {offsets = [0, 64], sizes = [8, 64], strides = [1, 1]} : vector<8x128xf32> to vector<8x64xf32>
    %285 = arith.truncf %283 : vector<8x64xf32> to vector<8x64xbf16>
    %286 = arith.truncf %284 : vector<8x64xf32> to vector<8x64xbf16>
    %cst_108 = arith.constant dense<0.000000e+00> : vector<8x8xf32>
    %287 = tpu.matmul %285, %286, %cst_108 {dimension_numbers = #tpu.dot_dimension_numbers<[1], [1], [0], [0], [0, 0, 1, 0], [], []>} : vector<8x64xbf16>, vector<8x64xbf16>, vector<8x8xf32> -> vector<8x8xf32>
    %cst_109 = arith.constant 1.250000e-01 : f32
    %288 = vector.broadcast %cst_109 : f32 to vector<8x8xf32>
    %289 = arith.mulf %287, %288 : vector<8x8xf32>
    %cst_110 = arith.constant dense<0xFF800000> : vector<8xf32>
    %290 = vector.multi_reduction <maximumf>, %289, %cst_110 [1] : vector<8x8xf32> to vector<8xf32>
    %291 = vector.shape_cast %290 : vector<8xf32> to vector<8x1xf32>
    %292 = vector.broadcast %291 : vector<8x1xf32> to vector<8x8xf32>
    %293 = arith.subf %289, %292 : vector<8x8xf32>
    %294 = math.exp %293 : vector<8x8xf32>
    %cst_111 = arith.constant dense<0.000000e+00> : vector<8xf32>
    %295 = vector.multi_reduction <add>, %294, %cst_111 [1] : vector<8x8xf32> to vector<8xf32>
    %296 = vector.shape_cast %295 : vector<8xf32> to vector<8x1xf32>
    %297 = tpu.reciprocal %296 {approx = true} : vector<8x1xf32> -> vector<8x1xf32>
    %298 = vector.broadcast %297 : vector<8x1xf32> to vector<8x8xf32>
    %299 = arith.mulf %294, %298 : vector<8x8xf32>
    %300 = vector.extract_strided_slice %256 {offsets = [0, 64], sizes = [8, 64], strides = [1, 1]} : vector<8x128xf32> to vector<8x64xf32>
    %301 = arith.truncf %299 : vector<8x8xf32> to vector<8x8xbf16>
    %302 = arith.truncf %300 : vector<8x64xf32> to vector<8x64xbf16>
    %cst_112 = arith.constant dense<0.000000e+00> : vector<8x64xf32>
    %303 = tpu.matmul %301, %302, %cst_112 {dimension_numbers = #tpu.dot_dimension_numbers<[1], [0], [0], [1], [0, 0, 1, 1], [], []>} : vector<8x8xbf16>, vector<8x64xbf16>, vector<8x64xf32> -> vector<8x64xf32>
    %304 = vector.extract_strided_slice %258 {offsets = [64, 0], sizes = [64, 128], strides = [1, 1]} : vector<128x128xbf16> to vector<64x128xbf16>
    %305 = arith.truncf %303 : vector<8x64xf32> to vector<8x64xbf16>
    %cst_113 = arith.constant dense<0.000000e+00> : vector<8x128xf32>
    %306 = tpu.matmul %305, %304, %cst_113 {dimension_numbers = #tpu.dot_dimension_numbers<[1], [0], [0], [1], [0, 0, 1, 1], [], []>} : vector<8x64xbf16>, vector<64x128xbf16>, vector<8x128xf32> -> vector<8x128xf32>
    %307 = arith.addf %282, %306 : vector<8x128xf32>
    %308 = arith.addf %229, %307 : vector<8x128xf32>
    %c1_114 = arith.constant 1 : index
    %c1_115 = arith.constant 1 : index
    %c0_116 = arith.constant 0 : index
    %309 = vector.load %arg3[%c1_114, %c1_115, %c0_116] : memref<2x4x128xf32, #tpu.memory_space<vmem>>, vector<1x1x128xf32>
    %310 = vector.shape_cast %309 : vector<1x1x128xf32> to vector<1x128xf32>
    %cst_117 = arith.constant dense<0.000000e+00> : vector<8xf32>
    %311 = vector.multi_reduction <add>, %308, %cst_117 [1] : vector<8x128xf32> to vector<8xf32>
    %312 = vector.shape_cast %311 : vector<8xf32> to vector<8x1xf32>
    %cst_118 = arith.constant 1.280000e+02 : f32
    %313 = vector.broadcast %cst_118 : f32 to vector<8x1xf32>
    %314 = arith.divf %312, %313 : vector<8x1xf32>
    %315 = vector.broadcast %314 : vector<8x1xf32> to vector<8x128xf32>
    %316 = arith.subf %308, %315 : vector<8x128xf32>
    %317 = arith.mulf %316, %316 : vector<8x128xf32>
    %cst_119 = arith.constant dense<0.000000e+00> : vector<8xf32>
    %318 = vector.multi_reduction <add>, %317, %cst_119 [1] : vector<8x128xf32> to vector<8xf32>
    %319 = vector.shape_cast %318 : vector<8xf32> to vector<8x1xf32>
    %cst_120 = arith.constant 1.280000e+02 : f32
    %320 = vector.broadcast %cst_120 : f32 to vector<8x1xf32>
    %321 = arith.divf %319, %320 : vector<8x1xf32>
    %cst_121 = arith.constant 9.99999997E-7 : f32
    %322 = vector.broadcast %cst_121 : f32 to vector<8x1xf32>
    %323 = arith.addf %321, %322 : vector<8x1xf32>
    %324 = math.rsqrt %323 : vector<8x1xf32>
    %325 = vector.broadcast %324 : vector<8x1xf32> to vector<8x128xf32>
    %326 = arith.mulf %316, %325 : vector<8x128xf32>
    %327 = vector.broadcast %310 : vector<1x128xf32> to vector<8x128xf32>
    %328 = arith.mulf %326, %327 : vector<8x128xf32>
    %c1_122 = arith.constant 1 : index
    %c2_123 = arith.constant 2 : index
    %c0_124 = arith.constant 0 : index
    %329 = vector.load %arg3[%c1_122, %c2_123, %c0_124] : memref<2x4x128xf32, #tpu.memory_space<vmem>>, vector<1x1x128xf32>
    %330 = vector.shape_cast %329 : vector<1x1x128xf32> to vector<1x128xf32>
    %cst_125 = arith.constant dense<0.000000e+00> : vector<16xf32>
    %331 = vector.multi_reduction <add>, %3, %cst_125 [1] : vector<16x128xf32> to vector<16xf32>
    %332 = vector.shape_cast %331 : vector<16xf32> to vector<16x1xf32>
    %cst_126 = arith.constant 1.280000e+02 : f32
    %333 = vector.broadcast %cst_126 : f32 to vector<16x1xf32>
    %334 = arith.divf %332, %333 : vector<16x1xf32>
    %335 = vector.broadcast %334 : vector<16x1xf32> to vector<16x128xf32>
    %336 = arith.subf %3, %335 : vector<16x128xf32>
    %337 = arith.mulf %336, %336 : vector<16x128xf32>
    %cst_127 = arith.constant dense<0.000000e+00> : vector<16xf32>
    %338 = vector.multi_reduction <add>, %337, %cst_127 [1] : vector<16x128xf32> to vector<16xf32>
    %339 = vector.shape_cast %338 : vector<16xf32> to vector<16x1xf32>
    %cst_128 = arith.constant 1.280000e+02 : f32
    %340 = vector.broadcast %cst_128 : f32 to vector<16x1xf32>
    %341 = arith.divf %339, %340 : vector<16x1xf32>
    %cst_129 = arith.constant 9.99999997E-7 : f32
    %342 = vector.broadcast %cst_129 : f32 to vector<16x1xf32>
    %343 = arith.addf %341, %342 : vector<16x1xf32>
    %344 = math.rsqrt %343 : vector<16x1xf32>
    %345 = vector.broadcast %344 : vector<16x1xf32> to vector<16x128xf32>
    %346 = arith.mulf %336, %345 : vector<16x128xf32>
    %347 = vector.broadcast %330 : vector<1x128xf32> to vector<16x128xf32>
    %348 = arith.mulf %346, %347 : vector<16x128xf32>
    %c1_130 = arith.constant 1 : index
    %c0_131 = arith.constant 0 : index
    %c512_132 = arith.constant 512 : index
    %349 = vector.load %arg4[%c1_130, %c0_131, %c512_132] : memref<2x128x1536xbf16, #tpu.memory_space<vmem>>, vector<1x128x128xbf16>
    %350 = vector.shape_cast %349 : vector<1x128x128xbf16> to vector<128x128xbf16>
    %351 = arith.truncf %328 : vector<8x128xf32> to vector<8x128xbf16>
    %cst_133 = arith.constant dense<0.000000e+00> : vector<8x128xf32>
    %352 = tpu.matmul %351, %350, %cst_133 {dimension_numbers = #tpu.dot_dimension_numbers<[1], [0], [0], [1], [0, 0, 1, 1], [], []>} : vector<8x128xbf16>, vector<128x128xbf16>, vector<8x128xf32> -> vector<8x128xf32>
    %c1_134 = arith.constant 1 : index
    %c0_135 = arith.constant 0 : index
    %c640_136 = arith.constant 640 : index
    %353 = vector.load %arg4[%c1_134, %c0_135, %c640_136] : memref<2x128x1536xbf16, #tpu.memory_space<vmem>>, vector<1x128x256xbf16>
    %354 = vector.shape_cast %353 : vector<1x128x256xbf16> to vector<128x256xbf16>
    %355 = arith.truncf %348 : vector<16x128xf32> to vector<16x128xbf16>
    %cst_137 = arith.constant dense<0.000000e+00> : vector<16x256xf32>
    %356 = tpu.matmul %355, %354, %cst_137 {dimension_numbers = #tpu.dot_dimension_numbers<[1], [0], [0], [1], [0, 0, 1, 1], [], []>} : vector<16x128xbf16>, vector<128x256xbf16>, vector<16x256xf32> -> vector<16x256xf32>
    %357 = vector.extract_strided_slice %356 {offsets = [0, 0], sizes = [16, 128], strides = [1, 1]} : vector<16x256xf32> to vector<16x128xf32>
    %358 = vector.extract_strided_slice %356 {offsets = [0, 128], sizes = [16, 128], strides = [1, 1]} : vector<16x256xf32> to vector<16x128xf32>
    %c1_138 = arith.constant 1 : index
    %c0_139 = arith.constant 0 : index
    %c896_140 = arith.constant 896 : index
    %359 = vector.load %arg4[%c1_138, %c0_139, %c896_140] : memref<2x128x1536xbf16, #tpu.memory_space<vmem>>, vector<1x128x128xbf16>
    %360 = vector.shape_cast %359 : vector<1x128x128xbf16> to vector<128x128xbf16>
    %361 = vector.extract_strided_slice %352 {offsets = [0, 0], sizes = [8, 64], strides = [1, 1]} : vector<8x128xf32> to vector<8x64xf32>
    %362 = vector.extract_strided_slice %357 {offsets = [0, 0], sizes = [16, 64], strides = [1, 1]} : vector<16x128xf32> to vector<16x64xf32>
    %363 = arith.truncf %361 : vector<8x64xf32> to vector<8x64xbf16>
    %364 = arith.truncf %362 : vector<16x64xf32> to vector<16x64xbf16>
    %cst_141 = arith.constant dense<0.000000e+00> : vector<8x16xf32>
    %365 = tpu.matmul %363, %364, %cst_141 {dimension_numbers = #tpu.dot_dimension_numbers<[1], [1], [0], [0], [0, 0, 1, 0], [], []>} : vector<8x64xbf16>, vector<16x64xbf16>, vector<8x16xf32> -> vector<8x16xf32>
    %cst_142 = arith.constant 1.250000e-01 : f32
    %366 = vector.broadcast %cst_142 : f32 to vector<8x16xf32>
    %367 = arith.mulf %365, %366 : vector<8x16xf32>
    %cst_143 = arith.constant dense<0xFF800000> : vector<8xf32>
    %368 = vector.multi_reduction <maximumf>, %367, %cst_143 [1] : vector<8x16xf32> to vector<8xf32>
    %369 = vector.shape_cast %368 : vector<8xf32> to vector<8x1xf32>
    %370 = vector.broadcast %369 : vector<8x1xf32> to vector<8x16xf32>
    %371 = arith.subf %367, %370 : vector<8x16xf32>
    %372 = math.exp %371 : vector<8x16xf32>
    %cst_144 = arith.constant dense<0.000000e+00> : vector<8xf32>
    %373 = vector.multi_reduction <add>, %372, %cst_144 [1] : vector<8x16xf32> to vector<8xf32>
    %374 = vector.shape_cast %373 : vector<8xf32> to vector<8x1xf32>
    %375 = tpu.reciprocal %374 {approx = true} : vector<8x1xf32> -> vector<8x1xf32>
    %376 = vector.broadcast %375 : vector<8x1xf32> to vector<8x16xf32>
    %377 = arith.mulf %372, %376 : vector<8x16xf32>
    %378 = vector.extract_strided_slice %358 {offsets = [0, 0], sizes = [16, 64], strides = [1, 1]} : vector<16x128xf32> to vector<16x64xf32>
    %379 = arith.truncf %377 : vector<8x16xf32> to vector<8x16xbf16>
    %380 = arith.truncf %378 : vector<16x64xf32> to vector<16x64xbf16>
    %cst_145 = arith.constant dense<0.000000e+00> : vector<8x64xf32>
    %381 = tpu.matmul %379, %380, %cst_145 {dimension_numbers = #tpu.dot_dimension_numbers<[1], [0], [0], [1], [0, 0, 1, 1], [], []>} : vector<8x16xbf16>, vector<16x64xbf16>, vector<8x64xf32> -> vector<8x64xf32>
    %382 = vector.extract_strided_slice %360 {offsets = [0, 0], sizes = [64, 128], strides = [1, 1]} : vector<128x128xbf16> to vector<64x128xbf16>
    %383 = arith.truncf %381 : vector<8x64xf32> to vector<8x64xbf16>
    %cst_146 = arith.constant dense<0.000000e+00> : vector<8x128xf32>
    %384 = tpu.matmul %383, %382, %cst_146 {dimension_numbers = #tpu.dot_dimension_numbers<[1], [0], [0], [1], [0, 0, 1, 1], [], []>} : vector<8x64xbf16>, vector<64x128xbf16>, vector<8x128xf32> -> vector<8x128xf32>
    %385 = vector.extract_strided_slice %352 {offsets = [0, 64], sizes = [8, 64], strides = [1, 1]} : vector<8x128xf32> to vector<8x64xf32>
    %386 = vector.extract_strided_slice %357 {offsets = [0, 64], sizes = [16, 64], strides = [1, 1]} : vector<16x128xf32> to vector<16x64xf32>
    %387 = arith.truncf %385 : vector<8x64xf32> to vector<8x64xbf16>
    %388 = arith.truncf %386 : vector<16x64xf32> to vector<16x64xbf16>
    %cst_147 = arith.constant dense<0.000000e+00> : vector<8x16xf32>
    %389 = tpu.matmul %387, %388, %cst_147 {dimension_numbers = #tpu.dot_dimension_numbers<[1], [1], [0], [0], [0, 0, 1, 0], [], []>} : vector<8x64xbf16>, vector<16x64xbf16>, vector<8x16xf32> -> vector<8x16xf32>
    %cst_148 = arith.constant 1.250000e-01 : f32
    %390 = vector.broadcast %cst_148 : f32 to vector<8x16xf32>
    %391 = arith.mulf %389, %390 : vector<8x16xf32>
    %cst_149 = arith.constant dense<0xFF800000> : vector<8xf32>
    %392 = vector.multi_reduction <maximumf>, %391, %cst_149 [1] : vector<8x16xf32> to vector<8xf32>
    %393 = vector.shape_cast %392 : vector<8xf32> to vector<8x1xf32>
    %394 = vector.broadcast %393 : vector<8x1xf32> to vector<8x16xf32>
    %395 = arith.subf %391, %394 : vector<8x16xf32>
    %396 = math.exp %395 : vector<8x16xf32>
    %cst_150 = arith.constant dense<0.000000e+00> : vector<8xf32>
    %397 = vector.multi_reduction <add>, %396, %cst_150 [1] : vector<8x16xf32> to vector<8xf32>
    %398 = vector.shape_cast %397 : vector<8xf32> to vector<8x1xf32>
    %399 = tpu.reciprocal %398 {approx = true} : vector<8x1xf32> -> vector<8x1xf32>
    %400 = vector.broadcast %399 : vector<8x1xf32> to vector<8x16xf32>
    %401 = arith.mulf %396, %400 : vector<8x16xf32>
    %402 = vector.extract_strided_slice %358 {offsets = [0, 64], sizes = [16, 64], strides = [1, 1]} : vector<16x128xf32> to vector<16x64xf32>
    %403 = arith.truncf %401 : vector<8x16xf32> to vector<8x16xbf16>
    %404 = arith.truncf %402 : vector<16x64xf32> to vector<16x64xbf16>
    %cst_151 = arith.constant dense<0.000000e+00> : vector<8x64xf32>
    %405 = tpu.matmul %403, %404, %cst_151 {dimension_numbers = #tpu.dot_dimension_numbers<[1], [0], [0], [1], [0, 0, 1, 1], [], []>} : vector<8x16xbf16>, vector<16x64xbf16>, vector<8x64xf32> -> vector<8x64xf32>
    %406 = vector.extract_strided_slice %360 {offsets = [64, 0], sizes = [64, 128], strides = [1, 1]} : vector<128x128xbf16> to vector<64x128xbf16>
    %407 = arith.truncf %405 : vector<8x64xf32> to vector<8x64xbf16>
    %cst_152 = arith.constant dense<0.000000e+00> : vector<8x128xf32>
    %408 = tpu.matmul %407, %406, %cst_152 {dimension_numbers = #tpu.dot_dimension_numbers<[1], [0], [0], [1], [0, 0, 1, 1], [], []>} : vector<8x64xbf16>, vector<64x128xbf16>, vector<8x128xf32> -> vector<8x128xf32>
    %409 = arith.addf %384, %408 : vector<8x128xf32>
    %410 = arith.addf %308, %409 : vector<8x128xf32>
    %c1_153 = arith.constant 1 : index
    %c3_154 = arith.constant 3 : index
    %c0_155 = arith.constant 0 : index
    %411 = vector.load %arg3[%c1_153, %c3_154, %c0_155] : memref<2x4x128xf32, #tpu.memory_space<vmem>>, vector<1x1x128xf32>
    %412 = vector.shape_cast %411 : vector<1x1x128xf32> to vector<1x128xf32>
    %cst_156 = arith.constant dense<0.000000e+00> : vector<8xf32>
    %413 = vector.multi_reduction <add>, %410, %cst_156 [1] : vector<8x128xf32> to vector<8xf32>
    %414 = vector.shape_cast %413 : vector<8xf32> to vector<8x1xf32>
    %cst_157 = arith.constant 1.280000e+02 : f32
    %415 = vector.broadcast %cst_157 : f32 to vector<8x1xf32>
    %416 = arith.divf %414, %415 : vector<8x1xf32>
    %417 = vector.broadcast %416 : vector<8x1xf32> to vector<8x128xf32>
    %418 = arith.subf %410, %417 : vector<8x128xf32>
    %419 = arith.mulf %418, %418 : vector<8x128xf32>
    %cst_158 = arith.constant dense<0.000000e+00> : vector<8xf32>
    %420 = vector.multi_reduction <add>, %419, %cst_158 [1] : vector<8x128xf32> to vector<8xf32>
    %421 = vector.shape_cast %420 : vector<8xf32> to vector<8x1xf32>
    %cst_159 = arith.constant 1.280000e+02 : f32
    %422 = vector.broadcast %cst_159 : f32 to vector<8x1xf32>
    %423 = arith.divf %421, %422 : vector<8x1xf32>
    %cst_160 = arith.constant 9.99999997E-7 : f32
    %424 = vector.broadcast %cst_160 : f32 to vector<8x1xf32>
    %425 = arith.addf %423, %424 : vector<8x1xf32>
    %426 = math.rsqrt %425 : vector<8x1xf32>
    %427 = vector.broadcast %426 : vector<8x1xf32> to vector<8x128xf32>
    %428 = arith.mulf %418, %427 : vector<8x128xf32>
    %429 = vector.broadcast %412 : vector<1x128xf32> to vector<8x128xf32>
    %430 = arith.mulf %428, %429 : vector<8x128xf32>
    %c1_161 = arith.constant 1 : index
    %c0_162 = arith.constant 0 : index
    %c1024_163 = arith.constant 1024 : index
    %431 = vector.load %arg4[%c1_161, %c0_162, %c1024_163] : memref<2x128x1536xbf16, #tpu.memory_space<vmem>>, vector<1x128x512xbf16>
    %432 = vector.shape_cast %431 : vector<1x128x512xbf16> to vector<128x512xbf16>
    %433 = arith.truncf %430 : vector<8x128xf32> to vector<8x128xbf16>
    %cst_164 = arith.constant dense<0.000000e+00> : vector<8x512xf32>
    %434 = tpu.matmul %433, %432, %cst_164 {dimension_numbers = #tpu.dot_dimension_numbers<[1], [0], [0], [1], [0, 0, 1, 1], [], []>} : vector<8x128xbf16>, vector<128x512xbf16>, vector<8x512xf32> -> vector<8x512xf32>
    %c1_165 = arith.constant 1 : index
    %c0_166 = arith.constant 0 : index
    %c0_167 = arith.constant 0 : index
    %435 = vector.load %arg6[%c1_165, %c0_166, %c0_167] : memref<2x1x640xf32, #tpu.memory_space<vmem>>, vector<1x1x512xf32>
    %436 = vector.shape_cast %435 : vector<1x1x512xf32> to vector<1x512xf32>
    %437 = vector.broadcast %436 : vector<1x512xf32> to vector<8x512xf32>
    %438 = arith.addf %434, %437 : vector<8x512xf32>
    %cst_168 = arith.constant 5.000000e-01 : f32
    %439 = vector.broadcast %cst_168 : f32 to vector<8x512xf32>
    %440 = arith.mulf %439, %438 : vector<8x512xf32>
    %cst_169 = arith.constant 0.707106769 : f32
    %441 = vector.broadcast %cst_169 : f32 to vector<8x512xf32>
    %442 = arith.mulf %438, %441 : vector<8x512xf32>
    %443 = math.erf %442 : vector<8x512xf32>
    %cst_170 = arith.constant 1.000000e+00 : f32
    %444 = vector.broadcast %cst_170 : f32 to vector<8x512xf32>
    %445 = arith.addf %444, %443 : vector<8x512xf32>
    %446 = arith.mulf %440, %445 : vector<8x512xf32>
    %c1_171 = arith.constant 1 : index
    %c0_172 = arith.constant 0 : index
    %c0_173 = arith.constant 0 : index
    %447 = vector.load %arg5[%c1_171, %c0_172, %c0_173] : memref<2x512x128xbf16, #tpu.memory_space<vmem>>, vector<1x512x128xbf16>
    %448 = vector.shape_cast %447 : vector<1x512x128xbf16> to vector<512x128xbf16>
    %449 = arith.truncf %446 : vector<8x512xf32> to vector<8x512xbf16>
    %cst_174 = arith.constant dense<0.000000e+00> : vector<8x128xf32>
    %450 = tpu.matmul %449, %448, %cst_174 {dimension_numbers = #tpu.dot_dimension_numbers<[1], [0], [0], [1], [0, 0, 1, 1], [], []>} : vector<8x512xbf16>, vector<512x128xbf16>, vector<8x128xf32> -> vector<8x128xf32>
    %451 = arith.addf %410, %450 : vector<8x128xf32>
    %c1_175 = arith.constant 1 : index
    %c0_176 = arith.constant 0 : index
    %c512_177 = arith.constant 512 : index
    %452 = vector.load %arg6[%c1_175, %c0_176, %c512_177] : memref<2x1x640xf32, #tpu.memory_space<vmem>>, vector<1x1x128xf32>
    %453 = vector.shape_cast %452 : vector<1x1x128xf32> to vector<1x128xf32>
    %454 = vector.broadcast %453 : vector<1x128xf32> to vector<8x128xf32>
    %455 = arith.addf %451, %454 : vector<8x128xf32>
    %c0_178 = arith.constant 0 : index
    %c0_179 = arith.constant 0 : index
    %c0_180 = arith.constant 0 : index
    %456 = vector.load %arg7[%c0_178, %c0_179, %c0_180] : memref<1x8x128xf32, #tpu.memory_space<vmem>>, vector<1x8x128xf32>
    %457 = vector.shape_cast %456 : vector<1x8x128xf32> to vector<8x128xf32>
    %458 = vector.shape_cast %455 : vector<8x128xf32> to vector<1x8x128xf32>
    tpu.vector_store %arg7[%c0_178, %c0_179, %c0_180], %458 {strides = array<i32>} : memref<1x8x128xf32, #tpu.memory_space<vmem>>, vector<1x8x128xf32>,
    return
  }
  func.func @transform_0(%arg0: i32) -> (i32, i32, i32) {
    %c0_i32 = arith.constant 0 : i32
    %c0_i32_0 = arith.constant 0 : i32
    %c0_i32_1 = arith.constant 0 : i32
    return %arg0, %c0_i32, %c0_i32_0 : i32, i32, i32
  }
  func.func @transform_1(%arg0: i32) -> (i32, i32, i32) {
    %c0_i32 = arith.constant 0 : i32
    %c0_i32_0 = arith.constant 0 : i32
    %c0_i32_1 = arith.constant 0 : i32
    return %arg0, %c0_i32, %c0_i32_0 : i32, i32, i32
  }
  func.func @transform_2(%arg0: i32) -> (i32, i32, i32) {
    %c0_i32 = arith.constant 0 : i32
    %c0_i32_0 = arith.constant 0 : i32
    %c0_i32_1 = arith.constant 0 : i32
    %c0_i32_2 = arith.constant 0 : i32
    return %c0_i32, %c0_i32_0, %c0_i32_1 : i32, i32, i32
  }
  func.func @transform_3(%arg0: i32) -> (i32, i32, i32) {
    %c0_i32 = arith.constant 0 : i32
    %c0_i32_0 = arith.constant 0 : i32
    %c0_i32_1 = arith.constant 0 : i32
    %c0_i32_2 = arith.constant 0 : i32
    return %c0_i32, %c0_i32_0, %c0_i32_1 : i32, i32, i32
  }
  func.func @transform_4(%arg0: i32) -> (i32, i32, i32) {
    %c0_i32 = arith.constant 0 : i32
    %c0_i32_0 = arith.constant 0 : i32
    %c0_i32_1 = arith.constant 0 : i32
    %c0_i32_2 = arith.constant 0 : i32
    return %c0_i32, %c0_i32_0, %c0_i32_1 : i32, i32, i32
  }
  func.func @transform_5(%arg0: i32) -> (i32, i32, i32) {
    %c0_i32 = arith.constant 0 : i32
    %c0_i32_0 = arith.constant 0 : i32
    %c0_i32_1 = arith.constant 0 : i32
    %c0_i32_2 = arith.constant 0 : i32
    return %c0_i32, %c0_i32_0, %c0_i32_1 : i32, i32, i32
  }
  func.func @transform_6(%arg0: i32) -> (i32, i32, i32) {
    %c0_i32 = arith.constant 0 : i32
    %c0_i32_0 = arith.constant 0 : i32
    %c0_i32_1 = arith.constant 0 : i32
    return %arg0, %c0_i32, %c0_i32_0 : i32, i32, i32
  }
}

</mosaic_0001>

<bundles_post_ra>
// kernel: transformer_decoder_trunk.1
= control target key start
LH: loop header
LB: loop body
LE: loop exit
PB: predicated region body
PF: predicated region fallthrough
CT: control target
= control target key end

     0   :  { %s6575_s0 = inlined_call_operand.hbm [shape: f32[2,8,128], index: 0, kind: input, shape index: {}]   ;;  %s6576_s1 = inlined_call_operand.hbm [shape: f32[2,16,128], index: 1, kind: input, shape index: {}]   ;;  %s6577_s2 = inlined_call_operand.hbm [shape: f32[2,4,128], index: 2, kind: input, shape index: {}]   ;;  %s6578_s3 = inlined_call_operand.hbm [shape: bf16[2,128,1536], index: 3, kind: input, shape index: {}]   ;;  %s6579_s4 = inlined_call_operand.hbm [shape: bf16[2,512,128], index: 4, kind: input, shape index: {}]   ;;  %s6580_s5 = inlined_call_operand.vmem [shape: f32[2,1,640], index: 5, kind: input, shape index: {}]   ;;  %s6581_s6 = inlined_call_operand.hbm [shape: f32[2,8,128], index: 6, kind: output, shape index: {}]  }
   0x1   :  { %6587 = sst [smem:[#allocation17_spill]] %s6575_s0 }
   0x2   :  { %6588 = sst [smem:[#allocation18_spill]] %s6577_s2 }
   0x3   :  { %11 = vsyncpa [#allocation3], 0 }
   0x4   :  { %13 = vsyncpa [#allocation3 + $0x1], 0 }
   0x5   :  { %14 = vsyncpa [#allocation6], 0 }
   0x6   :  { %16 = vsyncpa [#allocation6 + $0x1], 0 }
   0x7   :  { %17 = vsyncpa [#allocation9], 0 }
   0x8   :  { %18 = vsyncpa [#allocation4], 0 }
   0x9   :  { %20 = vsyncpa [#allocation4 + $0x1], 0  ;;  %s5968_s21 = smov 0   ;;  %s5970_s22 = smov 0  }
   0xa   :  { %s5972_s23 = smov 0   ;;  %s5974_s24 = smov 0  }
   0xb LB: > { %s5989_s25 = sadd.s32 4294967295, %s5915_s24   ;;  %s4433_s26 = sadd.s32 4294967294, %s5915_s24   ;;  %s5915_s24 = sphi %s5974_s24, %s6612_s24   ;;  %s5911_s23 = sphi %s5972_s23, %s6611_s23   ;;  %s5907_s22 = sphi %s5970_s22, %s6610_s22   ;;  %s5903_s21 = sphi %s5968_s21, %s6609_s21  }
   0xc   : > { %p46_p0 = scmp.ne.s32.totalorder %s5907_s22, %s5903_s21  ;;  %p6582_p1 = scmp.eq.s32.totalorder %s5989_s25, 0 }
   0xd   : > { %p186_p3 = scmp.eq.s32.totalorder %s4433_s26, 1  ;;  %p4434_p5 = scmp.ge.s32.totalorder %s5915_s24, 1 }
   0xe   : > { %p5998_p4 = por %p6582_p1, %p46_p0  ;;  %p193_p7 = scmp.lt.s32.totalorder %s5915_s24, 3 }
   0xf   : > { %p6003_p6 = por %p186_p3, %p46_p0  ;;  %s5917_s30 = smov [#allocation7]  }
  0x10   : > { %s6589_s27 = scalar_select %p5998_p4, 1, 0 }
  0x11   : > { %s6590_s28 = scalar_select %p6003_p6, 1, 0 }
  0x12   : > { %p6008_p8 = pnand %p4434_p5, %p193_p7  ;;  %s205_s7 = sshll.u32 %s5917_s30, 4  ;;  %s6012_s7 = int_to_ptr.vmem [resolvable:$true] %s205_s7 }
  0x13   : > { %s5918_s9 = smov [#allocation8]   ;;  %s6593_s2 = sld [smem:[#allocation18_spill]] }
  0x14   : > { %s6591_s29 = scalar_select %p6008_p8, 1, 0 }
  0x15   : > { %p5234_p9 = pneg %p6008_p8  ;;  %s218_s10 = sshll.u32 %s5918_s9, 4  ;;  %s6023_s10 = int_to_ptr.vmem [resolvable:$true] %s218_s10 }
  0x17   : > { %p6019_p11 = pnand %p5234_p9, %p6582_p1 }
  0x19   : > { %s5693_s13 = scalar_lea.hbm %s6593_s2, 128  ;;  %p6033_p13 = pneg %p6019_p11 }
  0x1a   : > { %p5694_p12 = scmp.ne.s32.totalorder %s6593_s2, %s5693_s13  ;;  %p5700_p5 = scmp.lt.u32.totalorder %s5693_s13, %s6593_s2 }
  0x1c   : > { %p5696_p0 = pnand %p6033_p13, %p5694_p12 }
  0x1e   : > { %p5697_p3 = pneg %p5696_p0 }
  0x20   : > { %p5702_p7 = pnand %p5700_p5, %p5697_p3 }
  0x22   : > { %5705 = shalt.err (!%p5702_p7)
}
  0x23   : > { %s5706_s19 = scalar_lea.vmem %s6012_s7, 128  ;;  %p5714_p2 = scmp.lt.s32.totalorder %s6012_s7, %s6012_s7 }
  0x24   : > { %p5707_p9 = scmp.ne.s32.totalorder %s6012_s7, %s5706_s19  ;;  %p5715_p6 = scmp.lt.s32.totalorder %s5706_s19, %s5706_s19 }
  0x26   : > { %p5709_p10 = pnand %p5707_p9, %p6033_p13  ;;  %p5716_p12 = por %p5715_p6, %p5714_p2 }
  0x28   : > { %p5710_p1 = pneg %p5709_p10 }
  0x2a   : > { %p5717_p0 = pnand %p5716_p12, %p5710_p1 }
  0x2c   : > { %5720 = shalt.err (!%p5717_p0)
}
  0x2d   : > { %s6583_s20 = smov 64   ;;  %s6584_s26 = smov 4  }
  0x2e   : > { %5237 = dma.hbm_to_vmem [thread:$0]  (!%p6019_p11), %s6593_s2, 128, %s6012_s7, [#allocation6], %s6583_s20, %s6583_s20, %s6584_s26  }
  0x2f   : > { %s5721_s13 = scalar_lea.hbm %s6578_s3, 24576 }
  0x30   : > { %p5722_p1 = scmp.ne.s32.totalorder %s6578_s3, %s5721_s13  ;;  %p5728_p10 = scmp.lt.u32.totalorder %s5721_s13, %s6578_s3 }
  0x32   : > { %p5724_p2 = pnand %p5722_p1, %p6033_p13 }
  0x34   : > { %p5725_p6 = pneg %p5724_p2 }
  0x36   : > { %p5730_p3 = pnand %p5728_p10, %p5725_p6 }
  0x38   : > { %5733 = shalt.err (!%p5730_p3)
}
  0x39   : > { %s5734_s7 = scalar_lea.vmem %s6023_s10, 24576  ;;  %p5742_p12 = scmp.lt.s32.totalorder %s6023_s10, %s6023_s10 }
  0x3a   : > { %p5735_p5 = scmp.ne.s32.totalorder %s6023_s10, %s5734_s7  ;;  %p5743_p0 = scmp.lt.s32.totalorder %s5734_s7, %s5734_s7 }
  0x3c   : > { %p5737_p7 = pnand %p5735_p5, %p6033_p13  ;;  %p5744_p1 = por %p5743_p0, %p5742_p12 }
  0x3e   : > { %p5738_p9 = pneg %p5737_p7 }
  0x40   : > { %p5745_p2 = pnand %p5744_p1, %p5738_p9 }
  0x42   : > { %5748 = shalt.err (!%p5745_p2)
}
  0x43   : > { %s5921_s19 = smov 768   ;;  %s5922_s30 = smov 48  }
  0x44   : > { %5240 = dma.hbm_to_vmem [thread:$0]  (!%p6019_p11), %s6578_s3, 24576, %s6023_s10, [#allocation9], %s5921_s19, %s5921_s19, %s5922_s30  }
  0x45   : > { %s5923_s12 = smov [#allocation10]   ;;  %s6081_s14 = sadd.s32 1, %s5915_s24  }
  0x46   : > { %s231_s13 = sshll.u32 %s5923_s12, 4  ;;  %s5749_s18 = scalar_lea.hbm %s6579_s4, 8192  ;;  %s232_s13 = int_to_ptr.vmem [resolvable:$true] %s231_s13 }
  0x47   : > { %p5750_p6 = scmp.ne.s32.totalorder %s6579_s4, %s5749_s18  ;;  %p5756_p5 = scmp.lt.u32.totalorder %s5749_s18, %s6579_s4 }
  0x49   : > { %p5752_p10 = pnand %p5750_p6, %p6033_p13 }
  0x4b   : > { %p5753_p3 = pneg %p5752_p10 }
  0x4d   : > { %p5758_p7 = pnand %p5756_p5, %p5753_p3 }
  0x4f   : > { %5761 = shalt.err (!%p5758_p7)
}
  0x50   : > { %s5762_s10 = scalar_lea.vmem %s232_s13, 8192  ;;  %p5770_p1 = scmp.lt.s32.totalorder %s232_s13, %s232_s13 }
  0x51   : > { %p5763_p9 = scmp.ne.s32.totalorder %s232_s13, %s5762_s10  ;;  %p5771_p2 = scmp.lt.s32.totalorder %s5762_s10, %s5762_s10 }
  0x53   : > { %p5765_p12 = pnand %p5763_p9, %p6033_p13  ;;  %p5772_p4 = por %p5771_p2, %p5770_p1 }
  0x55   : > { %p5766_p0 = pneg %p5765_p12 }
  0x57   : > { %p5773_p8 = pnand %p5772_p4, %p5766_p0 }
  0x59   : > { %5776 = shalt.err (!%p5773_p8)
}
  0x5a   : > { %s6595_s20 = smov 4   ;;  %s6596_s19 = smov 64  }
  0x5b   : > { %5243 = dma.hbm_to_vmem [thread:$0]  (!%p6019_p11), %s6579_s4, 8192, %s232_s13, [#allocation9], %s6596_s19, %s6596_s19, %s6595_s20  }
  0x5c   : > { %s30_s16 = ssub.s32 %s5915_s24, %s6081_s14  ;;  %s33_s8 = sadd.s32 1, %s5911_s23 }
  0x5d   : > { %p31_p4 = scmp.eq.s32.totalorder %s30_s16, 0  ;;  %p40_p8 = scmp.ne.s32.totalorder %s5911_s23, %s5907_s22 }
  0x5e   : > { %p41_p13 = scmp.eq.s32.totalorder %s5915_s24, 0  ;;  %p5258_p6 = scmp.lt.s32.totalorder %s5915_s24, 2 }
  0x5f   : > { %s6112_s30 = scalar_select %p31_p4, %s5911_s23, %s33_s8  }
  0x60   : > { %p42_p10 = por %p41_p13, %p40_p8  ;;  %p6597_p3 = scmp.eq.s32.totalorder %s5989_s25, 1 }
  0x61   : > { %s6121_s11 = sand.u32 1, %s5911_s23   ;;  %s4440_s12 = sshll.u32 %s5915_s24, 7 }
  0x62   : > { %p6116_p5 = por %p6597_p3, %p40_p8  ;;  %s4439_s13 = sshll.u32 %s6121_s11, 3 }
  0x63   : > { %s6599_s0 = sld [smem:[#allocation17_spill]]  ;;  %s252_s7 = scalar_lea.vmem [#allocation2], %s4439_s13 }
  0x64   : > { %s259_s10 = sshll.u32 %s252_s7, 4  ;;  %p6130_p11 = pnand %p5258_p6, %p42_p10  ;;  %s6134_s10 = int_to_ptr.vmem [resolvable:$true] %s259_s10 }
  0x65   : > { %s4441_s19 = sshll.u32 %s6121_s11, 4  ;;  %s249_s2 = scalar_lea.sflag [#allocation3], %s6121_s11 }
  0x66   : > { %p5779_p9 = pneg %p6130_p11 }
  0x69   : > { %s6128_s18 = scalar_lea.hbm %s6599_s0, %s4440_s12  ;;  %s5782_s12 = scalar_lea.hbm %s6599_s0, 256 }
  0x6a   : > { %s5777_s26 = scalar_lea.hbm %s6128_s18, 128  ;;  %p5783_p1 = scmp.lt.u32.totalorder %s6128_s18, %s6599_s0 }
  0x6b   : > { %p5778_p7 = scmp.ne.s32.totalorder %s6128_s18, %s5777_s26  ;;  %p5784_p2 = scmp.lt.u32.totalorder %s5782_s12, %s5777_s26 }
  0x6c   : > { %p5786_p8 = scmp.lt.u32.totalorder %s5777_s26, %s6128_s18 }
  0x6d   : > { %p5780_p12 = pnand %p5779_p9, %p5778_p7  ;;  %p5785_p4 = por %p5784_p2, %p5783_p1 }
  0x6f   : > { %p5781_p0 = pneg %p5780_p12  ;;  %p5787_p13 = por %p5786_p8, %p5785_p4 }
  0x71   : > { %p5788_p6 = pnand %p5787_p13, %p5781_p0 }
  0x73   : > { %5791 = shalt.err (!%p5788_p6)
}
  0x74   : > { %s5792_s17 = scalar_lea.vmem %s6134_s10, 128  ;;  %s5924_s7 = smov [#allocation2]  }
  0x75   : > { %p5793_p10 = scmp.ne.s32.totalorder %s6134_s10, %s5792_s17  ;;  %s5797_s16 = sshll.u32 %s5924_s7, 4  ;;  %s5798_s16 = int_to_ptr.vmem [resolvable:$false] %s5797_s16 }
  0x76   : > { %s5799_s8 = scalar_lea.vmem %s5798_s16, 256  ;;  %p5800_p12 = scmp.lt.s32.totalorder %s6134_s10, %s5798_s16 }
  0x77   : > { %p5795_p3 = pnand %p5793_p10, %p5779_p9  ;;  %p5801_p1 = scmp.lt.s32.totalorder %s5799_s8, %s5792_s17 }
  0x79   : > { %p5796_p7 = pneg %p5795_p3  ;;  %p5802_p2 = por %p5801_p1, %p5800_p12 }
  0x7b   : > { %p5803_p4 = pnand %p5802_p2, %p5796_p7 }
  0x7d   : > { %5806 = shalt.err (!%p5803_p4)
}
  0x7e   : > { %5247 = dma.hbm_to_vmem [thread:$0]  (!%p6130_p11), %s6128_s18, 128, %s6134_s10, %s249_s2  }
  0x7f   : > { %s270_s26 = scalar_lea.vmem [#allocation5], %s4441_s19  ;;  %s266_s13 = sand.u32 1, %s5915_s24  }
  0x80   : > { %s277_s12 = sshll.u32 %s270_s26, 4  ;;  %s4747_s15 = sshll.u32 %s5915_s24, 8  ;;  %s6166_s12 = int_to_ptr.vmem [resolvable:$true] %s277_s12 }
  0x81   : > { %s6172_s16 = scalar_lea.hbm %s6576_s1, %s4747_s15  ;;  %s6174_s8 = scalar_lea.sflag [#allocation6], %s266_s13 }
  0x82   : > { %s5807_s0 = scalar_lea.hbm %s6172_s16, 256  ;;  %s5812_s10 = scalar_lea.hbm %s6576_s1, 512 }
  0x83   : > { %p5808_p0 = scmp.ne.s32.totalorder %s6172_s16, %s5807_s0  ;;  %p5813_p6 = scmp.lt.u32.totalorder %s6172_s16, %s6576_s1 }
  0x84   : > { %p5814_p10 = scmp.lt.u32.totalorder %s5812_s10, %s5807_s0  ;;  %p5816_p7 = scmp.lt.u32.totalorder %s5807_s0, %s6172_s16 }
  0x85   : > { %p5810_p8 = pnand %p5808_p0, %p5779_p9 }
  0x86   : > { %p5815_p3 = por %p5814_p10, %p5813_p6 }
  0x87   : > { %p5811_p13 = pneg %p5810_p8 }
  0x88   : > { %p5817_p12 = por %p5816_p7, %p5815_p3 }
  0x8a   : > { %p5818_p1 = pnand %p5817_p12, %p5811_p13 }
  0x8c   : > { %5821 = shalt.err (!%p5818_p1)
}
  0x8d   : > { %s5822_s26 = scalar_lea.vmem %s6166_s12, 256  ;;  %s5925_s13 = smov [#allocation5]  }
  0x8e   : > { %p5823_p2 = scmp.ne.s32.totalorder %s6166_s12, %s5822_s26  ;;  %s5827_s15 = sshll.u32 %s5925_s13, 4  ;;  %s5828_s15 = int_to_ptr.vmem [resolvable:$false] %s5827_s15 }
  0x8f   : > { %s5829_s17 = scalar_lea.vmem %s5828_s15, 512  ;;  %p5830_p8 = scmp.lt.s32.totalorder %s6166_s12, %s5828_s15 }
  0x90   : > { %p5825_p4 = pnand %p5823_p2, %p5779_p9  ;;  %p5831_p6 = scmp.lt.s32.totalorder %s5829_s17, %s5822_s26 }
  0x92   : > { %p5826_p0 = pneg %p5825_p4  ;;  %p5832_p10 = por %p5831_p6, %p5830_p8 }
  0x94   : > { %p5833_p3 = pnand %p5832_p10, %p5826_p0 }
  0x96   : > { %5836 = shalt.err (!%p5833_p3)
}
  0x97   : > { %s5926_s0 = smov 128   ;;  %s5927_s7 = smov 8  }
  0x98   : > { %5250 = dma.hbm_to_vmem [thread:$0]  (!%p6130_p11), %s6172_s16, 256, %s6166_s12, %s6174_s8, %s5926_s0, %s5926_s0, %s5927_s7  }
  0x99   : > { %p6601_p9 = scmp.ne.s32.totalorder %s6591_s29, 0 }
  0x9a   : > { %s6203_s11 = sand.u32 (!%p6601_p9), 1, %s5907_s22   ;;  %p6602_p13 = scmp.ne.s32.totalorder (!%p6601_p9), %s6589_s27, 0 }
  0x9b   : > { %289 = sbr.rel (%p6601_p9) target bundleno = 8144 (0x1fd0), region = 44  ;;  %s4445_s18 = sshll.u32 (!%p6601_p9), %s6203_s11, 3 }
  0x9c   : > { %s292_s10 = scalar_lea.sflag (!%p6601_p9), [#allocation3], %s6203_s11  ;;  %s6209_s19 = scalar_lea.vmem (!%p6601_p9), [#allocation2], %s4445_s18 }
  0xa2   : > { %5882 = dma.done.wait (%p6602_p13), %s292_s10, 128  }
  0xa3   : > { %5884 = vsyncadd (%p6602_p13), %s292_s10, 4294967168  ;;  %s300_s29 = sand.u32 1, %s5989_s25   ;;  %s4446_s20 = sshll.u32 %s6203_s11, 4 }
  0xa4   : > { %s301_s12 = scalar_lea.sflag [#allocation6], %s300_s29  ;;  %s6217_s16 = scalar_lea.vmem [#allocation5], %s4446_s20 }
  0xa5   : > { %5886 = dma.done.wait (%p6602_p13), %s301_s12, 256  }
  0xa6   : > { %5888 = vsyncadd (%p6602_p13), %s301_s12, 4294967040  ;;  %p6603_p11 = scmp.eq.s32.totalorder %s5989_s25, 0 }
  0xa8   : > { %5890 = dma.done.wait (%p6603_p11), [#allocation6], 128   ;;  %p6604_p7 = pmov %p6603_p11 }
  0xaa   : > { %5892 = vsyncadd (%p6604_p7), [#allocation6], 4294967168  ;;  %p6605_p12 = pmov %p6604_p7 }
  0xab   : > { %p6606_p1 = pmov %p6604_p7 }
  0xac   : > { %5894 = dma.done.wait (%p6605_p12), [#allocation9], 32768  }
  0xad   : > { %5896 = vsyncadd (%p6606_p1), [#allocation9], 4294934528  ;;  %v351_v0 = vld [vmem:[%s6209_s19] sm:$0xff]  ;;  %v5928_v3 = vmov 0.0   ;;  %v5929_v25 = vmov 0   ;;  %vm5930_vm0 = vmmov 0  }
  0xae   : > { %355 = vadd.xlane.f32.xlu0 %v351_v0  ;;  %v5308_v1 = vld [vmem:[#allocation8 + $0x4] ss:$48 sps:$4 sm:$0xff]   ;;  %v5310_v2 = vld [vmem:[#allocation8] ss:$48 sps:$4 sm:$0xff]   ;;  %4944 = vmatprep.subr.bf16.mxu1 %v5928_v3  ;;  %v5311_v4 = vld [vmem:[#allocation8 + $0x8] ss:$48 sps:$4 sm:$0xff]  }
  0xaf   : > { %v5312_v5 = vld [vmem:[#allocation8 + $0x64] ss:$48 sps:$4 sm:$0xff]   ;;  %533 = vmatprep.subr.bf16.mxu0 %v5308_v1  ;;  %v5314_v6 = vld [vmem:[#allocation8 + $0x60] ss:$48 sps:$4 sm:$0xff]   ;;  %v5315_v7 = vld [vmem:[#allocation8 + $0x68] ss:$48 sps:$4 sm:$0xff]   ;;  %4945 = vmatpush3.bf16.msra.mxu1 %v5311_v4 }
  0xb0   : > { %534 = vmatpush1.bf16.msra.mxu0 %v5310_v2  ;;  %v5316_v8 = vld [vmem:[#allocation8 + $0xc4] ss:$48 sps:$4 sm:$0xff]   ;;  %4946 = vmatprep.subr.bf16.mxu1 %v5928_v3  ;;  %v5318_v9 = vld [vmem:[#allocation8 + $0xc0] ss:$48 sps:$4 sm:$0xff]   ;;  %v5319_v10 = vld [vmem:[#allocation8 + $0xc8] ss:$48 sps:$4 sm:$0xff]  }
  0xb1   : > { %535 = vmatprep.subr.bf16.mxu0 %v5312_v5  ;;  %v5320_v15 = vld [vmem:[#allocation8 + $0x124] ss:$48 sps:$4 sm:$0xff]   ;;  %v5322_v16 = vld [vmem:[#allocation8 + $0x120] ss:$48 sps:$4 sm:$0xff]   ;;  %v5323_v17 = vld [vmem:[#allocation8 + $0x128] ss:$48 sps:$4 sm:$0xff]   ;;  %565 = vmatprep.mubr.bf16.mxu0 %v5929_v25 }
  0xb2   : > { %v5324_v18 = vld [vmem:[#allocation8 + $0x184] ss:$48 sps:$4 sm:$0xff]   ;;  %v5326_v19 = vld [vmem:[#allocation8 + $0x180] ss:$48 sps:$4 sm:$0xff]   ;;  %v5327_v20 = vld [vmem:[#allocation8 + $0x188] ss:$48 sps:$4 sm:$0xff]   ;;  %4960 = vmatprep.mubr.msk.bf16.mxu1 %vm5930_vm0, %v5928_v3 }
  0xb3   : > { %4947 = vmatpush3.bf16.msra.mxu1 %v5315_v7  ;;  %v5328_v21 = vld [vmem:[#allocation8 + $0x1e4] ss:$48 sps:$4 sm:$0xff]   ;;  %v5330_v22 = vld [vmem:[#allocation8 + $0x1e0] ss:$48 sps:$4 sm:$0xff]   ;;  %v5331_v23 = vld [vmem:[#allocation8 + $0x1e8] ss:$48 sps:$4 sm:$0xff]  }
  0xb4   : > { %536 = vmatpush1.bf16.msra.mxu0 %v5314_v6  ;;  %4948 = vmatprep.subr.bf16.mxu1 %v5928_v3  ;;  %v5332_v24 = vld [vmem:[#allocation8 + $0x244] ss:$48 sps:$4 sm:$0xff]   ;;  %v5334_v26 = vld [vmem:[#allocation8 + $0x240] ss:$48 sps:$4 sm:$0xff]   ;;  %v5335_v27 = vld [vmem:[#allocation8 + $0x248] ss:$48 sps:$4 sm:$0xff]  }
  0xb5   : > { %537 = vmatprep.subr.bf16.mxu0 %v5316_v8  ;;  %v5336_v28 = vld [vmem:[#allocation8 + $0x2a4] ss:$48 sps:$4 sm:$0xff]   ;;  %v5338_v29 = vld [vmem:[#allocation8 + $0x2a0] ss:$48 sps:$4 sm:$0xff]   ;;  %v5339_v30 = vld [vmem:[#allocation8 + $0x2a8] ss:$48 sps:$4 sm:$0xff]  }
  0xb6   : > { %v4451_v35 = vld [vmem:[#allocation7] ss:$0 sm:$0xff]  ;;  %vm697_vm1 = vcmask 1043456   ;;  %vm632_vm2 = vcmask 523264   ;;  %s5931_s27 = smov 64   ;;  %vm680_vm3 = vcmask 64512  }
  0xb7   : > { %4949 = vmatpush3.bf16.msra.mxu1 %v5319_v10  ;;  %vm1348_vm4 = vcmask 130048   ;;  %s4744_s10 = sshll.u32 %s5989_s25, 7  ;;  %s5932_s25 = smov [#allocation11]  }
  0xb8   : > { %538 = vmatpush1.bf16.msra.mxu0 %v5318_v9  ;;  %4950 = vmatprep.subr.bf16.mxu1 %v5928_v3 }
  0xb9   : > { %539 = vmatprep.subr.bf16.mxu0 %v5320_v15 }
  0xbb   : > { %4951 = vmatpush3.bf16.msra.mxu1 %v5323_v17 }
  0xbc   : > { %540 = vmatpush1.bf16.msra.mxu0 %v5322_v16  ;;  %4952 = vmatprep.subr.bf16.mxu1 %v5928_v3 }
  0xbd   : > { %541 = vmatprep.subr.bf16.mxu0 %v5324_v18  ;;  %v5344_v18 = vld [vmem:[#allocation8 + $0x18c] ss:$48 sps:$4 sm:$0xff]  }
  0xbf   : > { %4953 = vmatpush3.bf16.msra.mxu1 %v5327_v20  ;;  %v5346_v20 = vld [vmem:[#allocation8 + $0x24c] ss:$48 sps:$4 sm:$0xff]  }
  0xc0   : > { %542 = vmatpush1.bf16.msra.mxu0 %v5326_v19  ;;  %4954 = vmatprep.subr.bf16.mxu1 %v5928_v3  ;;  %v5345_v19 = vld [vmem:[#allocation8 + $0x1ec] ss:$48 sps:$4 sm:$0xff]  }
  0xc1   : > { %543 = vmatprep.subr.bf16.mxu0 %v5328_v21 }
  0xc3   : > { %4955 = vmatpush3.bf16.msra.mxu1 %v5331_v23 }
  0xc4   : > { %544 = vmatpush1.bf16.msra.mxu0 %v5330_v22  ;;  %4956 = vmatprep.subr.bf16.mxu1 %v5928_v3 }
  0xc5   : > { %545 = vmatprep.subr.bf16.mxu0 %v5332_v24 }
  0xc7   : > { %4957 = vmatpush3.bf16.msra.mxu1 %v5335_v27  ;;  %v5340_v27 = vld [vmem:[#allocation8 + $0xc] ss:$48 sps:$4 sm:$0xff]  }
  0xc8   : > { %546 = vmatpush1.bf16.msra.mxu0 %v5334_v26  ;;  %4958 = vmatprep.subr.bf16.mxu1 %v5928_v3 }
  0xc9   : > { %547 = vmatprep.subr.bf16.mxu0 %v5336_v28 }
  0xcb   : > { %4959 = vmatpush3.bf16.msra.mxu1 %v5339_v30  ;;  %v5342_v30 = vld [vmem:[#allocation8 + $0xcc] ss:$48 sps:$4 sm:$0xff]  }
  0xcc   : > { %548 = vmatpush1.bf16.msra.mxu0 %v5338_v29  ;;  %4970 = vmatprep.subr.bf16.mxu1 %v5928_v3  ;;  %v5341_v29 = vld [vmem:[#allocation8 + $0x6c] ss:$48 sps:$4 sm:$0xff]  }
  0xcd   : > { %4964 = vmatprep.subr.bf16.mxu0 %v5928_v3 }
 0x13b   : > { %v356_v11 = vpop.xlane.xlu0 %355 }
 0x13c   : > { %v358_v12 = vmul.f32 0.0078125, %v356_v11 }
 0x13e   : > { %v359_v13 = vsub.f32 %v351_v0, %v358_v12 }
 0x140   : > { %v360_v14 = vmul.f32 %v359_v13, %v359_v13 }
 0x142   : > { %361 = vadd.xlane.f32.xlu0 %v360_v14 }
 0x1cf   : > { %v362_v31 = vpop.xlane.xlu0 %361 }
 0x1d0   : > { %v363_v32 = vmul.f32 0.0078125, %v362_v31  ;;  %v5343_v31 = vld [vmem:[#allocation8 + $0x12c] ss:$48 sps:$4 sm:$0xff]  }
 0x1d2   : > { %v364_v33 = vadd.f32 1e-06, %v363_v32  ;;  %v5347_v32 = vld [vmem:[#allocation8 + $0x2ac] ss:$48 sps:$4 sm:$0xff]  }
 0x1d4   : > { %5628 = vrsqrt.f32 %v364_v33  ;;  %v352_v33 = vld [vmem:[%s6217_s16] sm:$0xff] }
 0x1de   : > { %v5629_v34 = vpop.eup %5628 }
 0x1df   : > { %v366_v36 = vmul.f32 %v5629_v34, %v359_v13  ;;  %v353_v34 = vld [vmem:[%s6217_s16 + $0x8] sm:$0xff]  ;;  %s6531_s16 = scalar_lea.hbm %s6581_s6, %s4744_s10 }
 0x1e1   : > { %v371_v37 = vmul.f32 %v4451_v35, %v366_v36 }
 0x1e3   : > { %v404_v38 = vpack.c.bf16 %v371_v37, %v371_v37 }
 0x1e5   : > { %566 = vmatmul.mubr.bf16.vlgmr.msra.gmra.mrb[0].mxu0 %v404_v38  ;;  %4961 = vmatmul.mubr.bf16.vlgmr.msra.gmra.mrb[0].mxu1 %v404_v38 }
 0x1e6   : > { %4966 = vmatprep.mubr.msk.bf16.mxu0 %vm5930_vm0, %v5928_v3  ;;  %4972 = vmatprep.mubr.msk.bf16.mxu1 %vm5930_vm0, %v5928_v3 }
 0x2b8   : > { %v567_v39 = vpop.f32.mrb[0].mxu0  ;;  %v608_v40 = vpop.f32.mrb[0].mxu1 }
 0x2b9   : > { %v693_v41 = vpack.c.bf16 %v608_v40, %v608_v40  ;;  %v569_v42 = vpop.f32.mrb[1].mxu0  ;;  %v4962_v43 = vpop.f32.mrb[1].mxu1  ;;  %v630_v51 = vpack.c.bf16 %v567_v39, %v567_v39 }
 0x2ba   : > { %v631_v44 = vpack.c.bf16 %v569_v42, %v569_v42  ;;  %v571_v45 = vpop.f32.mrb[2].mxu0  ;;  %v611_v46 = vpop.f32.mrb[2].mxu1 }
 0x2bb   : > { %v699_v47 = vsel %vm697_vm1, %v693_v41, 0  ;;  %v572_v48 = vpop.f32.mrb[3].mxu0  ;;  %v4963_v49 = vpop.f32.mrb[3].mxu1  ;;  %v5348_v46 = vld [vmem:[#allocation8 + $0x14] ss:$48 sps:$4 sm:$0xff]  }
 0x2bc   : > { %v637_v50 = vsel %vm632_vm2, %v631_v44, 0  ;;  %4971 = vmatpush3.bf16.msra.mxu1 %v699_v47  ;;  %746 = vrot.lane.b32.xlu1 %v631_v44, %s5931_s27  ;;  %v5350_v47 = vld [vmem:[#allocation8 + $0x18] ss:$48 sps:$4 sm:$0xff]  }
 0x2bd   : > { %4965 = vmatpush3.bf16.xpose.msra.mxu0 %v637_v50  ;;  %4982 = vmatprep.subr.bf16.mxu1 %v5928_v3 }
 0x2be   : > { %4976 = vmatprep.subr.bf16.mxu0 %v5928_v3 }
 0x2c0   : > { %743 = vrot.lane.b32.xlu1 %v630_v51, %s5931_s27 }
 0x2c4   : > { %4967 = vmatmul.mubr.msk.bf16.vlgmr.msra.gmra.mrb[4].mxu0 %vm632_vm2, %v630_v51 }
 0x2c5   : > { %4978 = vmatprep.mubr.msk.bf16.mxu0 %vm5930_vm0, %v5928_v3 }
 0x32e   : > { %v747_v52 = vpop.permute.xlu1 %746 }
 0x32f   : > { %v752_v53 = vsel %vm632_vm2, %v747_v52, 0 }
 0x330   : > { %4977 = vmatpush3.bf16.xpose.msra.mxu0 %v752_v53 }
 0x331   : > { %4988 = vmatprep.subr.bf16.mxu0 %v5928_v3 }
 0x332   : > { %v744_v54 = vpop.permute.xlu1 %743 }
 0x337   : > { %4979 = vmatmul.mubr.msk.bf16.vlgmr.msra.gmra.mrb[8].mxu0 %vm632_vm2, %v744_v54 }
 0x338   : > { %4996 = vmatprep.mubr.msk.bf16.mxu0 %vm5930_vm0, %v5928_v3  ;;  %4989 = vmatpush3.bf16.msra.mxu0 %v5344_v18  ;;  %v5373_v18 = vld [vmem:[#allocation8 + $0x70] ss:$48 sps:$4 sm:$0xff]  }
 0x339   : > { %4990 = vmatprep.subr.bf16.mxu0 %v5928_v3 }
 0x33c   : > { %4991 = vmatpush3.bf16.msra.mxu0 %v5345_v19  ;;  %v5374_v19 = vld [vmem:[#allocation8 + $0xd0] ss:$48 sps:$4 sm:$0xff]  }
 0x33d   : > { %4992 = vmatprep.subr.bf16.mxu0 %v5928_v3 }
 0x340   : > { %4993 = vmatpush3.bf16.msra.mxu0 %v5346_v20 }
 0x341   : > { %4994 = vmatprep.subr.bf16.mxu0 %v5928_v3 }
 0x344   : > { %4995 = vmatpush3.bf16.msra.mxu0 %v5347_v32  ;;  %v5375_v32 = vld [vmem:[#allocation8 + $0x130] ss:$48 sps:$4 sm:$0xff]  }
 0x345   : > { %5012 = vmatprep.subr.bf16.mxu0 %v5928_v3 }
 0x397   : > { %v673_v55 = vpop.f32.mrb[4].mxu0 }
 0x398   : > { %v679_v56 = vmul.f32 0.125, %v673_v55  ;;  %v4968_v57 = vpop.f32.mrb[5].mxu0 }
 0x399   : > { %v676_v58 = vpop.f32.mrb[6].mxu0 }
 0x39a   : > { %v4969_v59 = vpop.f32.mrb[7].mxu0  ;;  %v681_v60 = vsel %vm680_vm3, %v679_v56, -inf }
 0x39b   : > { %682 = vmax.xlane.f32.xlu0 %v681_v60  ;;  %v5692_v60 = vld [vmem:[%s6209_s19] sm:$0xff]  ;;  %s349_s19 = scalar_lea.vmem [#allocation11], %s4445_s18  ;;  %s5841_s18 = sshll.u32 %s5932_s25, 4  ;;  %s5842_s18 = int_to_ptr.vmem [resolvable:$false] %s5841_s18 }
 0x39c   : > { %s4312_s29 = sshll.u32 %s349_s19, 4  ;;  %s5843_s2 = scalar_lea.vmem %s5842_s18, 256  ;;  %s6533_s29 = int_to_ptr.vmem [resolvable:$true] %s4312_s29 }
 0x39d   : > { %s5837_s8 = scalar_lea.vmem %s6533_s29, 128  ;;  %p5844_p8 = scmp.lt.s32.totalorder %s6533_s29, %s5842_s18 }
 0x39e   : > { %p5838_p2 = scmp.ne.s32.totalorder %s6533_s29, %s5837_s8  ;;  %p5845_p6 = scmp.lt.s32.totalorder %s5843_s2, %s5837_s8 }
 0x3a0   : > { %p5839_p4 = pnand %p5838_p2, %p6116_p5  ;;  %p5846_p10 = por %p5845_p6, %p5844_p8 }
 0x3a2   : > { %p5840_p0 = pneg %p5839_p4 }
 0x3a4   : > { %p5847_p3 = pnand %p5846_p10, %p5840_p0 }
 0x40a   : > { %v788_v61 = vpop.f32.mrb[8].mxu0 }
 0x40b   : > { %v794_v62 = vmul.f32 0.125, %v788_v61  ;;  %v4980_v63 = vpop.f32.mrb[9].mxu0 }
 0x40c   : > { %v791_v0 = vpop.f32.mrb[10].mxu0 }
 0x40d   : > { %v4981_v1 = vpop.f32.mrb[11].mxu0  ;;  %v795_v2 = vsel %vm680_vm3, %v794_v62, -inf }
 0x40e   : > { %796 = vmax.xlane.f32.xlu1 %v795_v2  ;;  %v5353_v2 = vld [vmem:[#allocation8 + $0x78] ss:$48 sps:$4 sm:$0xff]  }
 0x412   : > { %1012 = vadd.xlane.f32.xlu1 %v353_v34 }
 0x428   : > { %v683_v4 = vpop.xlane.xlu0 %682 }
 0x429   : > { %v684_v5 = vsub.f32 %v679_v56, %v683_v4  ;;  %v5351_v4 = vld [vmem:[#allocation8 + $0x74] ss:$48 sps:$4 sm:$0xff]  }
 0x42b   : > { %v685_v6 = vmul.f32 1.442695, %v684_v5  ;;  %v5356_v5 = vld [vmem:[#allocation8 + $0xd8] ss:$48 sps:$4 sm:$0xff]  }
 0x42d   : > { %5630 = vpow2.f32 %v685_v6  ;;  %v5354_v6 = vld [vmem:[#allocation8 + $0xd4] ss:$48 sps:$4 sm:$0xff]  }
 0x437   : > { %v5631_v7 = vpop.eup %5630 }
 0x438   : > { %v687_v8 = vsel %vm680_vm3, %v5631_v7, 0.0 }
 0x439   : > { %688 = vadd.xlane.f32.xlu0 %v687_v8  ;;  %v5357_v8 = vld [vmem:[#allocation8 + $0x134] ss:$48 sps:$4 sm:$0xff]  }
 0x49b   : > { %v797_v9 = vpop.xlane.xlu1 %796 }
 0x49c   : > { %v798_v10 = vsub.f32 %v794_v62, %v797_v9  ;;  %v5362_v9 = vld [vmem:[#allocation8 + $0x198] ss:$48 sps:$4 sm:$0xff]  }
 0x49e   : > { %v799_v11 = vmul.f32 1.442695, %v798_v10  ;;  %v5360_v10 = vld [vmem:[#allocation8 + $0x194] ss:$48 sps:$4 sm:$0xff]  }
 0x49f   : > { %v1013_v53 = vpop.xlane.xlu1 %1012 }
 0x4a0   : > { %5632 = vpow2.f32 %v799_v11  ;;  %v1015_v58 = vmul.f32 0.0078125, %v1013_v53  ;;  %v5365_v11 = vld [vmem:[#allocation8 + $0x1f8] ss:$48 sps:$4 sm:$0xff]  }
 0x4a2   : > { %v6296_v63 = vsub.f32 %v353_v34, %v1015_v58 }
 0x4a4   : > { %v1019_v1 = vmul.f32 %v6296_v63, %v6296_v63 }
 0x4aa   : > { %v5633_v12 = vpop.eup %5632 }
 0x4ab   : > { %v801_v13 = vsel %vm680_vm3, %v5633_v12, 0.0 }
 0x4ac   : > { %802 = vadd.xlane.f32.xlu0 %v801_v13  ;;  %v5368_v13 = vld [vmem:[#allocation8 + $0x258] ss:$48 sps:$4 sm:$0xff]  }
 0x4c2   : > { %808 = vrot.lane.b32.xlu0 %v693_v41, %s5931_s27 }
 0x4c6   : > { %v689_v14 = vpop.xlane.xlu0 %688 }
 0x4c7   : > { %5634 = vrcp.f32 %v689_v14  ;;  %v5366_v14 = vld [vmem:[#allocation8 + $0x254] ss:$48 sps:$4 sm:$0xff]  }
 0x4d1   : > { %v5635_v15 = vpop.eup %5634 }
 0x4d2   : > { %v691_v16 = vmul.f32 %v5635_v15, %v5631_v7  ;;  %v5359_v7 = vld [vmem:[#allocation8 + $0x138] ss:$48 sps:$4 sm:$0xff]  }
 0x4d3   : > { %v5371_v15 = vld [vmem:[#allocation8 + $0x2b8] ss:$48 sps:$4 sm:$0xff]  }
 0x4d4   : > { %v692_v17 = vpack.c.bf16 %v691_v16, %v691_v16  ;;  %v5369_v16 = vld [vmem:[#allocation8 + $0x2b4] ss:$48 sps:$4 sm:$0xff]  }
 0x4d6   : > { %4973 = vmatmul.mubr.msk.bf16.vlgmr.msra.gmra.mrb[4].mxu1 %vm680_vm3, %v692_v17  ;;  %v5372_v17 = vld [vmem:[#allocation8 + $0x10] ss:$48 sps:$4 sm:$0xff]  }
 0x4d7   : > { %4984 = vmatprep.mubr.msk.bf16.mxu1 %vm5930_vm0, %v5928_v3 }
 0x4e1   : > { %1010 = vadd.xlane.f32.xlu0 %v352_v33 }
 0x539   : > { %v803_v21 = vpop.xlane.xlu0 %802 }
 0x53a   : > { %5636 = vrcp.f32 %v803_v21 }
 0x53d   : > { %v809_v22 = vpop.permute.xlu0 %808 }
 0x53e   : > { %v814_v23 = vsel %vm697_vm1, %v809_v22, 0 }
 0x53f   : > { %4983 = vmatpush3.bf16.msra.mxu1 %v814_v23 }
 0x540   : > { %5000 = vmatprep.subr.bf16.mxu1 %v5928_v3 }
 0x544   : > { %v5637_v24 = vpop.eup %5636 }
 0x545   : > { %v805_v26 = vmul.f32 %v5637_v24, %v5633_v12  ;;  %v5363_v12 = vld [vmem:[#allocation8 + $0x1f4] ss:$48 sps:$4 sm:$0xff]  }
 0x547   : > { %v806_v28 = vpack.c.bf16 %v805_v26, %v805_v26 }
 0x549   : > { %4985 = vmatmul.mubr.msk.bf16.vlgmr.msra.gmra.mrb[8].mxu1 %vm680_vm3, %v806_v28 }
 0x54a   : > { %5001 = vmatpush3.bf16.msra.mxu1 %v5340_v27  ;;  %5008 = vmatprep.mubr.msk.bf16.mxu1 %vm5930_vm0, %v5928_v3 }
 0x54b   : > { %5002 = vmatprep.subr.bf16.mxu1 %v5928_v3 }
 0x54e   : > { %5003 = vmatpush3.bf16.msra.mxu1 %v5341_v29 }
 0x54f   : > { %5004 = vmatprep.subr.bf16.mxu1 %v5928_v3 }
 0x552   : > { %5005 = vmatpush3.bf16.msra.mxu1 %v5342_v30 }
 0x553   : > { %5006 = vmatprep.subr.bf16.mxu1 %v5928_v3 }
 0x556   : > { %5007 = vmatpush3.bf16.msra.mxu1 %v5343_v31 }
 0x557   : > { %1240 = vmatprep.subr.bf16.mxu1 %v5350_v47  ;;  %v5379_v47 = vld [vmem:[#allocation8 + $0x2b0] ss:$48 sps:$4 sm:$0xff]  }
 0x56e   : > { %v1011_v51 = vpop.xlane.xlu0 %1010 }
 0x56f   : > { %v1014_v52 = vmul.f32 0.0078125, %v1011_v51 }
 0x571   : > { %v6290_v57 = vsub.f32 %v352_v33, %v1014_v52  ;;  %v4490_v52 = vld [vmem:[#allocation7 + $0x1] ss:$0 sm:$0xff] }
 0x573   : > { %v1018_v0 = vmul.f32 %v6290_v57, %v6290_v57 }
 0x5a9   : > { %v735_v35 = vpop.f32.mrb[4].mxu1 }
 0x5aa   : > { %v741_v36 = vpack.c.bf16 %v735_v35, %v735_v35  ;;  %v4974_v37 = vpop.f32.mrb[5].mxu1  ;;  %v4491_v35 = vld [vmem:[#allocation7 + $0x2] ss:$0 sm:$0xff] }
 0x5ab   : > { %v738_v38 = vpop.f32.mrb[6].mxu1 }
 0x5ac   : > { %v4975_v39 = vpop.f32.mrb[7].mxu1  ;;  %5009 = vmatmul.mubr.msk.bf16.vlgmr.msra.gmra.mrb[12].mxu1 %vm632_vm2, %v741_v36  ;;  %v4636_v36 = vld [vmem:[#allocation7 + $0x6] ss:$0 sm:$0xff]  ;;  %v5376_v38 = vld [vmem:[#allocation8 + $0x190] ss:$48 sps:$4 sm:$0xff]  }
 0x5ad   : > { %1272 = vmatprep.mubr.bf16.mxu1 %v5929_v25  ;;  %1241 = vmatpush1.bf16.msra.mxu1 %v5348_v46  ;;  %v5378_v46 = vld [vmem:[#allocation8 + $0x250] ss:$48 sps:$4 sm:$0xff]  }
 0x5ae   : > { %1242 = vmatprep.subr.bf16.mxu1 %v5353_v2 }
 0x5b1   : > { %1243 = vmatpush1.bf16.msra.mxu1 %v5351_v4 }
 0x5b2   : > { %1244 = vmatprep.subr.bf16.mxu1 %v5356_v5 }
 0x5b5   : > { %1245 = vmatpush1.bf16.msra.mxu1 %v5354_v6 }
 0x5b6   : > { %1246 = vmatprep.subr.bf16.mxu1 %v5359_v7 }
 0x5b9   : > { %1247 = vmatpush1.bf16.msra.mxu1 %v5357_v8 }
 0x5ba   : > { %1248 = vmatprep.subr.bf16.mxu1 %v5362_v9 }
 0x5bd   : > { %1249 = vmatpush1.bf16.msra.mxu1 %v5360_v10 }
 0x5be   : > { %1250 = vmatprep.subr.bf16.mxu1 %v5365_v11 }
 0x5c1   : > { %1251 = vmatpush1.bf16.msra.mxu1 %v5363_v12 }
 0x5c2   : > { %1252 = vmatprep.subr.bf16.mxu1 %v5368_v13 }
 0x5c5   : > { %1253 = vmatpush1.bf16.msra.mxu1 %v5366_v14 }
 0x5c6   : > { %1254 = vmatprep.subr.bf16.mxu1 %v5371_v15 }
 0x5c9   : > { %1255 = vmatpush1.bf16.msra.mxu1 %v5369_v16 }
 0x5ca   : > { %5038 = vmatprep.subr.bf16.mxu1 %v5928_v3 }
 0x61c   : > { %v850_v40 = vpop.f32.mrb[8].mxu1 }
 0x61d   : > { %v856_v41 = vpack.c.bf16 %v850_v40, %v850_v40  ;;  %v4986_v42 = vpop.f32.mrb[9].mxu1 }
 0x61e   : > { %v853_v43 = vpop.f32.mrb[10].mxu1 }
 0x61f   : > { %v4987_v44 = vpop.f32.mrb[11].mxu1  ;;  %4997 = vmatmul.mubr.msk.bf16.vlgmr.msra.gmra.mrb[12].mxu0 %vm632_vm2, %v856_v41  ;;  %v5377_v43 = vld [vmem:[#allocation8 + $0x1f0] ss:$48 sps:$4 sm:$0xff]  }
 0x620   : > { %5028 = vmatprep.mubr.msk.bf16.mxu0 %vm5930_vm0, %v5928_v3  ;;  %5013 = vmatpush3.bf16.msra.mxu0 %v5372_v17 }
 0x621   : > { %5014 = vmatprep.subr.bf16.mxu0 %v5928_v3 }
 0x624   : > { %5015 = vmatpush3.bf16.msra.mxu0 %v5373_v18 }
 0x625   : > { %5016 = vmatprep.subr.bf16.mxu0 %v5928_v3 }
 0x628   : > { %5017 = vmatpush3.bf16.msra.mxu0 %v5374_v19 }
 0x629   : > { %5018 = vmatprep.subr.bf16.mxu0 %v5928_v3 }
 0x62c   : > { %5019 = vmatpush3.bf16.msra.mxu0 %v5375_v32 }
 0x62d   : > { %5020 = vmatprep.subr.bf16.mxu0 %v5928_v3 }
 0x630   : > { %5021 = vmatpush3.bf16.msra.mxu0 %v5376_v38  ;;  %v5386_v38 = vld [vmem:[#allocation8 + $0x25c] ss:$48 sps:$4 sm:$0xff]  }
 0x631   : > { %5022 = vmatprep.subr.bf16.mxu0 %v5928_v3 }
 0x634   : > { %5023 = vmatpush3.bf16.msra.mxu0 %v5377_v43 }
 0x635   : > { %5024 = vmatprep.subr.bf16.mxu0 %v5928_v3 }
 0x638   : > { %5025 = vmatpush3.bf16.msra.mxu0 %v5378_v46  ;;  %v5380_v46 = vld [vmem:[#allocation8 + $0x1c] ss:$48 sps:$4 sm:$0xff]  }
 0x639   : > { %5026 = vmatprep.subr.bf16.mxu0 %v5928_v3 }
 0x63c   : > { %5027 = vmatpush3.bf16.msra.mxu0 %v5379_v47 }
 0x63d   : > { %5032 = vmatprep.subr.bf16.mxu0 %v5928_v3 }
 0x67f   : > { %v985_v45 = vpop.f32.mrb[12].mxu1 }
 0x680   : > { %v5010_v48 = vpop.f32.mrb[13].mxu1 }
 0x681   : > { %v988_v49 = vpop.f32.mrb[14].mxu1 }
 0x682   : > { %v5011_v50 = vpop.f32.mrb[15].mxu1 }
 0x6f2   : > { %v918_v54 = vpop.f32.mrb[12].mxu0 }
 0x6f3   : > { %v986_v55 = vadd.f32 %v985_v45, %v918_v54  ;;  %v4998_v56 = vpop.f32.mrb[13].mxu0 }
 0x6f4   : > { %v921_v59 = vpop.f32.mrb[14].mxu0 }
 0x6f5   : > { %v6293_v61 = vadd.f32 %v5692_v60, %v986_v55  ;;  %v4999_v62 = vpop.f32.mrb[15].mxu0 }
 0x6f7   : > { %993 = vadd.xlane.f32.xlu1 %v6293_v61 }
 0x6fb   : > { %1020 = vadd.xlane.f32.xlu1 %v1018_v0 }
 0x6ff   : > { %1022 = vadd.xlane.f32.xlu1 %v1019_v1 }
 0x784   : > { %v994_v20 = vpop.xlane.xlu1 %993 }
 0x785   : > { %v995_v21 = vmul.f32 0.0078125, %v994_v20 }
 0x787   : > { %v996_v22 = vsub.f32 %v6293_v61, %v995_v21 }
 0x788   : > { %v1021_v23 = vpop.xlane.xlu1 %1020 }
 0x789   : > { %v1024_v24 = vmul.f32 0.0078125, %v1021_v23  ;;  %v997_v26 = vmul.f32 %v996_v22, %v996_v22 }
 0x78b   : > { %v1026_v27 = vadd.f32 1e-06, %v1024_v24  ;;  %998 = vadd.xlane.f32.xlu1 %v997_v26 }
 0x78c   : > { %v1023_v28 = vpop.xlane.xlu1 %1022 }
 0x78d   : > { %5638 = vrsqrt.f32 %v1026_v27  ;;  %v1025_v29 = vmul.f32 0.0078125, %v1023_v28 }
 0x78f   : > { %v1027_v30 = vadd.f32 1e-06, %v1025_v29 }
 0x791   : > { %5640 = vrsqrt.f32 %v1027_v30 }
 0x797   : > { %v5639_v31 = vpop.eup %5638 }
 0x798   : > { %v1030_v33 = vmul.f32 %v5639_v31, %v6290_v57 }
 0x79a   : > { %v1036_v39 = vmul.f32 %v4491_v35, %v1030_v33  ;;  %v6310_v41 = vmul.f32 %v4636_v36, %v1030_v33 }
 0x79b   : > { %v5641_v34 = vpop.eup %5640 }
 0x79c   : > { %v1031_v37 = vmul.f32 %v5641_v34, %v6296_v63 }
 0x79e   : > { %v1037_v40 = vmul.f32 %v4491_v35, %v1031_v37  ;;  %v6312_v42 = vmul.f32 %v4636_v36, %v1031_v37  ;;  %v5384_v36 = vld [vmem:[#allocation8 + $0x19c] ss:$48 sps:$4 sm:$0xff]  }
 0x79f   : > { %v5385_v37 = vld [vmem:[#allocation8 + $0x1fc] ss:$48 sps:$4 sm:$0xff]  }
 0x7a0   : > { %v1159_v44 = vpack.c.bf16 %v1037_v40, %v1036_v39  ;;  %v3118_v45 = vpack.c.bf16 %v6312_v42, %v6310_v41 }
 0x7a2   : > { %1273 = vmatmul.mubr.bf16.vlgmr.msra.gmra.mrb[16].mxu1 %v1159_v44 }
 0x7a3   : > { %5040 = vmatprep.mubr.msk.bf16.mxu1 %vm5930_vm0, %v5928_v3 }
 0x818   : > { %v999_v48 = vpop.xlane.xlu1 %998 }
 0x819   : > { %v1000_v49 = vmul.f32 0.0078125, %v999_v48  ;;  %v5381_v48 = vld [vmem:[#allocation8 + $0x7c] ss:$48 sps:$4 sm:$0xff]  }
 0x81b   : > { %v1001_v50 = vadd.f32 1e-06, %v1000_v49  ;;  %v5382_v49 = vld [vmem:[#allocation8 + $0xdc] ss:$48 sps:$4 sm:$0xff]  }
 0x81d   : > { %5642 = vrsqrt.f32 %v1001_v50  ;;  %v5383_v50 = vld [vmem:[#allocation8 + $0x13c] ss:$48 sps:$4 sm:$0xff]  }
 0x827   : > { %v5643_v51 = vpop.eup %5642 }
 0x828   : > { %v1003_v53 = vmul.f32 %v5643_v51, %v996_v22  ;;  %v5387_v51 = vld [vmem:[#allocation8 + $0x2bc] ss:$48 sps:$4 sm:$0xff]  }
 0x82a   : > { %v1008_v54 = vmul.f32 %v4490_v52, %v1003_v53 }
 0x82c   : > { %v1054_v55 = vpack.c.bf16 %v1008_v54, %v1008_v54 }
 0x82e   : > { %5029 = vmatmul.mubr.bf16.vlgmr.msra.gmra.mrb[16].mxu0 %v1054_v55 }
 0x82f   : > { %5034 = vmatprep.mubr.msk.bf16.mxu0 %vm5930_vm0, %v5928_v3 }
 0x875   : > { %v1274_v56 = vpop.f32.mrb[16].mxu1 }
 0x876   : > { %v1276_v57 = vpop.f32.mrb[17].mxu1 }
 0x877   : > { %v1278_v58 = vpop.f32.mrb[18].mxu1 }
 0x878   : > { %v1300_v59 = vpack.c.bf16 %v1278_v58, %v1274_v56  ;;  %v1280_v60 = vpop.f32.mrb[19].mxu1 }
 0x879   : > { %v1361_v62 = vpack.c.bf16 %v1280_v60, %v1276_v57 }
 0x87a   : > { %v1305_v63 = vsel %vm632_vm2, %v1300_v59, 0  ;;  %1410 = vrot.lane.b32.xlu1 %v1300_v59, %s5931_s27 }
 0x87b   : > { %5033 = vmatpush3.bf16.xpose.msra.mxu0 %v1305_v63  ;;  %5039 = vmatpush3.bf16.msra.mxu1 %v1361_v62 }
 0x87c   : > { %5044 = vmatprep.subr.bf16.mxu0 %v5928_v3  ;;  %5050 = vmatprep.subr.bf16.mxu1 %v5928_v3 }
 0x8ec   : > { %v1411_v0 = vpop.permute.xlu1 %1410 }
 0x8ed   : > { %v1416_v6 = vsel %vm632_vm2, %v1411_v0, 0 }
 0x901   : > { %v1137_v1 = vpop.f32.mrb[16].mxu0 }
 0x902   : > { %v1299_v2 = vpack.c.bf16 %v1137_v1, %v1137_v1  ;;  %v5030_v4 = vpop.f32.mrb[17].mxu0 }
 0x903   : > { %v1140_v5 = vpop.f32.mrb[18].mxu0 }
 0x904   : > { %1407 = vrot.lane.b32.xlu0 %v1299_v2, %s5931_s27  ;;  %v5031_v7 = vpop.f32.mrb[19].mxu0  ;;  %5035 = vmatmul.mubr.msk.bf16.vlgmr.msra.gmra.mrb[20].mxu0 %vm632_vm2, %v1299_v2 }
 0x905   : > { %5045 = vmatpush3.bf16.xpose.msra.mxu0 %v1416_v6  ;;  %5046 = vmatprep.mubr.msk.bf16.mxu0 %vm5930_vm0, %v5928_v3 }
 0x906   : > { %5056 = vmatprep.subr.bf16.mxu0 %v5928_v3 }
 0x976   : > { %v1408_v8 = vpop.permute.xlu0 %1407 }
 0x977   : > { %5047 = vmatmul.mubr.msk.bf16.vlgmr.msra.gmra.mrb[24].mxu0 %vm632_vm2, %v1408_v8 }
 0x978   : > { %5064 = vmatprep.mubr.msk.bf16.mxu0 %vm5930_vm0, %v5928_v3  ;;  %5057 = vmatpush3.bf16.msra.mxu0 %v5384_v36  ;;  %v5418_v36 = vld [vmem:[#allocation8 + $0x200] ss:$48 sps:$4 sm:$0xff]  }
 0x979   : > { %5058 = vmatprep.subr.bf16.mxu0 %v5928_v3 }
 0x97c   : > { %5059 = vmatpush3.bf16.msra.mxu0 %v5385_v37  ;;  %v5421_v37 = vld [vmem:[#allocation8 + $0x208] ss:$48 sps:$4 sm:$0xff]  }
 0x97d   : > { %5060 = vmatprep.subr.bf16.mxu0 %v5928_v3 }
 0x980   : > { %5061 = vmatpush3.bf16.msra.mxu0 %v5386_v38  ;;  %v5426_v38 = vld [vmem:[#allocation8 + $0x264] ss:$48 sps:$4 sm:$0xff]  }
 0x981   : > { %5062 = vmatprep.subr.bf16.mxu0 %v5928_v3 }
 0x984   : > { %5063 = vmatpush3.bf16.msra.mxu0 %v5387_v51 }
 0x9d7   : > { %v1341_v9 = vpop.f32.mrb[20].mxu0 }
 0x9d8   : > { %v1347_v10 = vmul.f32 0.125, %v1341_v9  ;;  %v5036_v11 = vpop.f32.mrb[21].mxu0 }
 0x9d9   : > { %v1344_v12 = vpop.f32.mrb[22].mxu0  ;;  %v5390_v11 = vld [vmem:[#allocation8 + $0x24] ss:$48 sps:$4 sm:$0xff]  }
 0x9da   : > { %v5037_v13 = vpop.f32.mrb[23].mxu0  ;;  %v1349_v14 = vsel %vm1348_vm4, %v1347_v10, -inf  ;;  %v5391_v12 = vld [vmem:[#allocation8 + $0x28] ss:$48 sps:$4 sm:$0xff]   ;;  %1886 = vmatprep.subr.bf16.mxu0 %v5390_v11 }
 0x9db   : > { %1350 = vmax.xlane.f32.xlu1 %v1349_v14  ;;  %v5393_v13 = vld [vmem:[#allocation8 + $0x2c] ss:$48 sps:$4 sm:$0xff]   ;;  %v5396_v14 = vld [vmem:[#allocation8 + $0x84] ss:$48 sps:$4 sm:$0xff]  }
 0x9dc   : > { %v5451_v11 = vld [vmem:[#allocation10 + $0x98] sm:$0xff]  }
 0xa4a   : > { %v1452_v15 = vpop.f32.mrb[24].mxu0 }
 0xa4b   : > { %v1458_v16 = vmul.f32 0.125, %v1452_v15  ;;  %v5048_v17 = vpop.f32.mrb[25].mxu0  ;;  %v5399_v15 = vld [vmem:[#allocation8 + $0x8c] ss:$48 sps:$4 sm:$0xff]  }
 0xa4c   : > { %v1455_v18 = vpop.f32.mrb[26].mxu0  ;;  %v5397_v17 = vld [vmem:[#allocation8 + $0x88] ss:$48 sps:$4 sm:$0xff]  }
 0xa4d   : > { %v5049_v19 = vpop.f32.mrb[27].mxu0  ;;  %v1459_v20 = vsel %vm1348_vm4, %v1458_v16, -inf  ;;  %v5402_v18 = vld [vmem:[#allocation8 + $0xe4] ss:$48 sps:$4 sm:$0xff]  }
 0xa4e   : > { %1460 = vmax.xlane.f32.xlu0 %v1459_v20  ;;  %v5400_v19 = vld [vmem:[#allocation8 + $0xe0] ss:$48 sps:$4 sm:$0xff]   ;;  %v5403_v20 = vld [vmem:[#allocation8 + $0xe8] ss:$48 sps:$4 sm:$0xff]  }
 0xa68   : > { %v1351_v21 = vpop.xlane.xlu1 %1350 }
 0xa69   : > { %v1352_v22 = vsub.f32 %v1347_v10, %v1351_v21  ;;  %v5388_v10 = vld [vmem:[#allocation8 + $0x20] ss:$48 sps:$4 sm:$0xff]  }
 0xa6b   : > { %v1353_v23 = vmul.f32 1.442695, %v1352_v22 }
 0xa6d   : > { %5644 = vpow2.f32 %v1353_v23 }
 0xa77   : > { %v5645_v24 = vpop.eup %5644 }
 0xa78   : > { %v1355_v26 = vsel %vm1348_vm4, %v5645_v24, 0.0 }
 0xa79   : > { %1356 = vadd.xlane.f32.xlu1 %v1355_v26  ;;  %v5408_v26 = vld [vmem:[#allocation8 + $0x144] ss:$48 sps:$4 sm:$0xff]  }
 0xadb   : > { %v1461_v27 = vpop.xlane.xlu0 %1460 }
 0xadc   : > { %v1462_v28 = vsub.f32 %v1458_v16, %v1461_v27  ;;  %v5394_v16 = vld [vmem:[#allocation8 + $0x80] ss:$48 sps:$4 sm:$0xff]   ;;  %v5411_v27 = vld [vmem:[#allocation8 + $0x14c] ss:$48 sps:$4 sm:$0xff]  }
 0xade   : > { %v1463_v29 = vmul.f32 1.442695, %v1462_v28  ;;  %v5406_v28 = vld [vmem:[#allocation8 + $0x140] ss:$48 sps:$4 sm:$0xff]  }
 0xae0   : > { %5646 = vpow2.f32 %v1463_v29  ;;  %v5409_v29 = vld [vmem:[#allocation8 + $0x148] ss:$48 sps:$4 sm:$0xff]  }
 0xaea   : > { %v5647_v30 = vpop.eup %5646 }
 0xaeb   : > { %v1465_v31 = vsel %vm1348_vm4, %v5647_v30, 0.0 }
 0xaec   : > { %1466 = vadd.xlane.f32.xlu1 %v1465_v31  ;;  %v5414_v31 = vld [vmem:[#allocation8 + $0x1a4] ss:$48 sps:$4 sm:$0xff]  }
 0xafd   : > { %1472 = vrot.lane.b32.xlu1 %v1361_v62, %s5931_s27 }
 0xb06   : > { %v1357_v32 = vpop.xlane.xlu1 %1356 }
 0xb07   : > { %5648 = vrcp.f32 %v1357_v32  ;;  %v5415_v32 = vld [vmem:[#allocation8 + $0x1a8] ss:$48 sps:$4 sm:$0xff]  }
 0xb11   : > { %v5649_v33 = vpop.eup %5648 }
 0xb12   : > { %v1359_v34 = vmul.f32 %v5649_v33, %v5645_v24  ;;  %v5417_v33 = vld [vmem:[#allocation8 + $0x1ac] ss:$48 sps:$4 sm:$0xff]  }
 0xb14   : > { %v1360_v35 = vpack.c.bf16 %v1359_v34, %v1359_v34  ;;  %v5420_v34 = vld [vmem:[#allocation8 + $0x204] ss:$48 sps:$4 sm:$0xff]  }
 0xb16   : > { %5041 = vmatmul.mubr.msk.bf16.vlgmr.msra.gmra.mrb[20].mxu1 %vm1348_vm4, %v1360_v35  ;;  %v5423_v35 = vld [vmem:[#allocation8 + $0x20c] ss:$48 sps:$4 sm:$0xff]  }
 0xb17   : > { %5052 = vmatprep.mubr.msk.bf16.mxu1 %vm5930_vm0, %v5928_v3 }
 0xb79   : > { %v1467_v39 = vpop.xlane.xlu1 %1466 }
 0xb7a   : > { %5650 = vrcp.f32 %v1467_v39  ;;  %v5429_v39 = vld [vmem:[#allocation8 + $0x26c] ss:$48 sps:$4 sm:$0xff]  }
 0xb7d   : > { %v1473_v40 = vpop.permute.xlu1 %1472 }
 0xb7e   : > { %5051 = vmatpush3.bf16.msra.mxu1 %v1473_v40  ;;  %v5424_v40 = vld [vmem:[#allocation8 + $0x260] ss:$48 sps:$4 sm:$0xff]  }
 0xb7f   : > { %5068 = vmatprep.subr.bf16.mxu1 %v5928_v3 }
 0xb84   : > { %v5651_v43 = vpop.eup %5650 }
 0xb85   : > { %v1469_v44 = vmul.f32 %v5651_v43, %v5647_v30  ;;  %v5412_v30 = vld [vmem:[#allocation8 + $0x1a0] ss:$48 sps:$4 sm:$0xff]   ;;  %v5427_v43 = vld [vmem:[#allocation8 + $0x268] ss:$48 sps:$4 sm:$0xff]  }
 0xb87   : > { %v1470_v47 = vpack.c.bf16 %v1469_v44, %v1469_v44  ;;  %v5432_v44 = vld [vmem:[#allocation8 + $0x2c4] ss:$48 sps:$4 sm:$0xff]  }
 0xb89   : > { %5053 = vmatmul.mubr.msk.bf16.vlgmr.msra.gmra.mrb[24].mxu1 %vm1348_vm4, %v1470_v47  ;;  %v5430_v47 = vld [vmem:[#allocation8 + $0x2c0] ss:$48 sps:$4 sm:$0xff]  }
 0xb8a   : > { %5069 = vmatpush3.bf16.msra.mxu1 %v5380_v46  ;;  %5076 = vmatprep.mubr.msk.bf16.mxu1 %vm5930_vm0, %v5928_v3  ;;  %v5435_v46 = vld [vmem:[#allocation8 + $0x2cc] ss:$48 sps:$4 sm:$0xff]  }
 0xb8b   : > { %5070 = vmatprep.subr.bf16.mxu1 %v5928_v3 }
 0xb8e   : > { %5071 = vmatpush3.bf16.msra.mxu1 %v5381_v48  ;;  %v5433_v48 = vld [vmem:[#allocation8 + $0x2c8] ss:$48 sps:$4 sm:$0xff]  }
 0xb8f   : > { %5072 = vmatprep.subr.bf16.mxu1 %v5928_v3 }
 0xb92   : > { %5073 = vmatpush3.bf16.msra.mxu1 %v5382_v49  ;;  %v5436_v49 = vld [vmem:[#allocation10 + $0x40] sm:$0xff]  }
 0xb93   : > { %5074 = vmatprep.subr.bf16.mxu1 %v5928_v3 }
 0xb96   : > { %5075 = vmatpush3.bf16.msra.mxu1 %v5383_v50  ;;  %v5437_v50 = vld [vmem:[#allocation10 + $0xc0] sm:$0xff]  }
 0xb97   : > { %1927 = vmatprep.subr.bf16.mxu1 %v5393_v13  ;;  %v5453_v13 = vld [vmem:[#allocation10 + $0xe0] sm:$0xff]  }
 0xbe9   : > { %v1399_v52 = vpop.f32.mrb[20].mxu1 }
 0xbea   : > { %v1405_v53 = vpack.c.bf16 %v1399_v52, %v1399_v52  ;;  %v5042_v54 = vpop.f32.mrb[21].mxu1 }
 0xbeb   : > { %v1402_v55 = vpop.f32.mrb[22].mxu1 }
 0xbec   : > { %v5043_v56 = vpop.f32.mrb[23].mxu1  ;;  %5077 = vmatmul.mubr.msk.bf16.vlgmr.msra.gmra.mrb[28].mxu1 %vm632_vm2, %v1405_v53  ;;  %v4530_v55 = vld [vmem:[#allocation7 + $0x3] ss:$0 sm:$0xff] }
 0xbed   : > { %1959 = vmatprep.mubr.bf16.mxu1 %v5929_v25  ;;  %1928 = vmatpush1.bf16.msra.mxu1 %v5391_v12  ;;  %v5452_v12 = vld [vmem:[#allocation10 + $0x60] sm:$0xff]  }
 0xbee   : > { %1929 = vmatprep.subr.bf16.mxu1 %v5399_v15  ;;  %v5455_v15 = vld [vmem:[#allocation10 + $0xa0] sm:$0xff]  }
 0xbf1   : > { %1930 = vmatpush1.bf16.msra.mxu1 %v5397_v17  ;;  %v5457_v17 = vld [vmem:[#allocation10 + $0xe8] sm:$0xff]  }
 0xc5c   : > { %v1512_v57 = vpop.f32.mrb[24].mxu1 }
 0xc5d   : > { %v1518_v58 = vpack.c.bf16 %v1512_v57, %v1512_v57  ;;  %v5054_v59 = vpop.f32.mrb[25].mxu1 }
 0xc5e   : > { %v1515_v60 = vpop.f32.mrb[26].mxu1  ;;  %v5439_v59 = vld [vmem:[#allocation10 + $0x80] sm:$0xff]  }
 0xc5f   : > { %v5055_v62 = vpop.f32.mrb[27].mxu1  ;;  %5065 = vmatmul.mubr.msk.bf16.vlgmr.msra.gmra.mrb[28].mxu0 %vm632_vm2, %v1518_v58  ;;  %v5438_v58 = vld [vmem:[#allocation10] sm:$0xff]  }
 0xc60   : > { %1918 = vmatprep.mubr.bf16.mxu0 %v5929_v25  ;;  %1887 = vmatpush1.bf16.msra.mxu0 %v5388_v10  ;;  %v5440_v62 = vld [vmem:[#allocation10 + $0x48] sm:$0xff]   ;;  %v5450_v10 = vld [vmem:[#allocation10 + $0x18] sm:$0xff]  }
 0xc61   : > { %1888 = vmatprep.subr.bf16.mxu0 %v5396_v14  ;;  %v5454_v14 = vld [vmem:[#allocation10 + $0x20] sm:$0xff]  }
 0xc64   : > { %1889 = vmatpush1.bf16.msra.mxu0 %v5394_v16  ;;  %v5456_v16 = vld [vmem:[#allocation10 + $0x68] sm:$0xff]  }
 0xc65   : > { %1890 = vmatprep.subr.bf16.mxu0 %v5402_v18  ;;  %v5458_v18 = vld [vmem:[#allocation10 + $0x28] sm:$0xff]  }
 0xc68   : > { %1891 = vmatpush1.bf16.msra.mxu0 %v5400_v19  ;;  %v5460_v19 = vld [vmem:[#allocation10 + $0x70] sm:$0xff]  }
 0xc69   : > { %1892 = vmatprep.subr.bf16.mxu0 %v5408_v26  ;;  %v5466_v26 = vld [vmem:[#allocation10 + $0x38] sm:$0xff]  }
 0xc6c   : > { %1893 = vmatpush1.bf16.msra.mxu0 %v5406_v28  ;;  %v1706_v28 = vlaneseq }
 0xc6d   : > { %1894 = vmatprep.subr.bf16.mxu0 %v5414_v31 }
 0xc70   : > { %1895 = vmatpush1.bf16.msra.mxu0 %v5412_v30 }
 0xc71   : > { %1896 = vmatprep.subr.bf16.mxu0 %v5420_v34 }
 0xc74   : > { %1897 = vmatpush1.bf16.msra.mxu0 %v5418_v36 }
 0xc75   : > { %1898 = vmatprep.subr.bf16.mxu0 %v5426_v38 }
 0xc78   : > { %1899 = vmatpush1.bf16.msra.mxu0 %v5424_v40 }
 0xc79   : > { %1900 = vmatprep.subr.bf16.mxu0 %v5432_v44 }
 0xc7c   : > { %1901 = vmatpush1.bf16.msra.mxu0 %v5430_v47 }
 0xc7d   : > { %4802 = vmatprep.subr.bf16.mxu0 %v5436_v49 }
 0xcbf   : > { %v1647_v63 = vpop.f32.mrb[28].mxu1 }
 0xcc0   : > { %v5078_v0 = vpop.f32.mrb[29].mxu1 }
 0xcc1   : > { %v1650_v1 = vpop.f32.mrb[30].mxu1  ;;  %v5442_v0 = vld [vmem:[#allocation10 + $0x8] sm:$0xff]  }
 0xcc2   : > { %v5079_v2 = vpop.f32.mrb[31].mxu1  ;;  %v5443_v1 = vld [vmem:[#allocation10 + $0x88] sm:$0xff]  }
 0xcc3   : > { %v5444_v2 = vld [vmem:[#allocation10 + $0x50] sm:$0xff]  }
 0xd32   : > { %v1580_v4 = vpop.f32.mrb[28].mxu0 }
 0xd33   : > { %v1648_v5 = vadd.f32 %v1647_v63, %v1580_v4  ;;  %v5066_v6 = vpop.f32.mrb[29].mxu0  ;;  %v5441_v63 = vld [vmem:[#allocation10 + $0xc8] sm:$0xff]   ;;  %v5445_v4 = vld [vmem:[#allocation10 + $0xd0] sm:$0xff]  }
 0xd34   : > { %v1583_v7 = vpop.f32.mrb[30].mxu0  ;;  %v5447_v6 = vld [vmem:[#allocation10 + $0x90] sm:$0xff]  }
 0xd35   : > { %v6360_v8 = vadd.f32 %v1648_v5, %v6293_v61  ;;  %v5067_v9 = vpop.f32.mrb[31].mxu0  ;;  %v5405_v61 = vld [vmem:[#allocation8 + $0xec] ss:$48 sps:$4 sm:$0xff]   ;;  %v5446_v5 = vld [vmem:[#allocation10 + $0x10] sm:$0xff]  }
 0xd36   : > { %1931 = vmatprep.subr.bf16.mxu1 %v5405_v61  ;;  %v5448_v7 = vld [vmem:[#allocation10 + $0x58] sm:$0xff]   ;;  %v5459_v61 = vld [vmem:[#allocation10 + $0xa8] sm:$0xff]  }
 0xd37   : > { %1655 = vadd.xlane.f32.xlu0 %v6360_v8  ;;  %1932 = vmatpush1.bf16.msra.mxu1 %v5403_v20  ;;  %v5449_v9 = vld [vmem:[#allocation10 + $0xd8] sm:$0xff]   ;;  %v5461_v20 = vld [vmem:[#allocation10 + $0xf0] sm:$0xff]  }
 0xd38   : > { %1933 = vmatprep.subr.bf16.mxu1 %v5411_v27  ;;  %v5467_v27 = vld [vmem:[#allocation10 + $0xb8] sm:$0xff]  }
 0xd3b   : > { %1934 = vmatpush1.bf16.msra.mxu1 %v5409_v29  ;;  %v6365_v29 = vshrl.u32 %v1706_v28, 7  ;;  %v4595_v28 = vld [vmem:[%s6580_s5 + $0x4] ss:$0 sm:$0xff] }
 0xd3c   : > { %1935 = vmatprep.subr.bf16.mxu1 %v5417_v33 }
 0xd3d   : > { %v1708_v30 = vsub.s32 0, %v6365_v29  ;;  %v1716_v31 = vsub.s32 2, %v6365_v29  ;;  %v1712_v33 = vsub.s32 1, %v6365_v29  ;;  %v1720_v34 = vsub.s32 3, %v6365_v29 }
 0xd3f   : > { %1936 = vmatpush1.bf16.msra.mxu1 %v5415_v32  ;;  %v1704_v32 = vld [vmem:[%s6580_s5] sm:$0xf] }
 0xd40   : > { %1937 = vmatprep.subr.bf16.mxu1 %v5423_v35  ;;  %v1709_v35 = vrot.slane %v1704_v32, %v1708_v30  ;;  %v1717_v36 = vrot.slane %v1704_v32, %v1716_v31  ;;  %v1721_v38 = vrot.slane %v1704_v32, %v1720_v34 }
 0xd43   : > { %1938 = vmatpush1.bf16.msra.mxu1 %v5421_v37  ;;  %v1713_v37 = vrot.slane %v1704_v32, %v1712_v33 }
 0xd44   : > { %1939 = vmatprep.subr.bf16.mxu1 %v5429_v39 }
 0xd47   : > { %1940 = vmatpush1.bf16.msra.mxu1 %v5427_v43 }
 0xd48   : > { %1941 = vmatprep.subr.bf16.mxu1 %v5435_v46 }
 0xd4b   : > { %1942 = vmatpush1.bf16.msra.mxu1 %v5433_v48 }
 0xd4c   : > { %4824 = vmatprep.subr.bf16.mxu1 %v5437_v50 }
 0xdc4   : > { %v1656_v21 = vpop.xlane.xlu0 %1655 }
 0xdc5   : > { %v1657_v22 = vmul.f32 0.0078125, %v1656_v21  ;;  %v5462_v21 = vld [vmem:[#allocation10 + $0x30] sm:$0xff]  }
 0xdc7   : > { %v1658_v23 = vsub.f32 %v6360_v8, %v1657_v22  ;;  %v5463_v22 = vld [vmem:[#allocation10 + $0xb0] sm:$0xff]  }
 0xdc9   : > { %v1659_v24 = vmul.f32 %v1658_v23, %v1658_v23 }
 0xdcb   : > { %1660 = vadd.xlane.f32.xlu0 %v1659_v24  ;;  %v5465_v24 = vld [vmem:[#allocation10 + $0xf8] sm:$0xff]  }
 0xe58   : > { %v1661_v51 = vpop.xlane.xlu0 %1660 }
 0xe59   : > { %v1662_v52 = vmul.f32 0.0078125, %v1661_v51 }
 0xe5b   : > { %v1663_v53 = vadd.f32 1e-06, %v1662_v52 }
 0xe5d   : > { %5652 = vrsqrt.f32 %v1663_v53 }
 0xe67   : > { %v5653_v54 = vpop.eup %5652 }
 0xe68   : > { %v1665_v56 = vmul.f32 %v5653_v54, %v1658_v23  ;;  %v5464_v23 = vld [vmem:[#allocation10 + $0x78] sm:$0xff]  }
 0xe6a   : > { %v1670_v57 = vmul.f32 %v4530_v55, %v1665_v56 }
 0xe6c   : > { %v1703_v60 = vpack.c.bf16 %v1670_v57, %v1670_v57 }
 0xe6e   : > { %1919 = vmatmul.mubr.bf16.vlgmr.msra.gmra.mrb[32].mxu0 %v1703_v60  ;;  %1960 = vmatmul.mubr.bf16.vlgmr.msra.gmra.mrb[32].mxu1 %v1703_v60 }
 0xe6f   : > { %4803 = vmatpush3.bf16.msra.mxu0 %v5438_v58  ;;  %4825 = vmatpush3.bf16.msra.mxu1 %v5439_v59 }
 0xe70   : > { %4804 = vmatprep.subr.bf16.mxu0 %v5440_v62  ;;  %4826 = vmatprep.subr.bf16.mxu1 %v5441_v63 }
 0xe73   : > { %4805 = vmatpush3.bf16.msra.mxu0 %v5442_v0  ;;  %4827 = vmatpush3.bf16.msra.mxu1 %v5443_v1 }
 0xe74   : > { %4806 = vmatprep.subr.bf16.mxu0 %v5444_v2  ;;  %4828 = vmatprep.subr.bf16.mxu1 %v5445_v4 }
 0xe77   : > { %4807 = vmatpush3.bf16.msra.mxu0 %v5446_v5  ;;  %4829 = vmatpush3.bf16.msra.mxu1 %v5447_v6 }
 0xe78   : > { %4808 = vmatprep.subr.bf16.mxu0 %v5448_v7  ;;  %4830 = vmatprep.subr.bf16.mxu1 %v5449_v9 }
 0xe7b   : > { %4809 = vmatpush3.bf16.msra.mxu0 %v5450_v10  ;;  %4831 = vmatpush3.bf16.msra.mxu1 %v5451_v11 }
 0xe7c   : > { %4810 = vmatprep.subr.bf16.mxu0 %v5452_v12  ;;  %4832 = vmatprep.subr.bf16.mxu1 %v5453_v13 }
 0xe7f   : > { %4811 = vmatpush3.bf16.msra.mxu0 %v5454_v14  ;;  %4833 = vmatpush3.bf16.msra.mxu1 %v5455_v15 }
 0xe80   : > { %4812 = vmatprep.subr.bf16.mxu0 %v5456_v16  ;;  %4834 = vmatprep.subr.bf16.mxu1 %v5457_v17 }
 0xe83   : > { %4813 = vmatpush3.bf16.msra.mxu0 %v5458_v18  ;;  %4835 = vmatpush3.bf16.msra.mxu1 %v5459_v61 }
 0xe84   : > { %4814 = vmatprep.subr.bf16.mxu0 %v5460_v19  ;;  %4836 = vmatprep.subr.bf16.mxu1 %v5461_v20 }
 0xe87   : > { %4815 = vmatpush3.bf16.msra.mxu0 %v5462_v21  ;;  %4837 = vmatpush3.bf16.msra.mxu1 %v5463_v22 }
 0xe88   : > { %4816 = vmatprep.subr.bf16.mxu0 %v5464_v23  ;;  %4838 = vmatprep.subr.bf16.mxu1 %v5465_v24 }
 0xe8b   : > { %4817 = vmatpush3.bf16.msra.mxu0 %v5466_v26  ;;  %4839 = vmatpush3.bf16.msra.mxu1 %v5467_v27 }
 0xe8c   : > { %5080 = vmatprep.subr.bf16.mxu1 %v5928_v3 }
 0xf41   : > { %v1920_v39 = vpop.f32.mrb[32].mxu0  ;;  %v1961_v40 = vpop.f32.mrb[32].mxu1 }
 0xf42   : > { %v1921_v43 = vadd.f32 %v1920_v39, %v1709_v35  ;;  %v1962_v44 = vadd.f32 %v1961_v40, %v1717_v36  ;;  %v1922_v46 = vpop.f32.mrb[33].mxu0  ;;  %v1963_v47 = vpop.f32.mrb[33].mxu1  ;;  %v5468_v36 = vld [vmem:[#allocation8 + $0x300] ss:$48 sps:$4 sm:$0xff]   ;;  %v5474_v39 = vld [vmem:[#allocation8 + $0x364] ss:$48 sps:$4 sm:$0xff]  }
 0xf43   : > { %v1923_v48 = vadd.f32 %v1922_v46, %v1713_v37  ;;  %v1964_v49 = vadd.f32 %v1963_v47, %v1721_v38  ;;  %v1924_v50 = vpop.f32.mrb[34].mxu0  ;;  %v1965_v51 = vpop.f32.mrb[34].mxu1  ;;  %v5470_v37 = vld [vmem:[#allocation8 + $0x304] ss:$48 sps:$4 sm:$0xff]   ;;  %v5471_v38 = vld [vmem:[#allocation8 + $0x308] ss:$48 sps:$4 sm:$0xff]  }
 0xf44   : > { %v1972_v52 = vmul.f32 0.70710677, %v1921_v43  ;;  %v1974_v53 = vmul.f32 0.70710677, %v1962_v44  ;;  %v1925_v56 = vpop.f32.mrb[35].mxu0  ;;  %v1966_v57 = vpop.f32.mrb[35].mxu1  ;;  %2517 = vmatprep.subr.bf16.mxu0 %v5470_v37 }
 0xf45   : > { %v1973_v54 = vmul.f32 0.70710677, %v1923_v48  ;;  %v1975_v55 = vmul.f32 0.70710677, %v1964_v49  ;;  %v1968_v63 = vmul.f32 0.5, %v1921_v43  ;;  %v1970_v2 = vmul.f32 0.5, %v1962_v44 }
 0xf46   : > { %5654 = verf.f32 %v1972_v52  ;;  %v1969_v4 = vmul.f32 0.5, %v1923_v48  ;;  %v1971_v7 = vmul.f32 0.5, %v1964_v49  ;;  %v5475_v40 = vld [vmem:[#allocation8 + $0x368] ss:$48 sps:$4 sm:$0xff]   ;;  %v5472_v43 = vld [vmem:[#allocation8 + $0x360] ss:$48 sps:$4 sm:$0xff]  }
 0xf47   : > { %5656 = verf.f32 %v1974_v53  ;;  %v5478_v44 = vld [vmem:[#allocation8 + $0x3c4] ss:$48 sps:$4 sm:$0xff]   ;;  %v5479_v46 = vld [vmem:[#allocation8 + $0x3c8] ss:$48 sps:$4 sm:$0xff]   ;;  %v5480_v52 = vld [vmem:[#allocation8 + $0x420] ss:$48 sps:$4 sm:$0xff]  }
 0xf48   : > { %5658 = verf.f32 %v1973_v54  ;;  %v5482_v51 = vld [vmem:[#allocation8 + $0x424] ss:$48 sps:$4 sm:$0xff]   ;;  %v5483_v53 = vld [vmem:[#allocation8 + $0x428] ss:$48 sps:$4 sm:$0xff]  }
 0xf49   : > { %5660 = verf.f32 %v1975_v55  ;;  %v5486_v54 = vld [vmem:[#allocation8 + $0x484] ss:$48 sps:$4 sm:$0xff]   ;;  %v5484_v55 = vld [vmem:[#allocation8 + $0x480] ss:$48 sps:$4 sm:$0xff]   ;;  %v5487_v56 = vld [vmem:[#allocation8 + $0x488] ss:$48 sps:$4 sm:$0xff]  }
 0xf4a   : > { %v5490_v57 = vld [vmem:[#allocation8 + $0x4e4] ss:$48 sps:$4 sm:$0xff]  }
 0xf50   : > { %v5655_v58 = vpop.eup %5654 }
 0xf51   : > { %v5657_v59 = vpop.eup %5656  ;;  %v1980_v60 = vadd.f32 1.0, %v5655_v58  ;;  %v5488_v58 = vld [vmem:[#allocation8 + $0x4e0] ss:$48 sps:$4 sm:$0xff]  }
 0xf52   : > { %v5659_v62 = vpop.eup %5658  ;;  %v1982_v0 = vadd.f32 1.0, %v5657_v59  ;;  %v5491_v59 = vld [vmem:[#allocation8 + $0x4e8] ss:$48 sps:$4 sm:$0xff]  }
 0xf53   : > { %v5661_v1 = vpop.eup %5660  ;;  %v1981_v5 = vadd.f32 1.0, %v5659_v62  ;;  %v1984_v6 = vmul.f32 %v1980_v60, %v1968_v63  ;;  %v5494_v60 = vld [vmem:[#allocation8 + $0x544] ss:$48 sps:$4 sm:$0xff]   ;;  %v5492_v62 = vld [vmem:[#allocation8 + $0x540] ss:$48 sps:$4 sm:$0xff]  }
 0xf54   : > { %v1983_v9 = vadd.f32 1.0, %v5661_v1  ;;  %v1986_v10 = vmul.f32 %v1982_v0, %v1970_v2  ;;  %v5495_v63 = vld [vmem:[#allocation8 + $0x548] ss:$48 sps:$4 sm:$0xff]   ;;  %v5498_v0 = vld [vmem:[#allocation8 + $0x5a4] ss:$48 sps:$4 sm:$0xff]  }
 0xf55   : > { %v1985_v11 = vmul.f32 %v1981_v5, %v1969_v4  ;;  %v2052_v14 = vpack.c.bf16 %v1984_v6, %v1984_v6  ;;  %v5496_v1 = vld [vmem:[#allocation8 + $0x5a0] ss:$48 sps:$4 sm:$0xff]   ;;  %v5499_v2 = vld [vmem:[#allocation8 + $0x5a8] ss:$48 sps:$4 sm:$0xff]  }
 0xf56   : > { %v1987_v12 = vmul.f32 %v1983_v9, %v1971_v7  ;;  %v2054_v16 = vpack.c.bf16 %v1986_v10, %v1986_v10  ;;  %v4596_v9 = vld [vmem:[#allocation7 + $0x4] ss:$0 sm:$0xff] }
 0xf57   : > { %v2053_v13 = vpack.c.bf16 %v1985_v11, %v1985_v11 }
 0xf58   : > { %v2055_v15 = vpack.c.bf16 %v1987_v12, %v1987_v12 }
 0xf59   : > { %2280 = vmatprep.mubr.bf16.mxu0 %v2053_v13 }
 0xf5a   : > { %2320 = vmatprep.mubr.bf16.mxu1 %v2055_v15  ;;  %2281 = vmatmul.mubr.bf16.vlgmr.msra.gmra.mrb[36].mxu0 %v2052_v14 }
 0xf5b   : > { %2321 = vmatmul.mubr.bf16.vlgmr.msra.gmra.mrb[36].mxu1 %v2054_v16  ;;  %2549 = vmatprep.mubr.bf16.mxu0 %v5929_v25 }
 0xf5c   : > { %5096 = vmatprep.mubr.msk.bf16.mxu1 %vm5930_vm0, %v5928_v3  ;;  %5081 = vmatpush3.bf16.msra.mxu1 %v5471_v38 }
 0xf5d   : > { %2518 = vmatpush1.bf16.msra.mxu0 %v5468_v36  ;;  %5082 = vmatprep.subr.bf16.mxu1 %v5928_v3 }
 0xf5e   : > { %2519 = vmatprep.subr.bf16.mxu0 %v5474_v39 }
 0xf60   : > { %5083 = vmatpush3.bf16.msra.mxu1 %v5475_v40 }
 0xf61   : > { %2520 = vmatpush1.bf16.msra.mxu0 %v5472_v43  ;;  %5084 = vmatprep.subr.bf16.mxu1 %v5928_v3 }
 0xf62   : > { %2521 = vmatprep.subr.bf16.mxu0 %v5478_v44 }
 0xf64   : > { %5085 = vmatpush3.bf16.msra.mxu1 %v5479_v46 }
 0xf65   : > { %5086 = vmatprep.subr.bf16.mxu1 %v5928_v3 }
 0xf68   : > { %5087 = vmatpush3.bf16.msra.mxu1 %v5483_v53 }
 0xf69   : > { %5088 = vmatprep.subr.bf16.mxu1 %v5928_v3 }
 0xf6c   : > { %5089 = vmatpush3.bf16.msra.mxu1 %v5487_v56 }
 0xf6d   : > { %5090 = vmatprep.subr.bf16.mxu1 %v5928_v3 }
 0xf70   : > { %5091 = vmatpush3.bf16.msra.mxu1 %v5491_v59 }
 0xf71   : > { %5092 = vmatprep.subr.bf16.mxu1 %v5928_v3 }
 0xf74   : > { %5093 = vmatpush3.bf16.msra.mxu1 %v5495_v63 }
 0xf75   : > { %5094 = vmatprep.subr.bf16.mxu1 %v5928_v3 }
 0xf78   : > { %5095 = vmatpush3.bf16.msra.mxu1 %v5499_v2 }
 0xf79   : > { %5106 = vmatprep.subr.bf16.mxu1 %v5928_v3 }
0x102d   : > { %v4818_v17 = vpop.f32.mrb[36].mxu0 }
0x102e   : > { %v4840_v18 = vpop.f32.mrb[36].mxu1  ;;  %v4819_v61 = vpop.f32.mrb[37].mxu0 }
0x102f   : > { %v4820_v19 = vadd.f32 %v4819_v61, %v4818_v17  ;;  %v4841_v20 = vpop.f32.mrb[37].mxu1  ;;  %v4821_v21 = vpop.f32.mrb[38].mxu0 }
0x1030   : > { %v4842_v22 = vadd.f32 %v4841_v20, %v4840_v18  ;;  %v4843_v23 = vpop.f32.mrb[38].mxu1  ;;  %v4822_v24 = vpop.f32.mrb[39].mxu0 }
0x1031   : > { %v4844_v26 = vpop.f32.mrb[39].mxu1 }
0x1032   : > { %v2323_v27 = vadd.f32 %v4842_v22, %v4820_v19 }
0x1034   : > { %v2328_v32 = vadd.f32 %v2323_v27, %v6360_v8  ;;  %v5476_v8 = vld [vmem:[#allocation8 + $0x3c0] ss:$48 sps:$4 sm:$0xff]  }
0x1035   : > { %2522 = vmatpush1.bf16.msra.mxu0 %v5476_v8 }
0x1036   : > { %v6389_v35 = vadd.f32 %v4595_v28, %v2328_v32  ;;  %2523 = vmatprep.subr.bf16.mxu0 %v5482_v51 }
0x1038   : > { %2339 = vadd.xlane.f32.xlu0 %v6389_v35 }
0x1039   : > { %2524 = vmatpush1.bf16.msra.mxu0 %v5480_v52 }
0x103a   : > { %2525 = vmatprep.subr.bf16.mxu0 %v5486_v54 }
0x103d   : > { %2526 = vmatpush1.bf16.msra.mxu0 %v5484_v55 }
0x103e   : > { %2527 = vmatprep.subr.bf16.mxu0 %v5490_v57 }
0x1041   : > { %2528 = vmatpush1.bf16.msra.mxu0 %v5488_v58 }
0x1042   : > { %2529 = vmatprep.subr.bf16.mxu0 %v5494_v60 }
0x1045   : > { %2530 = vmatpush1.bf16.msra.mxu0 %v5492_v62 }
0x1046   : > { %2531 = vmatprep.subr.bf16.mxu0 %v5498_v0 }
0x1049   : > { %2532 = vmatpush1.bf16.msra.mxu0 %v5496_v1 }
0x104a   : > { %5100 = vmatprep.subr.bf16.mxu0 %v5928_v3 }
0x10c5   : > { %v2340_v47 = vpop.xlane.xlu0 %2339 }
0x10c6   : > { %v2341_v48 = vmul.f32 0.0078125, %v2340_v47 }
0x10c8   : > { %v2342_v49 = vsub.f32 %v6389_v35, %v2341_v48 }
0x10ca   : > { %v2343_v50 = vmul.f32 %v2342_v49, %v2342_v49 }
0x10cc   : > { %2344 = vadd.xlane.f32.xlu0 %v2343_v50 }
0x1159   : > { %v2345_v4 = vpop.xlane.xlu0 %2344 }
0x115a   : > { %v2346_v5 = vmul.f32 0.0078125, %v2345_v4 }
0x115c   : > { %v2347_v6 = vadd.f32 1e-06, %v2346_v5 }
0x115e   : > { %5662 = vrsqrt.f32 %v2347_v6  ;;  %v5500_v6 = vld [vmem:[#allocation8 + $0x30c] ss:$48 sps:$4 sm:$0xff]  }
0x1168   : > { %v5663_v7 = vpop.eup %5662 }
0x1169   : > { %v2349_v10 = vmul.f32 %v5663_v7, %v2342_v49 }
0x116b   : > { %v2354_v11 = vmul.f32 %v4596_v9, %v2349_v10  ;;  %v5501_v9 = vld [vmem:[#allocation8 + $0x36c] ss:$48 sps:$4 sm:$0xff]  }
0x116c   : > { %v5528_v10 = vld [vmem:[#allocation8 + $0x48c] ss:$48 sps:$4 sm:$0xff]  }
0x116d   : > { %v2388_v12 = vpack.c.bf16 %v2354_v11, %v2354_v11  ;;  %v5502_v11 = vld [vmem:[#allocation8 + $0x3cc] ss:$48 sps:$4 sm:$0xff]  }
0x116f   : > { %2550 = vmatmul.mubr.bf16.vlgmr.msra.gmra.mrb[40].mxu0 %v2388_v12  ;;  %5097 = vmatmul.mubr.bf16.vlgmr.msra.gmra.mrb[40].mxu1 %v2388_v12  ;;  %v5529_v12 = vld [vmem:[#allocation8 + $0x4ec] ss:$48 sps:$4 sm:$0xff]  }
0x1170   : > { %5102 = vmatprep.mubr.msk.bf16.mxu0 %vm5930_vm0, %v5928_v3  ;;  %5108 = vmatprep.mubr.msk.bf16.mxu1 %vm5930_vm0, %v5928_v3 }
0x1242   : > { %v2551_v13 = vpop.f32.mrb[40].mxu0  ;;  %v2592_v14 = vpop.f32.mrb[40].mxu1 }
0x1243   : > { %v2614_v15 = vpack.c.bf16 %v2551_v13, %v2551_v13  ;;  %v2675_v16 = vpack.c.bf16 %v2592_v14, %v2592_v14  ;;  %v2553_v17 = vpop.f32.mrb[41].mxu0  ;;  %v5098_v18 = vpop.f32.mrb[41].mxu1  ;;  %v5503_v13 = vld [vmem:[#allocation8 + $0x42c] ss:$48 sps:$4 sm:$0xff]  }
0x1244   : > { %v2615_v61 = vpack.c.bf16 %v2553_v17, %v2553_v17  ;;  %v2555_v19 = vpop.f32.mrb[42].mxu0  ;;  %v2595_v20 = vpop.f32.mrb[42].mxu1  ;;  %v5530_v14 = vld [vmem:[#allocation8 + $0x54c] ss:$48 sps:$4 sm:$0xff]   ;;  %v5504_v18 = vld [vmem:[#allocation8 + $0x314] ss:$48 sps:$4 sm:$0xff]  }
0x1245   : > { %v2680_v21 = vsel %vm697_vm1, %v2675_v16, 0  ;;  %v5099_v22 = vpop.f32.mrb[43].mxu1  ;;  %2724 = vrot.lane.b32.xlu1 %v2614_v15, %s5931_s27  ;;  %v2556_v23 = vpop.f32.mrb[43].mxu0  ;;  %v5509_v20 = vld [vmem:[#allocation8 + $0x378] ss:$48 sps:$4 sm:$0xff]  }
0x1246   : > { %v2620_v24 = vsel %vm632_vm2, %v2615_v61, 0  ;;  %5107 = vmatpush3.bf16.msra.mxu1 %v2680_v21  ;;  %2727 = vrot.lane.b32.xlu0 %v2615_v61, %s5931_s27  ;;  %v5507_v23 = vld [vmem:[#allocation8 + $0x374] ss:$48 sps:$4 sm:$0xff]  }
0x1247   : > { %5101 = vmatpush3.bf16.xpose.msra.mxu0 %v2620_v24  ;;  %5118 = vmatprep.subr.bf16.mxu1 %v5928_v3  ;;  %v5512_v24 = vld [vmem:[#allocation8 + $0x3d8] ss:$48 sps:$4 sm:$0xff]  }
0x1248   : > { %5112 = vmatprep.subr.bf16.mxu0 %v5928_v3 }
0x124e   : > { %5103 = vmatmul.mubr.msk.bf16.vlgmr.msra.gmra.mrb[44].mxu0 %vm632_vm2, %v2614_v15  ;;  %v5506_v15 = vld [vmem:[#allocation8 + $0x318] ss:$48 sps:$4 sm:$0xff]  }
0x124f   : > { %5114 = vmatprep.mubr.msk.bf16.mxu0 %vm5930_vm0, %v5928_v3 }
0x12b7   : > { %v2725_v28 = vpop.permute.xlu1 %2724 }
0x12b8   : > { %v2728_v26 = vpop.permute.xlu0 %2727 }
0x12b9   : > { %v2733_v27 = vsel %vm632_vm2, %v2728_v26, 0  ;;  %v5510_v26 = vld [vmem:[#allocation8 + $0x3d4] ss:$48 sps:$4 sm:$0xff]  }
0x12ba   : > { %5113 = vmatpush3.bf16.xpose.msra.mxu0 %v2733_v27  ;;  %v5515_v27 = vld [vmem:[#allocation8 + $0x438] ss:$48 sps:$4 sm:$0xff]  }
0x12bb   : > { %5124 = vmatprep.subr.bf16.mxu0 %v5928_v3 }
0x12c1   : > { %5115 = vmatmul.mubr.msk.bf16.vlgmr.msra.gmra.mrb[48].mxu0 %vm632_vm2, %v2725_v28  ;;  %v5513_v28 = vld [vmem:[#allocation8 + $0x434] ss:$48 sps:$4 sm:$0xff]  }
0x12c2   : > { %5132 = vmatprep.mubr.msk.bf16.mxu0 %vm5930_vm0, %v5928_v3  ;;  %5125 = vmatpush3.bf16.msra.mxu0 %v5528_v10  ;;  %v5537_v10 = vld [vmem:[#allocation8 + $0x4f0] ss:$48 sps:$4 sm:$0xff]  }
0x12c3   : > { %5126 = vmatprep.subr.bf16.mxu0 %v5928_v3 }
0x12c6   : > { %5127 = vmatpush3.bf16.msra.mxu0 %v5529_v12  ;;  %v5539_v12 = vld [vmem:[#allocation8 + $0x5b0] ss:$48 sps:$4 sm:$0xff]  }
0x12c7   : > { %5128 = vmatprep.subr.bf16.mxu0 %v5928_v3 }
0x12ca   : > { %5129 = vmatpush3.bf16.msra.mxu0 %v5530_v14 }
0x12cb   : > { %5130 = vmatprep.subr.bf16.mxu0 %v5928_v3 }
0x1321   : > { %v2656_v32 = vpop.f32.mrb[44].mxu0 }
0x1322   : > { %v2662_v36 = vmul.f32 0.125, %v2656_v32  ;;  %v5104_v37 = vpop.f32.mrb[45].mxu0  ;;  %v5518_v32 = vld [vmem:[#allocation8 + $0x498] ss:$48 sps:$4 sm:$0xff]  }
0x1323   : > { %v2659_v38 = vpop.f32.mrb[46].mxu0  ;;  %v5521_v37 = vld [vmem:[#allocation8 + $0x4f8] ss:$48 sps:$4 sm:$0xff]  }
0x1324   : > { %v5105_v39 = vpop.f32.mrb[47].mxu0  ;;  %v2663_v40 = vsel %vm680_vm3, %v2662_v36, -inf  ;;  %v5519_v38 = vld [vmem:[#allocation8 + $0x4f4] ss:$48 sps:$4 sm:$0xff]  }
0x1325   : > { %2664 = vmax.xlane.f32.xlu1 %v2663_v40  ;;  %v5524_v39 = vld [vmem:[#allocation8 + $0x558] ss:$48 sps:$4 sm:$0xff]   ;;  %v5522_v40 = vld [vmem:[#allocation8 + $0x554] ss:$48 sps:$4 sm:$0xff]  }
0x1394   : > { %v2769_v43 = vpop.f32.mrb[48].mxu0 }
0x1395   : > { %v2775_v44 = vmul.f32 0.125, %v2769_v43  ;;  %v5116_v46 = vpop.f32.mrb[49].mxu0  ;;  %v5527_v43 = vld [vmem:[#allocation8 + $0x5b8] ss:$48 sps:$4 sm:$0xff]  }
0x1396   : > { %v2772_v8 = vpop.f32.mrb[50].mxu0 }
0x1397   : > { %v5117_v47 = vpop.f32.mrb[51].mxu0  ;;  %v2776_v48 = vsel %vm680_vm3, %v2775_v44, -inf }
0x1398   : > { %2777 = vmax.xlane.f32.xlu0 %v2776_v48 }
0x13b2   : > { %v2665_v49 = vpop.xlane.xlu1 %2664 }
0x13b3   : > { %v2666_v50 = vsub.f32 %v2662_v36, %v2665_v49  ;;  %v5516_v36 = vld [vmem:[#allocation8 + $0x494] ss:$48 sps:$4 sm:$0xff]  }
0x13b5   : > { %v2667_v51 = vmul.f32 1.442695, %v2666_v50 }
0x13b7   : > { %5664 = vpow2.f32 %v2667_v51 }
0x13c1   : > { %v5665_v52 = vpop.eup %5664 }
0x13c2   : > { %v2669_v53 = vsel %vm680_vm3, %v5665_v52, 0.0 }
0x13c3   : > { %2670 = vadd.xlane.f32.xlu1 %v2669_v53 }
0x1425   : > { %v2778_v54 = vpop.xlane.xlu0 %2777 }
0x1426   : > { %v2779_v55 = vsub.f32 %v2775_v44, %v2778_v54  ;;  %v5525_v44 = vld [vmem:[#allocation8 + $0x5b4] ss:$48 sps:$4 sm:$0xff]  }
0x1428   : > { %v2780_v56 = vmul.f32 1.442695, %v2779_v55 }
0x142a   : > { %5666 = vpow2.f32 %v2780_v56 }
0x1434   : > { %v5667_v57 = vpop.eup %5666 }
0x1435   : > { %v2782_v58 = vsel %vm680_vm3, %v5667_v57, 0.0 }
0x1436   : > { %2783 = vadd.xlane.f32.xlu1 %v2782_v58 }
0x1447   : > { %2789 = vrot.lane.b32.xlu1 %v2675_v16, %s5931_s27  ;;  %v5531_v16 = vld [vmem:[#allocation8 + $0x5ac] ss:$48 sps:$4 sm:$0xff]  }
0x1448   : > { %5131 = vmatpush3.bf16.msra.mxu0 %v5531_v16 }
0x1449   : > { %5148 = vmatprep.subr.bf16.mxu0 %v5928_v3 }
0x1450   : > { %v2671_v59 = vpop.xlane.xlu1 %2670 }
0x1451   : > { %5668 = vrcp.f32 %v2671_v59 }
0x145b   : > { %v5669_v60 = vpop.eup %5668 }
0x145c   : > { %v2673_v62 = vmul.f32 %v5669_v60, %v5665_v52 }
0x145e   : > { %v2674_v63 = vpack.c.bf16 %v2673_v62, %v2673_v62 }
0x1460   : > { %5109 = vmatmul.mubr.msk.bf16.vlgmr.msra.gmra.mrb[44].mxu1 %vm680_vm3, %v2674_v63 }
0x1461   : > { %5120 = vmatprep.mubr.msk.bf16.mxu1 %vm5930_vm0, %v5928_v3 }
0x14c3   : > { %v2784_v0 = vpop.xlane.xlu1 %2783 }
0x14c4   : > { %5670 = vrcp.f32 %v2784_v0  ;;  %v5532_v0 = vld [vmem:[#allocation8 + $0x310] ss:$48 sps:$4 sm:$0xff]  }
0x14c7   : > { %v2790_v1 = vpop.permute.xlu1 %2789 }
0x14c8   : > { %v2795_v2 = vsel %vm697_vm1, %v2790_v1, 0  ;;  %v5533_v1 = vld [vmem:[#allocation8 + $0x370] ss:$48 sps:$4 sm:$0xff]  }
0x14c9   : > { %5119 = vmatpush3.bf16.msra.mxu1 %v2795_v2  ;;  %v5534_v2 = vld [vmem:[#allocation8 + $0x3d0] ss:$48 sps:$4 sm:$0xff]  }
0x14ca   : > { %5136 = vmatprep.subr.bf16.mxu1 %v5928_v3 }
0x14ce   : > { %v5671_v4 = vpop.eup %5670 }
0x14cf   : > { %v2786_v5 = vmul.f32 %v5671_v4, %v5667_v57  ;;  %v5535_v4 = vld [vmem:[#allocation8 + $0x430] ss:$48 sps:$4 sm:$0xff]  }
0x14d1   : > { %v2787_v7 = vpack.c.bf16 %v2786_v5, %v2786_v5 }
0x14d3   : > { %5121 = vmatmul.mubr.msk.bf16.vlgmr.msra.gmra.mrb[48].mxu1 %vm680_vm3, %v2787_v7 }
0x14d4   : > { %5137 = vmatpush3.bf16.msra.mxu1 %v5500_v6  ;;  %5144 = vmatprep.mubr.msk.bf16.mxu1 %vm5930_vm0, %v5928_v3 }
0x14d5   : > { %5138 = vmatprep.subr.bf16.mxu1 %v5928_v3 }
0x14d8   : > { %5139 = vmatpush3.bf16.msra.mxu1 %v5501_v9  ;;  %v5536_v9 = vld [vmem:[#allocation8 + $0x490] ss:$48 sps:$4 sm:$0xff]  }
0x14d9   : > { %5140 = vmatprep.subr.bf16.mxu1 %v5928_v3 }
0x14dc   : > { %5141 = vmatpush3.bf16.msra.mxu1 %v5502_v11  ;;  %v5538_v11 = vld [vmem:[#allocation8 + $0x550] ss:$48 sps:$4 sm:$0xff]  }
0x14dd   : > { %5142 = vmatprep.subr.bf16.mxu1 %v5928_v3 }
0x14e0   : > { %5143 = vmatpush3.bf16.msra.mxu1 %v5503_v13 }
0x14e1   : > { %3199 = vmatprep.subr.bf16.mxu1 %v5506_v15 }
0x1533   : > { %v2716_v17 = vpop.f32.mrb[44].mxu1 }
0x1534   : > { %v2722_v61 = vpack.c.bf16 %v2716_v17, %v2716_v17  ;;  %v5110_v19 = vpop.f32.mrb[45].mxu1  ;;  %v4635_v17 = vld [vmem:[#allocation7 + $0x5] ss:$0 sm:$0xff] }
0x1535   : > { %v2719_v21 = vpop.f32.mrb[46].mxu1 }
0x1536   : > { %v5111_v22 = vpop.f32.mrb[47].mxu1  ;;  %5145 = vmatmul.mubr.msk.bf16.vlgmr.msra.gmra.mrb[52].mxu1 %vm632_vm2, %v2722_v61 }
0x1537   : > { %3200 = vmatpush1.bf16.msra.mxu1 %v5504_v18  ;;  %3231 = vmatprep.mubr.bf16.mxu1 %v5929_v25 }
0x1538   : > { %3201 = vmatprep.subr.bf16.mxu1 %v5509_v20 }
0x153b   : > { %3202 = vmatpush1.bf16.msra.mxu1 %v5507_v23 }
0x153c   : > { %3203 = vmatprep.subr.bf16.mxu1 %v5512_v24 }
0x153f   : > { %3204 = vmatpush1.bf16.msra.mxu1 %v5510_v26 }
0x1540   : > { %3205 = vmatprep.subr.bf16.mxu1 %v5515_v27 }
0x1543   : > { %3206 = vmatpush1.bf16.msra.mxu1 %v5513_v28 }
0x1544   : > { %3207 = vmatprep.subr.bf16.mxu1 %v5518_v32 }
0x1547   : > { %3208 = vmatpush1.bf16.msra.mxu1 %v5516_v36 }
0x1548   : > { %3209 = vmatprep.subr.bf16.mxu1 %v5521_v37 }
0x154b   : > { %3210 = vmatpush1.bf16.msra.mxu1 %v5519_v38 }
0x154c   : > { %3211 = vmatprep.subr.bf16.mxu1 %v5524_v39 }
0x154f   : > { %3212 = vmatpush1.bf16.msra.mxu1 %v5522_v40 }
0x1550   : > { %3213 = vmatprep.subr.bf16.mxu1 %v5527_v43 }
0x1553   : > { %3214 = vmatpush1.bf16.msra.mxu1 %v5525_v44 }
0x1554   : > { %5174 = vmatprep.subr.bf16.mxu1 %v5928_v3 }
0x1556   : > { %3232 = vmatmul.mubr.bf16.vlgmr.msra.gmra.mrb[56].mxu1 %v3118_v45 }
0x1557   : > { %5176 = vmatprep.mubr.msk.bf16.mxu1 %vm5930_vm0, %v5928_v3 }
0x15a6   : > { %v2831_v46 = vpop.f32.mrb[48].mxu1 }
0x15a7   : > { %v2837_v8 = vpack.c.bf16 %v2831_v46, %v2831_v46  ;;  %v5122_v47 = vpop.f32.mrb[49].mxu1 }
0x15a8   : > { %v2834_v48 = vpop.f32.mrb[50].mxu1 }
0x15a9   : > { %v5123_v49 = vpop.f32.mrb[51].mxu1  ;;  %5133 = vmatmul.mubr.msk.bf16.vlgmr.msra.gmra.mrb[52].mxu0 %vm632_vm2, %v2837_v8 }
0x15aa   : > { %5164 = vmatprep.mubr.msk.bf16.mxu0 %vm5930_vm0, %v5928_v3  ;;  %5149 = vmatpush3.bf16.msra.mxu0 %v5532_v0  ;;  %v5544_v0 = vld [vmem:[#allocation8 + $0x49c] ss:$48 sps:$4 sm:$0xff]  }
0x15ab   : > { %5150 = vmatprep.subr.bf16.mxu0 %v5928_v3 }
0x15ae   : > { %5151 = vmatpush3.bf16.msra.mxu0 %v5533_v1  ;;  %v5545_v1 = vld [vmem:[#allocation8 + $0x4fc] ss:$48 sps:$4 sm:$0xff]  }
0x15af   : > { %5152 = vmatprep.subr.bf16.mxu0 %v5928_v3 }
0x15b2   : > { %5153 = vmatpush3.bf16.msra.mxu0 %v5534_v2  ;;  %v5546_v2 = vld [vmem:[#allocation8 + $0x55c] ss:$48 sps:$4 sm:$0xff]  }
0x15b3   : > { %5154 = vmatprep.subr.bf16.mxu0 %v5928_v3 }
0x15b6   : > { %5155 = vmatpush3.bf16.msra.mxu0 %v5535_v4 }
0x15b7   : > { %5156 = vmatprep.subr.bf16.mxu0 %v5928_v3 }
0x15ba   : > { %5157 = vmatpush3.bf16.msra.mxu0 %v5536_v9  ;;  %v5541_v9 = vld [vmem:[#allocation8 + $0x37c] ss:$48 sps:$4 sm:$0xff]  }
0x15bb   : > { %5158 = vmatprep.subr.bf16.mxu0 %v5928_v3 }
0x15be   : > { %5159 = vmatpush3.bf16.msra.mxu0 %v5537_v10  ;;  %v5542_v10 = vld [vmem:[#allocation8 + $0x3dc] ss:$48 sps:$4 sm:$0xff]  }
0x15bf   : > { %5160 = vmatprep.subr.bf16.mxu0 %v5928_v3 }
0x15c2   : > { %5161 = vmatpush3.bf16.msra.mxu0 %v5538_v11  ;;  %v5543_v11 = vld [vmem:[#allocation8 + $0x43c] ss:$48 sps:$4 sm:$0xff]  }
0x15c3   : > { %5162 = vmatprep.subr.bf16.mxu0 %v5928_v3 }
0x15c6   : > { %5163 = vmatpush3.bf16.msra.mxu0 %v5539_v12  ;;  %v5547_v12 = vld [vmem:[#allocation8 + $0x5bc] ss:$48 sps:$4 sm:$0xff]  }
0x15c7   : > { %5168 = vmatprep.subr.bf16.mxu0 %v5928_v3 }
0x1609   : > { %v2966_v50 = vpop.f32.mrb[52].mxu1 }
0x160a   : > { %v5146_v51 = vpop.f32.mrb[53].mxu1 }
0x160b   : > { %v2969_v52 = vpop.f32.mrb[54].mxu1 }
0x160c   : > { %v5147_v53 = vpop.f32.mrb[55].mxu1 }
0x1629   : > { %v3233_v54 = vpop.f32.mrb[56].mxu1 }
0x162a   : > { %v3235_v41 = vpop.f32.mrb[57].mxu1 }
0x162b   : > { %v3237_v42 = vpop.f32.mrb[58].mxu1 }
0x162c   : > { %v3259_v45 = vpack.c.bf16 %v3237_v42, %v3233_v54  ;;  %v3239_v55 = vpop.f32.mrb[59].mxu1 }
0x162d   : > { %v6451_v56 = vpack.c.bf16 %v3239_v55, %v3235_v41 }
0x162e   : > { %v3264_v20 = vsel %vm632_vm2, %v3259_v45, 0 }
0x162f   : > { %5175 = vmatpush3.bf16.msra.mxu1 %v6451_v56 }
0x1630   : > { %5186 = vmatprep.subr.bf16.mxu1 %v5928_v3 }
0x167c   : > { %v2899_v57 = vpop.f32.mrb[52].mxu0 }
0x167d   : > { %v2967_v58 = vadd.f32 %v2966_v50, %v2899_v57  ;;  %v5134_v59 = vpop.f32.mrb[53].mxu0 }
0x167e   : > { %v2902_v60 = vpop.f32.mrb[54].mxu0 }
0x167f   : > { %v6456_v62 = vadd.f32 %v2967_v58, %v6389_v35  ;;  %v5135_v63 = vpop.f32.mrb[55].mxu0 }
0x1681   : > { %2974 = vadd.xlane.f32.xlu0 %v6456_v62 }
0x170e   : > { %v2975_v35 = vpop.xlane.xlu0 %2974 }
0x170f   : > { %v2976_v5 = vmul.f32 0.0078125, %v2975_v35 }
0x1711   : > { %v2977_v6 = vsub.f32 %v6456_v62, %v2976_v5 }
0x1713   : > { %v2978_v7 = vmul.f32 %v2977_v6, %v2977_v6 }
0x1715   : > { %2979 = vadd.xlane.f32.xlu0 %v2978_v7 }
0x172b   : > { %3368 = vrot.lane.b32.xlu0 %v3259_v45, %s5931_s27 }
0x17a2   : > { %v2980_v13 = vpop.xlane.xlu0 %2979 }
0x17a3   : > { %v2981_v14 = vmul.f32 0.0078125, %v2980_v13 }
0x17a5   : > { %v2982_v15 = vadd.f32 1e-06, %v2981_v14 }
0x17a6   : > { %v3369_v21 = vpop.permute.xlu0 %3368 }
0x17a7   : > { %5672 = vrsqrt.f32 %v2982_v15  ;;  %v3374_v27 = vsel %vm632_vm2, %v3369_v21, 0 }
0x17b1   : > { %v5673_v16 = vpop.eup %5672 }
0x17b2   : > { %v2984_v18 = vmul.f32 %v5673_v16, %v2977_v6  ;;  %v5540_v6 = vld [vmem:[#allocation8 + $0x31c] ss:$48 sps:$4 sm:$0xff]  }
0x17b4   : > { %v2989_v61 = vmul.f32 %v4635_v17, %v2984_v18 }
0x17b6   : > { %v3013_v19 = vpack.c.bf16 %v2989_v61, %v2989_v61 }
0x17b8   : > { %5165 = vmatmul.mubr.bf16.vlgmr.msra.gmra.mrb[56].mxu0 %v3013_v19 }
0x17b9   : > { %5169 = vmatpush3.bf16.xpose.msra.mxu0 %v3264_v20  ;;  %5170 = vmatprep.mubr.msk.bf16.mxu0 %vm5930_vm0, %v5928_v3 }
0x17ba   : > { %5180 = vmatprep.subr.bf16.mxu0 %v5928_v3 }
0x188b   : > { %v3096_v22 = vpop.f32.mrb[56].mxu0 }
0x188c   : > { %v3258_v23 = vpack.c.bf16 %v3096_v22, %v3096_v22  ;;  %v5166_v24 = vpop.f32.mrb[57].mxu0 }
0x188d   : > { %v3099_v26 = vpop.f32.mrb[58].mxu0 }
0x188e   : > { %3365 = vrot.lane.b32.xlu1 %v3258_v23, %s5931_s27  ;;  %v5167_v28 = vpop.f32.mrb[59].mxu0  ;;  %5171 = vmatmul.mubr.msk.bf16.vlgmr.msra.gmra.mrb[60].mxu0 %vm632_vm2, %v3258_v23 }
0x188f   : > { %5181 = vmatpush3.bf16.xpose.msra.mxu0 %v3374_v27  ;;  %5182 = vmatprep.mubr.msk.bf16.mxu0 %vm5930_vm0, %v5928_v3 }
0x1890   : > { %5192 = vmatprep.subr.bf16.mxu0 %v5928_v3 }
0x1900   : > { %v3366_v32 = vpop.permute.xlu1 %3365 }
0x1901   : > { %5183 = vmatmul.mubr.msk.bf16.vlgmr.msra.gmra.mrb[64].mxu0 %vm632_vm2, %v3366_v32 }
0x1902   : > { %5200 = vmatprep.mubr.msk.bf16.mxu0 %vm5930_vm0, %v5928_v3  ;;  %5193 = vmatpush3.bf16.msra.mxu0 %v5544_v0  ;;  %v5578_v0 = vld [vmem:[#allocation8 + $0x500] ss:$48 sps:$4 sm:$0xff]  }
0x1903   : > { %5194 = vmatprep.subr.bf16.mxu0 %v5928_v3 }
0x1906   : > { %5195 = vmatpush3.bf16.msra.mxu0 %v5545_v1  ;;  %v5581_v1 = vld [vmem:[#allocation8 + $0x508] ss:$48 sps:$4 sm:$0xff]  }
0x1907   : > { %5196 = vmatprep.subr.bf16.mxu0 %v5928_v3 }
0x190a   : > { %5197 = vmatpush3.bf16.msra.mxu0 %v5546_v2  ;;  %v5586_v2 = vld [vmem:[#allocation8 + $0x564] ss:$48 sps:$4 sm:$0xff]  }
0x190b   : > { %5198 = vmatprep.subr.bf16.mxu0 %v5928_v3 }
0x190e   : > { %5199 = vmatpush3.bf16.msra.mxu0 %v5547_v12 }
0x1961   : > { %v3300_v36 = vpop.f32.mrb[60].mxu0 }
0x1962   : > { %v3306_v37 = vmul.f32 0.125, %v3300_v36  ;;  %v5172_v38 = vpop.f32.mrb[61].mxu0 }
0x1963   : > { %v3303_v39 = vpop.f32.mrb[62].mxu0  ;;  %v5548_v38 = vld [vmem:[#allocation8 + $0x320] ss:$48 sps:$4 sm:$0xff]  }
0x1964   : > { %v5173_v40 = vpop.f32.mrb[63].mxu0  ;;  %v3307_v43 = vsel %vm1348_vm4, %v3306_v37, -inf  ;;  %v5550_v39 = vld [vmem:[#allocation8 + $0x324] ss:$48 sps:$4 sm:$0xff]  }
0x1965   : > { %3308 = vmax.xlane.f32.xlu1 %v3307_v43  ;;  %v5551_v40 = vld [vmem:[#allocation8 + $0x328] ss:$48 sps:$4 sm:$0xff]   ;;  %v5553_v43 = vld [vmem:[#allocation8 + $0x32c] ss:$48 sps:$4 sm:$0xff]   ;;  %3845 = vmatprep.subr.bf16.mxu0 %v5550_v39 }
0x1966   : > { %v5611_v39 = vld [vmem:[#allocation10 + $0x198] sm:$0xff]  }
0x19d4   : > { %v3410_v44 = vpop.f32.mrb[64].mxu0 }
0x19d5   : > { %v3416_v46 = vmul.f32 0.125, %v3410_v44  ;;  %v5184_v8 = vpop.f32.mrb[65].mxu0  ;;  %v5556_v44 = vld [vmem:[#allocation8 + $0x384] ss:$48 sps:$4 sm:$0xff]  }
0x19d6   : > { %v3413_v47 = vpop.f32.mrb[66].mxu0  ;;  %v5557_v8 = vld [vmem:[#allocation8 + $0x388] ss:$48 sps:$4 sm:$0xff]  }
0x19d7   : > { %v5185_v48 = vpop.f32.mrb[67].mxu0  ;;  %v3417_v49 = vsel %vm1348_vm4, %v3416_v46, -inf  ;;  %v5562_v47 = vld [vmem:[#allocation8 + $0x3e4] ss:$48 sps:$4 sm:$0xff]  }
0x19d8   : > { %3418 = vmax.xlane.f32.xlu0 %v3417_v49  ;;  %v5560_v48 = vld [vmem:[#allocation8 + $0x3e0] ss:$48 sps:$4 sm:$0xff]   ;;  %v5563_v49 = vld [vmem:[#allocation8 + $0x3e8] ss:$48 sps:$4 sm:$0xff]  }
0x19f2   : > { %v3309_v50 = vpop.xlane.xlu1 %3308 }
0x19f3   : > { %v3310_v51 = vsub.f32 %v3306_v37, %v3309_v50 }
0x19f5   : > { %v3311_v52 = vmul.f32 1.442695, %v3310_v51 }
0x19f7   : > { %5674 = vpow2.f32 %v3311_v52 }
0x1a01   : > { %v5675_v53 = vpop.eup %5674 }
0x1a02   : > { %v3313_v54 = vsel %vm1348_vm4, %v5675_v53, 0.0 }
0x1a03   : > { %3314 = vadd.xlane.f32.xlu1 %v3313_v54  ;;  %v5568_v54 = vld [vmem:[#allocation8 + $0x444] ss:$48 sps:$4 sm:$0xff]  }
0x1a65   : > { %v3419_v41 = vpop.xlane.xlu0 %3418 }
0x1a66   : > { %v3420_v42 = vsub.f32 %v3416_v46, %v3419_v41  ;;  %v5554_v46 = vld [vmem:[#allocation8 + $0x380] ss:$48 sps:$4 sm:$0xff]   ;;  %v5571_v41 = vld [vmem:[#allocation8 + $0x44c] ss:$48 sps:$4 sm:$0xff]  }
0x1a68   : > { %v3421_v45 = vmul.f32 1.442695, %v3420_v42  ;;  %v5566_v42 = vld [vmem:[#allocation8 + $0x440] ss:$48 sps:$4 sm:$0xff]  }
0x1a6a   : > { %5676 = vpow2.f32 %v3421_v45  ;;  %v5569_v45 = vld [vmem:[#allocation8 + $0x448] ss:$48 sps:$4 sm:$0xff]  }
0x1a74   : > { %v5677_v55 = vpop.eup %5676 }
0x1a75   : > { %v3423_v57 = vsel %vm1348_vm4, %v5677_v55, 0.0 }
0x1a76   : > { %3424 = vadd.xlane.f32.xlu1 %v3423_v57  ;;  %v5574_v57 = vld [vmem:[#allocation8 + $0x4a4] ss:$48 sps:$4 sm:$0xff]  }
0x1a87   : > { %3430 = vrot.lane.b32.xlu1 %v6451_v56, %s5931_s27  ;;  %s4299_s27 = scalar_lea.sflag [#allocation4], %s6203_s11 }
0x1a90   : > { %v3315_v58 = vpop.xlane.xlu1 %3314 }
0x1a91   : > { %5678 = vrcp.f32 %v3315_v58  ;;  %v5575_v58 = vld [vmem:[#allocation8 + $0x4a8] ss:$48 sps:$4 sm:$0xff]  }
0x1a9b   : > { %v5679_v59 = vpop.eup %5678 }
0x1a9c   : > { %v3317_v60 = vmul.f32 %v5679_v59, %v5675_v53  ;;  %v5577_v59 = vld [vmem:[#allocation8 + $0x4ac] ss:$48 sps:$4 sm:$0xff]  }
0x1a9e   : > { %v3318_v63 = vpack.c.bf16 %v3317_v60, %v3317_v60  ;;  %v5580_v60 = vld [vmem:[#allocation8 + $0x504] ss:$48 sps:$4 sm:$0xff]  }
0x1aa0   : > { %5177 = vmatmul.mubr.msk.bf16.vlgmr.msra.gmra.mrb[60].mxu1 %vm1348_vm4, %v3318_v63  ;;  %v5583_v63 = vld [vmem:[#allocation8 + $0x50c] ss:$48 sps:$4 sm:$0xff]  }
0x1aa1   : > { %5188 = vmatprep.mubr.msk.bf16.mxu1 %vm5930_vm0, %v5928_v3 }
0x1b03   : > { %v3425_v56 = vpop.xlane.xlu1 %3424 }
0x1b04   : > { %5680 = vrcp.f32 %v3425_v56  ;;  %v5589_v56 = vld [vmem:[#allocation8 + $0x56c] ss:$48 sps:$4 sm:$0xff]  }
0x1b07   : > { %v3431_v4 = vpop.permute.xlu1 %3430 }
0x1b08   : > { %5187 = vmatpush3.bf16.msra.mxu1 %v3431_v4  ;;  %v5584_v4 = vld [vmem:[#allocation8 + $0x560] ss:$48 sps:$4 sm:$0xff]  }
0x1b09   : > { %5204 = vmatprep.subr.bf16.mxu1 %v5928_v3 }
0x1b0e   : > { %v5681_v35 = vpop.eup %5680 }
0x1b0f   : > { %v3427_v5 = vmul.f32 %v5681_v35, %v5677_v55  ;;  %v5572_v55 = vld [vmem:[#allocation8 + $0x4a0] ss:$48 sps:$4 sm:$0xff]   ;;  %v5587_v35 = vld [vmem:[#allocation8 + $0x568] ss:$48 sps:$4 sm:$0xff]  }
0x1b11   : > { %v3428_v7 = vpack.c.bf16 %v3427_v5, %v3427_v5  ;;  %v5592_v5 = vld [vmem:[#allocation8 + $0x5c4] ss:$48 sps:$4 sm:$0xff]  }
0x1b13   : > { %5189 = vmatmul.mubr.msk.bf16.vlgmr.msra.gmra.mrb[64].mxu1 %vm1348_vm4, %v3428_v7  ;;  %v5590_v7 = vld [vmem:[#allocation8 + $0x5c0] ss:$48 sps:$4 sm:$0xff]  }
0x1b14   : > { %5205 = vmatpush3.bf16.msra.mxu1 %v5540_v6  ;;  %5212 = vmatprep.mubr.msk.bf16.mxu1 %vm5930_vm0, %v5928_v3  ;;  %v5595_v6 = vld [vmem:[#allocation8 + $0x5cc] ss:$48 sps:$4 sm:$0xff]  }
0x1b15   : > { %5206 = vmatprep.subr.bf16.mxu1 %v5928_v3 }
0x1b18   : > { %5207 = vmatpush3.bf16.msra.mxu1 %v5541_v9  ;;  %v5593_v9 = vld [vmem:[#allocation8 + $0x5c8] ss:$48 sps:$4 sm:$0xff]  }
0x1b19   : > { %5208 = vmatprep.subr.bf16.mxu1 %v5928_v3 }
0x1b1c   : > { %5209 = vmatpush3.bf16.msra.mxu1 %v5542_v10  ;;  %v5596_v10 = vld [vmem:[#allocation10 + $0x140] sm:$0xff]  }
0x1b1d   : > { %5210 = vmatprep.subr.bf16.mxu1 %v5928_v3 }
0x1b20   : > { %5211 = vmatpush3.bf16.msra.mxu1 %v5543_v11  ;;  %v5597_v11 = vld [vmem:[#allocation10 + $0x1c0] sm:$0xff]  }
0x1b21   : > { %3886 = vmatprep.subr.bf16.mxu1 %v5553_v43  ;;  %v5613_v43 = vld [vmem:[#allocation10 + $0x1e0] sm:$0xff]  }
0x1b73   : > { %v3357_v13 = vpop.f32.mrb[60].mxu1 }
0x1b74   : > { %v3363_v14 = vpack.c.bf16 %v3357_v13, %v3357_v13  ;;  %v5178_v15 = vpop.f32.mrb[61].mxu1 }
0x1b75   : > { %v3360_v16 = vpop.f32.mrb[62].mxu1 }
0x1b76   : > { %v5179_v17 = vpop.f32.mrb[63].mxu1  ;;  %5213 = vmatmul.mubr.msk.bf16.vlgmr.msra.gmra.mrb[68].mxu1 %vm632_vm2, %v3363_v14  ;;  %v4675_v16 = vld [vmem:[#allocation7 + $0x7] ss:$0 sm:$0xff] }
0x1b77   : > { %3918 = vmatprep.mubr.bf16.mxu1 %v5929_v25  ;;  %3887 = vmatpush1.bf16.msra.mxu1 %v5551_v40  ;;  %v5612_v40 = vld [vmem:[#allocation10 + $0x160] sm:$0xff]  }
0x1be6   : > { %v3470_v18 = vpop.f32.mrb[64].mxu1 }
0x1be7   : > { %v3476_v61 = vpack.c.bf16 %v3470_v18, %v3470_v18  ;;  %v5190_v19 = vpop.f32.mrb[65].mxu1 }
0x1be8   : > { %v3473_v20 = vpop.f32.mrb[66].mxu1  ;;  %v5599_v19 = vld [vmem:[#allocation10 + $0x180] sm:$0xff]  }
0x1be9   : > { %v5191_v21 = vpop.f32.mrb[67].mxu1  ;;  %5201 = vmatmul.mubr.msk.bf16.vlgmr.msra.gmra.mrb[68].mxu0 %vm632_vm2, %v3476_v61  ;;  %v5598_v61 = vld [vmem:[#allocation10 + $0x100] sm:$0xff]  }
0x1bea   : > { %3877 = vmatprep.mubr.bf16.mxu0 %v5929_v25  ;;  %v5559_v25 = vld [vmem:[#allocation8 + $0x38c] ss:$48 sps:$4 sm:$0xff]   ;;  %3846 = vmatpush1.bf16.msra.mxu0 %v5548_v38 }
0x1beb   : > { %3847 = vmatprep.subr.bf16.mxu0 %v5556_v44  ;;  %3888 = vmatprep.subr.bf16.mxu1 %v5559_v25  ;;  %v5600_v21 = vld [vmem:[#allocation10 + $0x148] sm:$0xff]   ;;  %v5610_v38 = vld [vmem:[#allocation10 + $0x118] sm:$0xff]   ;;  %v5614_v44 = vld [vmem:[#allocation10 + $0x120] sm:$0xff]  }
0x1bec   : > { %3889 = vmatpush1.bf16.msra.mxu1 %v5557_v8  ;;  %v5615_v25 = vld [vmem:[#allocation10 + $0x1a0] sm:$0xff]   ;;  %v5617_v8 = vld [vmem:[#allocation10 + $0x1e8] sm:$0xff]  }
0x1bee   : > { %3848 = vmatpush1.bf16.msra.mxu0 %v5554_v46  ;;  %v5616_v46 = vld [vmem:[#allocation10 + $0x168] sm:$0xff]  }
0x1bef   : > { %3849 = vmatprep.subr.bf16.mxu0 %v5562_v47  ;;  %v5618_v47 = vld [vmem:[#allocation10 + $0x128] sm:$0xff]  }
0x1bf2   : > { %3850 = vmatpush1.bf16.msra.mxu0 %v5560_v48  ;;  %v5620_v48 = vld [vmem:[#allocation10 + $0x170] sm:$0xff]  }
0x1bf3   : > { %3851 = vmatprep.subr.bf16.mxu0 %v5568_v54  ;;  %v5626_v54 = vld [vmem:[#allocation10 + $0x138] sm:$0xff]  }
0x1bf6   : > { %3852 = vmatpush1.bf16.msra.mxu0 %v5566_v42  ;;  %v4676_v42 = vld [vmem:[%s6580_s5 + $0x5] sm:$0xf] }
0x1bf7   : > { %3853 = vmatprep.subr.bf16.mxu0 %v5574_v57  ;;  %v3672_v57 = vrot.slane %v4676_v42, %v1712_v33 }
0x1bfa   : > { %3854 = vmatpush1.bf16.msra.mxu0 %v5572_v55  ;;  %v3676_v55 = vrot.slane %v4676_v42, %v1716_v31 }
0x1bfb   : > { %3855 = vmatprep.subr.bf16.mxu0 %v5580_v60 }
0x1bfe   : > { %3856 = vmatpush1.bf16.msra.mxu0 %v5578_v0 }
0x1bff   : > { %3857 = vmatprep.subr.bf16.mxu0 %v5586_v2 }
0x1c02   : > { %3858 = vmatpush1.bf16.msra.mxu0 %v5584_v4 }
0x1c03   : > { %3859 = vmatprep.subr.bf16.mxu0 %v5592_v5 }
0x1c06   : > { %3860 = vmatpush1.bf16.msra.mxu0 %v5590_v7 }
0x1c07   : > { %4900 = vmatprep.subr.bf16.mxu0 %v5596_v10 }
0x1c49   : > { %v3605_v3 = vpop.f32.mrb[68].mxu1 }
0x1c4a   : > { %v5214_v22 = vpop.f32.mrb[69].mxu1 }
0x1c4b   : > { %v3608_v23 = vpop.f32.mrb[70].mxu1  ;;  %v5602_v22 = vld [vmem:[#allocation10 + $0x108] sm:$0xff]  }
0x1c4c   : > { %v5215_v24 = vpop.f32.mrb[71].mxu1  ;;  %v5603_v23 = vld [vmem:[#allocation10 + $0x188] sm:$0xff]  }
0x1c4d   : > { %v5604_v24 = vld [vmem:[#allocation10 + $0x150] sm:$0xff]  }
0x1cbc   : > { %v3538_v26 = vpop.f32.mrb[68].mxu0 }
0x1cbd   : > { %v3606_v27 = vadd.f32 %v3605_v3, %v3538_v26  ;;  %v5202_v28 = vpop.f32.mrb[69].mxu0  ;;  %v5601_v3 = vld [vmem:[#allocation10 + $0x1c8] sm:$0xff]   ;;  %v5605_v26 = vld [vmem:[#allocation10 + $0x1d0] sm:$0xff]  }
0x1cbe   : > { %v3541_v32 = vpop.f32.mrb[70].mxu0  ;;  %v5607_v28 = vld [vmem:[#allocation10 + $0x190] sm:$0xff]  }
0x1cbf   : > { %v6506_v36 = vadd.f32 %v3606_v27, %v6456_v62  ;;  %v5203_v37 = vpop.f32.mrb[71].mxu0  ;;  %v5565_v62 = vld [vmem:[#allocation8 + $0x3ec] ss:$48 sps:$4 sm:$0xff]   ;;  %v5606_v27 = vld [vmem:[#allocation10 + $0x110] sm:$0xff]  }
0x1cc0   : > { %3890 = vmatprep.subr.bf16.mxu1 %v5565_v62  ;;  %v5608_v32 = vld [vmem:[#allocation10 + $0x158] sm:$0xff]   ;;  %v5619_v62 = vld [vmem:[#allocation10 + $0x1a8] sm:$0xff]  }
0x1cc1   : > { %3613 = vadd.xlane.f32.xlu0 %v6506_v36  ;;  %3891 = vmatpush1.bf16.msra.mxu1 %v5563_v49  ;;  %v5609_v37 = vld [vmem:[#allocation10 + $0x1d8] sm:$0xff]   ;;  %v5621_v49 = vld [vmem:[#allocation10 + $0x1f0] sm:$0xff]  }
0x1cc2   : > { %3892 = vmatprep.subr.bf16.mxu1 %v5571_v41  ;;  %v5627_v41 = vld [vmem:[#allocation10 + $0x1b8] sm:$0xff]  }
0x1cc5   : > { %3893 = vmatpush1.bf16.msra.mxu1 %v5569_v45  ;;  %v3668_v45 = vrot.slane %v4676_v42, %v1708_v30 }
0x1cc6   : > { %3894 = vmatprep.subr.bf16.mxu1 %v5577_v59 }
0x1cc9   : > { %3895 = vmatpush1.bf16.msra.mxu1 %v5575_v58  ;;  %v3680_v58 = vrot.slane %v4676_v42, %v1720_v34 }
0x1cca   : > { %3896 = vmatprep.subr.bf16.mxu1 %v5583_v63 }
0x1ccd   : > { %3897 = vmatpush1.bf16.msra.mxu1 %v5581_v1 }
0x1cce   : > { %3898 = vmatprep.subr.bf16.mxu1 %v5589_v56 }
0x1cd1   : > { %3899 = vmatpush1.bf16.msra.mxu1 %v5587_v35 }
0x1cd2   : > { %3900 = vmatprep.subr.bf16.mxu1 %v5595_v6 }
0x1cd5   : > { %3901 = vmatpush1.bf16.msra.mxu1 %v5593_v9 }
0x1cd6   : > { %4922 = vmatprep.subr.bf16.mxu1 %v5597_v11 }
0x1d4e   : > { %v3614_v50 = vpop.xlane.xlu0 %3613 }
0x1d4f   : > { %v3615_v51 = vmul.f32 0.0078125, %v3614_v50  ;;  %v5622_v50 = vld [vmem:[#allocation10 + $0x130] sm:$0xff]  }
0x1d51   : > { %v3616_v52 = vsub.f32 %v6506_v36, %v3615_v51  ;;  %v5623_v51 = vld [vmem:[#allocation10 + $0x1b0] sm:$0xff]  }
0x1d53   : > { %v3617_v53 = vmul.f32 %v3616_v52, %v3616_v52 }
0x1d55   : > { %3618 = vadd.xlane.f32.xlu0 %v3617_v53  ;;  %v5625_v53 = vld [vmem:[#allocation10 + $0x1f8] sm:$0xff]  }
0x1de2   : > { %v3619_v12 = vpop.xlane.xlu0 %3618 }
0x1de3   : > { %v3620_v13 = vmul.f32 0.0078125, %v3619_v12 }
0x1de5   : > { %v3621_v14 = vadd.f32 1e-06, %v3620_v13 }
0x1de7   : > { %5682 = vrsqrt.f32 %v3621_v14 }
0x1df1   : > { %v5683_v15 = vpop.eup %5682 }
0x1df2   : > { %v3623_v17 = vmul.f32 %v5683_v15, %v3616_v52  ;;  %v5624_v52 = vld [vmem:[#allocation10 + $0x178] sm:$0xff]  }
0x1df4   : > { %v3628_v18 = vmul.f32 %v4675_v16, %v3623_v17 }
0x1df6   : > { %v3661_v20 = vpack.c.bf16 %v3628_v18, %v3628_v18 }
0x1df8   : > { %3878 = vmatmul.mubr.bf16.vlgmr.msra.gmra.mrb[72].mxu0 %v3661_v20  ;;  %3919 = vmatmul.mubr.bf16.vlgmr.msra.gmra.mrb[72].mxu1 %v3661_v20 }
0x1df9   : > { %4901 = vmatpush3.bf16.msra.mxu0 %v5598_v61  ;;  %4923 = vmatpush3.bf16.msra.mxu1 %v5599_v19 }
0x1dfa   : > { %4902 = vmatprep.subr.bf16.mxu0 %v5600_v21  ;;  %4924 = vmatprep.subr.bf16.mxu1 %v5601_v3 }
0x1dfd   : > { %4903 = vmatpush3.bf16.msra.mxu0 %v5602_v22  ;;  %4925 = vmatpush3.bf16.msra.mxu1 %v5603_v23 }
0x1dfe   : > { %4904 = vmatprep.subr.bf16.mxu0 %v5604_v24  ;;  %4926 = vmatprep.subr.bf16.mxu1 %v5605_v26 }
0x1e01   : > { %4905 = vmatpush3.bf16.msra.mxu0 %v5606_v27  ;;  %4927 = vmatpush3.bf16.msra.mxu1 %v5607_v28 }
0x1e02   : > { %4906 = vmatprep.subr.bf16.mxu0 %v5608_v32  ;;  %4928 = vmatprep.subr.bf16.mxu1 %v5609_v37 }
0x1e05   : > { %4907 = vmatpush3.bf16.msra.mxu0 %v5610_v38  ;;  %4929 = vmatpush3.bf16.msra.mxu1 %v5611_v39 }
0x1e06   : > { %4908 = vmatprep.subr.bf16.mxu0 %v5612_v40  ;;  %4930 = vmatprep.subr.bf16.mxu1 %v5613_v43 }
0x1e09   : > { %4909 = vmatpush3.bf16.msra.mxu0 %v5614_v44  ;;  %4931 = vmatpush3.bf16.msra.mxu1 %v5615_v25 }
0x1e0a   : > { %4910 = vmatprep.subr.bf16.mxu0 %v5616_v46  ;;  %4932 = vmatprep.subr.bf16.mxu1 %v5617_v8  ;;  %v4742_v8 = vld [vmem:[%s6580_s5 + $0x9] ss:$0 sm:$0xff] }
0x1e0d   : > { %4911 = vmatpush3.bf16.msra.mxu0 %v5618_v47  ;;  %4933 = vmatpush3.bf16.msra.mxu1 %v5619_v62 }
0x1e0e   : > { %4912 = vmatprep.subr.bf16.mxu0 %v5620_v48  ;;  %4934 = vmatprep.subr.bf16.mxu1 %v5621_v49 }
0x1e11   : > { %4913 = vmatpush3.bf16.msra.mxu0 %v5622_v50  ;;  %4935 = vmatpush3.bf16.msra.mxu1 %v5623_v51 }
0x1e12   : > { %4914 = vmatprep.subr.bf16.mxu0 %v5624_v52  ;;  %4936 = vmatprep.subr.bf16.mxu1 %v5625_v53 }
0x1e15   : > { %4915 = vmatpush3.bf16.msra.mxu0 %v5626_v54  ;;  %4937 = vmatpush3.bf16.msra.mxu1 %v5627_v41 }
0x1ecb   : > { %v3879_v59 = vpop.f32.mrb[72].mxu0  ;;  %v3920_v60 = vpop.f32.mrb[72].mxu1 }
0x1ecc   : > { %v3880_v63 = vadd.f32 %v3879_v59, %v3668_v45  ;;  %v3921_v0 = vadd.f32 %v3920_v60, %v3676_v55  ;;  %v3881_v1 = vpop.f32.mrb[73].mxu0  ;;  %v3922_v2 = vpop.f32.mrb[73].mxu1 }
0x1ecd   : > { %v3882_v56 = vadd.f32 %v3881_v1, %v3672_v57  ;;  %v3923_v4 = vadd.f32 %v3922_v2, %v3680_v58  ;;  %v3883_v35 = vpop.f32.mrb[74].mxu0  ;;  %v3924_v5 = vpop.f32.mrb[74].mxu1 }
0x1ece   : > { %v3931_v30 = vmul.f32 0.70710677, %v3880_v63  ;;  %v3933_v6 = vmul.f32 0.70710677, %v3921_v0  ;;  %v3884_v9 = vpop.f32.mrb[75].mxu0  ;;  %v3925_v33 = vpop.f32.mrb[75].mxu1 }
0x1ecf   : > { %v3932_v7 = vmul.f32 0.70710677, %v3882_v56  ;;  %v3934_v31 = vmul.f32 0.70710677, %v3923_v4  ;;  %v3927_v12 = vmul.f32 0.5, %v3880_v63  ;;  %v3929_v15 = vmul.f32 0.5, %v3921_v0 }
0x1ed0   : > { %5684 = verf.f32 %v3931_v30  ;;  %v3928_v16 = vmul.f32 0.5, %v3882_v56  ;;  %v3930_v61 = vmul.f32 0.5, %v3923_v4 }
0x1ed1   : > { %5686 = verf.f32 %v3933_v6 }
0x1ed2   : > { %5688 = verf.f32 %v3932_v7 }
0x1ed3   : > { %5690 = verf.f32 %v3934_v31 }
0x1eda   : > { %v5685_v29 = vpop.eup %5684 }
0x1edb   : > { %v5687_v34 = vpop.eup %5686  ;;  %v3939_v10 = vadd.f32 1.0, %v5685_v29 }
0x1edc   : > { %v5689_v11 = vpop.eup %5688  ;;  %v3941_v13 = vadd.f32 1.0, %v5687_v34 }
0x1edd   : > { %v5691_v14 = vpop.eup %5690  ;;  %v3940_v17 = vadd.f32 1.0, %v5689_v11  ;;  %v3943_v18 = vmul.f32 %v3939_v10, %v3927_v12 }
0x1ede   : > { %v3942_v19 = vadd.f32 1.0, %v5691_v14  ;;  %v3945_v20 = vmul.f32 %v3941_v13, %v3929_v15 }
0x1edf   : > { %v3944_v21 = vmul.f32 %v3940_v17, %v3928_v16  ;;  %v4012_v23 = vpack.c.bf16 %v3943_v18, %v3943_v18 }
0x1ee0   : > { %v3946_v3 = vmul.f32 %v3942_v19, %v3930_v61  ;;  %v4014_v26 = vpack.c.bf16 %v3945_v20, %v3945_v20 }
0x1ee1   : > { %v4013_v22 = vpack.c.bf16 %v3944_v21, %v3944_v21 }
0x1ee2   : > { %v4015_v24 = vpack.c.bf16 %v3946_v3, %v3946_v3 }
0x1ee3   : > { %4240 = vmatprep.mubr.bf16.mxu0 %v4013_v22 }
0x1ee4   : > { %4280 = vmatprep.mubr.bf16.mxu1 %v4015_v24  ;;  %4241 = vmatmul.mubr.bf16.vlgmr.msra.gmra.mrb[76].mxu0 %v4012_v23 }
0x1ee5   : > { %4281 = vmatmul.mubr.bf16.vlgmr.msra.gmra.mrb[76].mxu1 %v4014_v26 }
0x1fb7   : > { %v4916_v27 = vpop.f32.mrb[76].mxu0 }
0x1fb8   : > { %v4938_v28 = vpop.f32.mrb[76].mxu1  ;;  %v4917_v32 = vpop.f32.mrb[77].mxu0 }
0x1fb9   : > { %v4918_v37 = vadd.f32 %v4917_v32, %v4916_v27  ;;  %v4939_v38 = vpop.f32.mrb[77].mxu1  ;;  %v4919_v39 = vpop.f32.mrb[78].mxu0 }
0x1fba   : > { %v4940_v40 = vadd.f32 %v4939_v38, %v4938_v28  ;;  %v4941_v43 = vpop.f32.mrb[78].mxu1  ;;  %v4920_v44 = vpop.f32.mrb[79].mxu0 }
0x1fbb   : > { %v4942_v25 = vpop.f32.mrb[79].mxu1 }
0x1fbc   : > { %v4283_v46 = vadd.f32 %v4940_v40, %v4918_v37 }
0x1fbe   : > { %v4288_v47 = vadd.f32 %v4283_v46, %v6506_v36 }
0x1fc0   : > { %v4296_v62 = vadd.f32 %v4742_v8, %v4288_v47 }
0x1fc2   : > { %4297 = vst [vmem:[%s349_s19] sm:$0xff] %v4296_v62 }
0x1fc3   : > { %5850 = shalt.err (!%p5847_p3)
}
0x1fc4   : > { %s5851_s11 = scalar_lea.hbm %s6531_s16, 128  ;;  %s5855_s15 = scalar_lea.hbm %s6581_s6, 256 }
0x1fc5   : > { %p5852_p9 = scmp.ne.s32.totalorder %s6531_s16, %s5851_s11  ;;  %p5856_p7 = scmp.lt.u32.totalorder %s6531_s16, %s6581_s6 }
0x1fc6   : > { %p5857_p12 = scmp.lt.u32.totalorder %s5855_s15, %s5851_s11  ;;  %p5859_p2 = scmp.lt.u32.totalorder %s5851_s11, %s6531_s16 }
0x1fc7   : > { %p5853_p13 = pnand %p5852_p9, %p6116_p5 }
0x1fc8   : > { %p5858_p1 = por %p5857_p12, %p5856_p7 }
0x1fc9   : > { %p5854_p11 = pneg %p5853_p13 }
0x1fca   : > { %p5860_p4 = por %p5859_p2, %p5858_p1 }
0x1fcc   : > { %p5861_p0 = pnand %p5860_p4, %p5854_p11 }
0x1fce   : > { %5864 = shalt.err (!%p5861_p0)
}
0x1fcf   : > { %5232 = dma.vmem_to_hbm [thread:$0]  (%p6116_p5), %s6533_s29, 128, %s6531_s16, %s4299_s27  }
0x1fd0 PF: > { %s4324_s7 = sand.u32 1, %s5903_s21   ;;  %p6607_p8 = scmp.ne.s32.totalorder %s6590_s28, 0 }
0x1fd1   : > { %p6608_p6 = scmp.ge.s32.totalorder %s5915_s24, 2  ;;  %s4325_s10 = scalar_lea.sflag [#allocation4], %s4324_s7 }
0x1fd3   : > { %p5252_p10 = pnand %p6608_p6, %p6607_p8 }
0x1fd5   : > { %5898 = dma.done.wait (!%p5252_p10), %s4325_s10, 128  }
0x1fd6   : > { %5900 = vsyncadd (!%p5252_p10), %s4325_s10, 4294967168  ;;  %p23_p3 = scmp.ge.s32.totalorder %s6081_s14, 4   ;;  %s6609_s21 = smov %s5907_s22 }
0x1fd7   : > { %s6610_s22 = smov %s5911_s23  ;;  %s6611_s23 = smov %s6112_s30 }
0x1fd8   : > { %s6612_s24 = smov %s6081_s14  ;;  %25 = sbr.rel (!%p23_p3) target bundleno = 11 (0xb), region = 118 }
0x1fdf   :  { %4330 = vsyncpa [#allocation3], 1 }
0x1fe0   :  { %4332 = vsyncpa [#allocation3 + $0x1], 1 }
0x1fe1   :  { %4333 = vsyncpa [#allocation6], 1 }
0x1fe2   :  { %4335 = vsyncpa [#allocation6 + $0x1], 1 }
0x1fe3   :  { %4336 = vsyncpa [#allocation9], 1 }
0x1fe4   :  { %4337 = vsyncpa [#allocation4], 1 }
0x1fe5   :  { %4339 = vsyncpa [#allocation4 + $0x1], 1 }

</bundles_post_ra>
